<compile_context>
chip_gen: v6e
topology: v6e:2x2x1
jax: 0.10.0
libtpu: 0.0.40
codegen_flags: <defaults>
</compile_context>

<pallas_src>
import functools
import math

import jax
import jax.numpy as jnp
from jax.experimental import pallas as pl
from jax.experimental.pallas import tpu as pltpu

EPS = 1e-5                   # PyTorch BatchNorm2d default eps
ACT_DTYPE = jnp.bfloat16     # activation storage dtype between kernels

_VMEM_LIMIT = None


def _vmem_limit_bytes():
    """Generation-dependent scoped-VMEM cap (v7x: 64 MiB phys -> 32 MiB;
    v5e/v6e: 128 MiB phys -> 96 MiB)."""
    global _VMEM_LIMIT
    if _VMEM_LIMIT is None:
        cap = 128 << 20
        try:
            cap = int(getattr(pltpu.get_tpu_info(), "vmem_capacity_bytes", cap))
        except Exception:
            pass
        _VMEM_LIMIT = (32 << 20) if cap <= (64 << 20) else (96 << 20)
    return _VMEM_LIMIT


def _cparams(*sem):
    return pltpu.CompilerParams(dimension_semantics=sem,
                                vmem_limit_bytes=_vmem_limit_bytes())


def bn_affine(c):
    # eval-mode BatchNorm folded into per-channel scale/shift (gamma=1, beta=0,
    # running_mean=0, running_var=1 per DCIN.__init__).
    gamma = jnp.ones((c,), jnp.float32)
    beta = jnp.zeros((c,), jnp.float32)
    mean = jnp.zeros((c,), jnp.float32)
    var = jnp.ones((c,), jnp.float32)
    scale = gamma / jnp.sqrt(var + EPS)
    shift = beta - mean * scale
    return scale.reshape(1, c), shift.reshape(1, c)


# ---------------------------------------------------------------- conv helpers
def _edge_masks(W, HW):
    rr = jax.lax.broadcasted_iota(jnp.int32, (HW, 1), 0)
    return (rr % W) != 0, (rr % W) != (W - 1)


def _tap_patches(xp, W, HW, not_left, not_right):
    """xp: row-padded bf16 slab (HW + 2W + 2, C).  Returns the 9 row-shifted
    windows lane-concatenated into a single (HW, 9*C) slab (im2col in VMEM)."""
    wins = []
    for t in range(9):
        di, dj = divmod(t, 3)
        start = di * W + dj                       # static offsets
        win = xp[start:start + HW, :]
        if dj == 0:                               # left tap would wrap rows
            win = jnp.where(not_left, win, jnp.zeros_like(win))
        elif dj == 2:                             # right tap would wrap rows
            win = jnp.where(not_right, win, jnp.zeros_like(win))
        wins.append(win)
    return jnp.concatenate(wins, axis=-1)


def _pad_rows(x, W):
    zrow = jnp.zeros((W + 1, x.shape[-1]), x.dtype)
    return jnp.concatenate([zrow, x, zrow], axis=0)


# ------------------------------------------------ conv0 + BN + ReLU + MaxPool
def _conv0_pool_kernel(x_ref, w_ref, b_ref, s_ref, t_ref, o_ref, *,
                       H, W, HW, pool):
    x = x_ref[0]                                              # (HW, Cin) bf16
    not_left, not_right = _edge_masks(W, HW)
    patch = _tap_patches(_pad_rows(x, W), W, HW, not_left, not_right)
    acc = jnp.dot(patch, w_ref[...], preferred_element_type=jnp.float32)
    y = jnp.maximum((acc + b_ref[...]) * s_ref[...] + t_ref[...], 0.0)
    cout = y.shape[-1]
    y = y.reshape(H // pool, pool, W, cout).max(axis=1)       # MaxPool2d((p,1))
    o_ref[0] = y.reshape((H // pool) * W, cout).astype(o_ref.dtype)


def conv0_pool(x, w, b, bn, *, pool=4):
    n, h, wd, cin = x.shape
    cout = w.shape[-1]
    assert h % pool == 0, "MaxPool2d((4,1)) needs freq axis divisible by 4"
    hw = h * wd
    xflat = x.reshape(n, hw, cin).astype(ACT_DTYPE)
    wmat = w.reshape(9 * cin, cout).astype(jnp.bfloat16)
    es, et = bn
    out = pl.pallas_call(
        functools.partial(_conv0_pool_kernel, H=h, W=wd, HW=hw, pool=pool),
        out_shape=jax.ShapeDtypeStruct((n, (h // pool) * wd, cout), ACT_DTYPE),
        grid=(n,),
        in_specs=[pl.BlockSpec((1, hw, cin), lambda i: (i, 0, 0)),
                  pl.BlockSpec((9 * cin, cout), lambda i: (0, 0)),
                  pl.BlockSpec((1, cout), lambda i: (0, 0)),
                  pl.BlockSpec((1, cout), lambda i: (0, 0)),
                  pl.BlockSpec((1, cout), lambda i: (0, 0))],
        out_specs=pl.BlockSpec((1, (h // pool) * wd, cout), lambda i: (i, 0, 0)),
        compiler_params=_cparams("parallel"),
    )(xflat, wmat, b, es, et)
    return out.reshape(n, h // pool, wd, cout)


# --------------------------------------------- one whole DenseBlock per kernel
def _dense_block_kernel(*refs, num_layers, W, HW):
    x_ref = refs[0]
    o_ref = refs[1 + 6 * num_layers]
    not_left, not_right = _edge_masks(W, HW)
    slab = x_ref[0]                                           # (HW, C0) bf16
    for j in range(num_layers):
        bn1s, bn1t, w1, bn2s, bn2t, w2 = refs[1 + 6 * j: 1 + 6 * (j + 1)]
        # BN1 -> ReLU (f32) -> single bf16 cast -> 1x1 conv
        a = jnp.maximum(slab.astype(jnp.float32) * bn1s[...] + bn1t[...], 0.0)
        inter = jnp.dot(a.astype(jnp.bfloat16), w1[...],
                        preferred_element_type=jnp.float32)   # (HW, K)
        # BN2 -> ReLU (f32) -> single bf16 cast -> 3x3 conv via packed taps
        inter = jnp.maximum(inter * bn2s[...] + bn2t[...], 0.0)
        inter = inter.astype(jnp.bfloat16)
        patch = _tap_patches(_pad_rows(inter, W), W, HW, not_left, not_right)
        z = jnp.dot(patch, w2[...], preferred_element_type=jnp.float32)
        # channel concat stays in VMEM (no HBM copy)
        slab = jnp.concatenate([slab, z.astype(slab.dtype)], axis=-1)
    o_ref[0] = slab


def dense_block(x, layers):
    n, h, wd, c0 = x.shape
    hw = h * wd
    g = layers[0]["conv2_w"].shape[-1]
    ctot = c0 + len(layers) * g

    args = [x.reshape(n, hw, c0).astype(ACT_DTYPE)]
    in_specs = [pl.BlockSpec((1, hw, c0), lambda i: (i, 0, 0))]
    for lp in layers:
        cin = lp["conv1_w"].shape[2]
        k = lp["conv1_w"].shape[3]
        w1 = lp["conv1_w"].reshape(cin, k).astype(jnp.bfloat16)
        w2 = lp["conv2_w"].reshape(9 * k, g).astype(jnp.bfloat16)
        for a in (lp["bn1"][0], lp["bn1"][1], w1, lp["bn2"][0], lp["bn2"][1], w2):
            args.append(a)
            in_specs.append(pl.BlockSpec(a.shape, lambda i: (0, 0)))

    out = pl.pallas_call(
        functools.partial(_dense_block_kernel, num_layers=len(layers),
                          W=wd, HW=hw),
        out_shape=jax.ShapeDtypeStruct((n, hw, ctot), ACT_DTYPE),
        grid=(n,),
        in_specs=in_specs,
        out_specs=pl.BlockSpec((1, hw, ctot), lambda i: (i, 0, 0)),
        compiler_params=_cparams("parallel"),
    )(*args)
    return out.reshape(n, h, wd, ctot)


# ----------------------------------- Transition: BN-ReLU-1x1 conv + AvgPool(2)
def _transition_kernel(x_ref, s_ref, t_ref, w_ref, o_ref, *, H, W):
    xf = jnp.maximum(x_ref[0].astype(jnp.float32) * s_ref[...] + t_ref[...], 0.0)
    acc = jnp.dot(xf.astype(jnp.bfloat16), w_ref[...],
                  preferred_element_type=jnp.float32)          # (HW, Cout)
    cout = acc.shape[-1]
    s1 = acc.reshape(H // 2, 2, W, cout).sum(axis=1)           # pool H pairs
    s2 = s1.reshape(H // 2, W // 2, 2, cout).sum(axis=2)       # pool W pairs
    o_ref[0] = ((s2 * 0.25)
                .reshape((H // 2) * (W // 2), cout).astype(o_ref.dtype))


def transition(x, p):
    n, h, wd, cin = x.shape
    assert h % 2 == 0 and wd % 2 == 0, "AvgPool2d(2) needs even spatial dims"
    cout = p["conv_w"].shape[-1]
    hw = h * wd
    es, et = p["bn"]
    w = p["conv_w"].reshape(cin, cout).astype(jnp.bfloat16)
    out = pl.pallas_call(
        functools.partial(_transition_kernel, H=h, W=wd),
        out_shape=jax.ShapeDtypeStruct((n, (h // 2) * (wd // 2), cout),
                                       ACT_DTYPE),
        grid=(n,),
        in_specs=[pl.BlockSpec((1, hw, cin), lambda i: (i, 0, 0)),
                  pl.BlockSpec((1, cin), lambda i: (0, 0)),
                  pl.BlockSpec((1, cin), lambda i: (0, 0)),
                  pl.BlockSpec((cin, cout), lambda i: (0, 0))],
        out_specs=pl.BlockSpec((1, (h // 2) * (wd // 2), cout),
                               lambda i: (i, 0, 0)),
        compiler_params=_cparams("parallel"),
    )(x.reshape(n, hw, cin).astype(ACT_DTYPE), es, et, w)
    return out.reshape(n, h // 2, wd // 2, cout)


# -------------------------- head: BN-ReLU-AdaptiveAvgPool-Linear for ALL images
def _head_kernel(x_ref, s_ref, t_ref, w_ref, b_ref, o_ref):
    xf = jnp.maximum(x_ref[...].astype(jnp.float32) * s_ref[...] + t_ref[...],
                     0.0)                                      # (N, HW, C)
    m = jnp.mean(xf, axis=1)                                   # (N, C)
    o_ref[...] = (jnp.dot(m, w_ref[...], preferred_element_type=jnp.float32)
                  + b_ref[...])


def dcin_head(x, bn, cls_w, cls_b):
    n, h, wd, c = x.shape
    ncls = cls_w.shape[1]
    xflat = x.reshape(n, h * wd, c)
    return pl.pallas_call(
        _head_kernel,
        out_shape=jax.ShapeDtypeStruct((n, ncls), jnp.float32),
        grid=(1,),
        in_specs=[pl.BlockSpec((n, h * wd, c), lambda i: (0, 0, 0)),
                  pl.BlockSpec((1, c), lambda i: (0, 0)),
                  pl.BlockSpec((1, c), lambda i: (0, 0)),
                  pl.BlockSpec((c, ncls), lambda i: (0, 0)),
                  pl.BlockSpec((1, ncls), lambda i: (0, 0))],
        out_specs=pl.BlockSpec((n, ncls), lambda i: (0, 0)),
        compiler_params=_cparams("arbitrary"),
    )(xflat, bn[0], bn[1], cls_w, cls_b)


# -------------------------------------- AttentionBlock for ALL sample groups
def _attention_kernel(f_ref, w0_ref, w1_ref, o_ref):
    # torch: p = softmax(x, dim=2); w = softmax(MLP(p), dim=1);
    #        out = log(sum_j w_j * p_j)   -- computed in log-space.
    x = f_ref[...]                                             # (ns, s, C) f32
    xs = x - jnp.max(x, axis=-1, keepdims=True)
    logp = xs - jnp.log(jnp.sum(jnp.exp(xs), axis=-1, keepdims=True))
    p = jnp.exp(logp)
    ns, s, c = p.shape
    h = jnp.maximum(jnp.dot(p.reshape(ns * s, c), w0_ref[...],
                            preferred_element_type=jnp.float32), 0.0)
    logit = jnp.sum(h.reshape(ns, s, c) * w1_ref[...], axis=-1,
                    keepdims=True)                             # (ns, s, 1)
    ls = logit - jnp.max(logit, axis=1, keepdims=True)
    logw = ls - jnp.log(jnp.sum(jnp.exp(ls), axis=1, keepdims=True))
    z = logw + logp                                            # (ns, s, C)
    zmax = jnp.max(z, axis=1, keepdims=True)
    o_ref[...] = zmax + jnp.log(jnp.sum(jnp.exp(z - zmax), axis=1,
                                        keepdims=True))


def attention_block(feats, w0, w1_row):
    ns, s, c = feats.shape
    out = pl.pallas_call(
        _attention_kernel,
        out_shape=jax.ShapeDtypeStruct((ns, 1, c), jnp.float32),
        grid=(1,),
        in_specs=[pl.BlockSpec((ns, s, c), lambda i: (0, 0, 0)),
                  pl.BlockSpec((c, c), lambda i: (0, 0)),
                  pl.BlockSpec((1, c), lambda i: (0, 0))],
        out_specs=pl.BlockSpec((ns, 1, c), lambda i: (0, 0, 0)),
        compiler_params=_cparams("arbitrary"),
    )(feats, w0, w1_row)
    return out[:, 0, :]


# ----------------------------------------------------------------- model flow
def dcin_forward(x_nhwc, params):
    y = conv0_pool(x_nhwc, params["conv0_w"], params["conv0_b"], params["bn0"],
                   pool=4)
    for blk in params["blocks"]:
        y = dense_block(y, blk["layers"])
        if blk["transition"] is not None:
            y = transition(y, blk["transition"])
    return dcin_head(y, params["bn_final"], params["cls_w"], params["cls_b"])


def context_free_dcin_forward(x, params):
    # x: (num_samples, num_segs, num_feats, num_freqs, num_frames)
    ns, s, f, fr, t = x.shape
    # compute_features: per-segment loop == folding segments into the batch
    # (BatchNorm is inference-mode affine so batch composition is irrelevant).
    xb = x.reshape(ns * s, f, fr, t)
    xb = jnp.transpose(xb, (0, 2, 3, 1))            # NCHW -> NHWC (C on lanes)
    logits = dcin_forward(xb, params)               # (ns*s, num_classes) f32
    feats = logits.reshape(ns, s, -1)
    return attention_block(feats, params["att_w0"], params["att_w1"])


# -------------------------------------------------------------------- params
def init_params(key, *, num_input_features, growth_rate, block_config,
                num_init_features, bn_size, num_classes):
    def he(k, shape):
        fan_in = (shape[0] * shape[1] * shape[2]) if len(shape) == 4 else shape[0]
        return jax.random.normal(k, shape, jnp.float32) * math.sqrt(2.0 / fan_in)

    keys = iter(jax.random.split(key, 64))
    p = {}
    p["conv0_w"] = he(next(keys), (3, 3, num_input_features, num_init_features))
    p["conv0_b"] = jax.random.normal(next(keys), (1, num_init_features),
                                     jnp.float32) * 0.01
    p["bn0"] = bn_affine(num_init_features)

    blocks = []
    nf = num_init_features
    for i, nl in enumerate(block_config):
        layers = []
        for j in range(nl):
            cin = nf + j * growth_rate
            layers.append({
                "bn1": bn_affine(cin),
                "conv1_w": he(next(keys), (1, 1, cin, bn_size * growth_rate)),
                "bn2": bn_affine(bn_size * growth_rate),
                "conv2_w": he(next(keys),
                              (3, 3, bn_size * growth_rate, growth_rate)),
            })
        nf = nf + nl * growth_rate
        trans = None
        if i != len(block_config) - 1:
            trans = {"bn": bn_affine(nf),
                     "conv_w": he(next(keys), (1, 1, nf, nf // 2))}
            nf = nf // 2
        blocks.append({"layers": layers, "transition": trans})
    p["blocks"] = blocks
    p["bn_final"] = bn_affine(nf)
    p["cls_w"] = he(next(keys), (nf, num_classes))
    p["cls_b"] = jnp.zeros((1, num_classes), jnp.float32)  # DCIN zeroes Linear bias
    # AttentionBlock(num_classes): Linear(C,C,bias=False), Linear(C,1,bias=False)
    p["att_w0"] = he(next(keys), (num_classes, num_classes))
    p["att_w1"] = he(next(keys), (1, num_classes))
    return p


# ---------------------------------------------------------------------- main
if __name__ == "__main__":
    key = jax.random.PRNGKey(0)
    kx, kp = jax.random.split(key)

    num_samples, num_segs = 2, 3
    num_feats, num_freqs, num_frames = 2, 16, 8
    num_classes = 10

    x = jax.random.normal(
        kx, (num_samples, num_segs, num_feats, num_freqs, num_frames),
        jnp.float32)

    params = init_params(
        kp, num_input_features=num_feats, growth_rate=8, block_config=(2, 2),
        num_init_features=16, bn_size=2, num_classes=num_classes)

    fwd = jax.jit(lambda xx: context_free_dcin_forward(xx, params))
    out = fwd(x)
    jax.block_until_ready(out)
    assert out.shape == (num_samples, num_classes)
    print("KERNEL_OK")
</pallas_src>

<mosaic_0001>
module attributes {stable_mosaic.version = 11 : i64} {
  func.func @_conv0_pool_kernel(%arg0: i32, %arg1: memref<1x128x2xbf16, #tpu.memory_space<vmem>>, %arg2: memref<18x16xbf16, #tpu.memory_space<vmem>>, %arg3: memref<1x16xf32, #tpu.memory_space<vmem>>, %arg4: memref<1x16xf32, #tpu.memory_space<vmem>>, %arg5: memref<1x16xf32, #tpu.memory_space<vmem>>, %arg6: memref<1x32x16xbf16, #tpu.memory_space<vmem>>) attributes {dimension_semantics = [#tpu.dimension_semantics<parallel>], iteration_bounds = array<i64: 6>, scalar_prefetch = 0 : i64, scratch_operands = 0 : i64, tpu.core_type = #tpu.core_type<tc>, window_params = [{transform_indices = @transform_0, window_bounds = array<i64: 1, 128, 2>}, {pipeline_mode = #tpu.pipeline_mode<synchronous>, transform_indices = @transform_1, window_bounds = array<i64: 18, 16>}, {pipeline_mode = #tpu.pipeline_mode<synchronous>, transform_indices = @transform_2, window_bounds = array<i64: 1, 16>}, {pipeline_mode = #tpu.pipeline_mode<synchronous>, transform_indices = @transform_3, window_bounds = array<i64: 1, 16>}, {pipeline_mode = #tpu.pipeline_mode<synchronous>, transform_indices = @transform_4, window_bounds = array<i64: 1, 16>}, {transform_indices = @transform_5, window_bounds = array<i64: 1, 32, 16>}]} {
    %c0 = arith.constant 0 : index
    %c0_0 = arith.constant 0 : index
    %c0_1 = arith.constant 0 : index
    %0 = vector.load %arg1[%c0, %c0_0, %c0_1] : memref<1x128x2xbf16, #tpu.memory_space<vmem>>, vector<1x128x2xbf16>
    %1 = vector.shape_cast %0 : vector<1x128x2xbf16> to vector<128x2xbf16>
    %2 = tpu.iota {dimensions = array<i32: 0>} : vector<128x1xi32>
    %c8_i32 = arith.constant 8 : i32
    %c0_i32 = arith.constant 0 : i32
    %3 = arith.cmpi eq, %c8_i32, %c0_i32 : i32
    %c1_i32 = arith.constant 1 : i32
    %4 = arith.select %3, %c1_i32, %c8_i32 : i32
    %5 = vector.broadcast %4 : i32 to vector<128x1xi32>
    %6 = arith.remsi %2, %5 : vector<128x1xi32>
    %c0_i32_2 = arith.constant 0 : i32
    %7 = vector.broadcast %c0_i32_2 : i32 to vector<128x1xi32>
    %8 = arith.cmpi ne, %6, %7 : vector<128x1xi32>
    %c0_i32_3 = arith.constant 0 : i32
    %9 = vector.broadcast %c0_i32_3 : i32 to vector<128x1xi32>
    %10 = arith.cmpi slt, %6, %9 : vector<128x1xi32>
    %c0_i32_4 = arith.constant 0 : i32
    %11 = arith.cmpi slt, %4, %c0_i32_4 : i32
    %12 = vector.broadcast %11 : i1 to vector<128x1xi1>
    %13 = vector.broadcast %12 : vector<128x1xi1> to vector<128x1xi1>
    %14 = arith.xori %10, %13 : vector<128x1xi1>
    %15 = arith.andi %14, %8 : vector<128x1xi1>
    %16 = vector.broadcast %4 : i32 to vector<128x1xi32>
    %17 = arith.addi %6, %16 : vector<128x1xi32>
    %18 = arith.select %15, %17, %6 : vector<128x1xi1>, vector<128x1xi32>
    %c0_i32_5 = arith.constant 0 : i32
    %19 = vector.broadcast %c0_i32_5 : i32 to vector<128x1xi32>
    %20 = arith.cmpi ne, %18, %19 : vector<128x1xi32>
    %c8_i32_6 = arith.constant 8 : i32
    %c0_i32_7 = arith.constant 0 : i32
    %21 = arith.cmpi eq, %c8_i32_6, %c0_i32_7 : i32
    %c1_i32_8 = arith.constant 1 : i32
    %22 = arith.select %21, %c1_i32_8, %c8_i32_6 : i32
    %23 = vector.broadcast %22 : i32 to vector<128x1xi32>
    %24 = arith.remsi %2, %23 : vector<128x1xi32>
    %c0_i32_9 = arith.constant 0 : i32
    %25 = vector.broadcast %c0_i32_9 : i32 to vector<128x1xi32>
    %26 = arith.cmpi ne, %24, %25 : vector<128x1xi32>
    %c0_i32_10 = arith.constant 0 : i32
    %27 = vector.broadcast %c0_i32_10 : i32 to vector<128x1xi32>
    %28 = arith.cmpi slt, %24, %27 : vector<128x1xi32>
    %c0_i32_11 = arith.constant 0 : i32
    %29 = arith.cmpi slt, %22, %c0_i32_11 : i32
    %30 = vector.broadcast %29 : i1 to vector<128x1xi1>
    %31 = vector.broadcast %30 : vector<128x1xi1> to vector<128x1xi1>
    %32 = arith.xori %28, %31 : vector<128x1xi1>
    %33 = arith.andi %32, %26 : vector<128x1xi1>
    %34 = vector.broadcast %22 : i32 to vector<128x1xi32>
    %35 = arith.addi %24, %34 : vector<128x1xi32>
    %36 = arith.select %33, %35, %24 : vector<128x1xi1>, vector<128x1xi32>
    %c7_i32 = arith.constant 7 : i32
    %37 = vector.broadcast %c7_i32 : i32 to vector<128x1xi32>
    %38 = arith.cmpi ne, %36, %37 : vector<128x1xi32>
    %cst = arith.constant 0.000000e+00 : bf16
    %39 = vector.broadcast %cst : bf16 to vector<9x2xbf16>
    %40 = tpu.concatenate %39, %1, %39 in 0 : vector<9x2xbf16>, vector<128x2xbf16>, vector<9x2xbf16> -> vector<146x2xbf16>
    %41 = vector.extract_strided_slice %40 {offsets = [0, 0], sizes = [128, 2], strides = [1, 1]} : vector<146x2xbf16> to vector<128x2xbf16>
    %cst_12 = arith.constant 0.000000e+00 : bf16
    %42 = vector.broadcast %cst_12 : bf16 to vector<128x2xbf16>
    %43 = vector.shape_cast %20 : vector<128x1xi1> to vector<128x1xi1>
    %44 = vector.broadcast %43 : vector<128x1xi1> to vector<128x2xi1>
    %45 = arith.select %44, %41, %42 : vector<128x2xi1>, vector<128x2xbf16>
    %46 = vector.extract_strided_slice %40 {offsets = [1, 0], sizes = [128, 2], strides = [1, 1]} : vector<146x2xbf16> to vector<128x2xbf16>
    %47 = vector.extract_strided_slice %40 {offsets = [2, 0], sizes = [128, 2], strides = [1, 1]} : vector<146x2xbf16> to vector<128x2xbf16>
    %cst_13 = arith.constant 0.000000e+00 : bf16
    %48 = vector.broadcast %cst_13 : bf16 to vector<128x2xbf16>
    %49 = vector.shape_cast %38 : vector<128x1xi1> to vector<128x1xi1>
    %50 = vector.broadcast %49 : vector<128x1xi1> to vector<128x2xi1>
    %51 = arith.select %50, %47, %48 : vector<128x2xi1>, vector<128x2xbf16>
    %52 = vector.extract_strided_slice %40 {offsets = [8, 0], sizes = [128, 2], strides = [1, 1]} : vector<146x2xbf16> to vector<128x2xbf16>
    %cst_14 = arith.constant 0.000000e+00 : bf16
    %53 = vector.broadcast %cst_14 : bf16 to vector<128x2xbf16>
    %54 = vector.shape_cast %20 : vector<128x1xi1> to vector<128x1xi1>
    %55 = vector.broadcast %54 : vector<128x1xi1> to vector<128x2xi1>
    %56 = arith.select %55, %52, %53 : vector<128x2xi1>, vector<128x2xbf16>
    %57 = vector.extract_strided_slice %40 {offsets = [9, 0], sizes = [128, 2], strides = [1, 1]} : vector<146x2xbf16> to vector<128x2xbf16>
    %58 = vector.extract_strided_slice %40 {offsets = [10, 0], sizes = [128, 2], strides = [1, 1]} : vector<146x2xbf16> to vector<128x2xbf16>
    %cst_15 = arith.constant 0.000000e+00 : bf16
    %59 = vector.broadcast %cst_15 : bf16 to vector<128x2xbf16>
    %60 = vector.shape_cast %38 : vector<128x1xi1> to vector<128x1xi1>
    %61 = vector.broadcast %60 : vector<128x1xi1> to vector<128x2xi1>
    %62 = arith.select %61, %58, %59 : vector<128x2xi1>, vector<128x2xbf16>
    %63 = vector.extract_strided_slice %40 {offsets = [16, 0], sizes = [128, 2], strides = [1, 1]} : vector<146x2xbf16> to vector<128x2xbf16>
    %cst_16 = arith.constant 0.000000e+00 : bf16
    %64 = vector.broadcast %cst_16 : bf16 to vector<128x2xbf16>
    %65 = vector.shape_cast %20 : vector<128x1xi1> to vector<128x1xi1>
    %66 = vector.broadcast %65 : vector<128x1xi1> to vector<128x2xi1>
    %67 = arith.select %66, %63, %64 : vector<128x2xi1>, vector<128x2xbf16>
    %68 = vector.extract_strided_slice %40 {offsets = [17, 0], sizes = [128, 2], strides = [1, 1]} : vector<146x2xbf16> to vector<128x2xbf16>
    %69 = vector.extract_strided_slice %40 {offsets = [18, 0], sizes = [128, 2], strides = [1, 1]} : vector<146x2xbf16> to vector<128x2xbf16>
    %cst_17 = arith.constant 0.000000e+00 : bf16
    %70 = vector.broadcast %cst_17 : bf16 to vector<128x2xbf16>
    %71 = vector.shape_cast %38 : vector<128x1xi1> to vector<128x1xi1>
    %72 = vector.broadcast %71 : vector<128x1xi1> to vector<128x2xi1>
    %73 = arith.select %72, %69, %70 : vector<128x2xi1>, vector<128x2xbf16>
    %74 = tpu.concatenate %45, %46, %51, %56, %57, %62, %67, %68, %73 in 1 : vector<128x2xbf16>, vector<128x2xbf16>, vector<128x2xbf16>, vector<128x2xbf16>, vector<128x2xbf16>, vector<128x2xbf16>, vector<128x2xbf16>, vector<128x2xbf16>, vector<128x2xbf16> -> vector<128x18xbf16>
    %c0_18 = arith.constant 0 : index
    %c0_19 = arith.constant 0 : index
    %75 = vector.load %arg2[%c0_18, %c0_19] : memref<18x16xbf16, #tpu.memory_space<vmem>>, vector<18x16xbf16>
    %cst_20 = arith.constant dense<0.000000e+00> : vector<128x16xf32>
    %76 = tpu.matmul %74, %75, %cst_20 {dimension_numbers = #tpu.dot_dimension_numbers<[1], [0], [0], [1], [0, 0, 1, 1], [], []>} : vector<128x18xbf16>, vector<18x16xbf16>, vector<128x16xf32> -> vector<128x16xf32>
    %c0_21 = arith.constant 0 : index
    %c0_22 = arith.constant 0 : index
    %77 = vector.load %arg3[%c0_21, %c0_22] : memref<1x16xf32, #tpu.memory_space<vmem>>, vector<1x16xf32>
    %78 = vector.broadcast %77 : vector<1x16xf32> to vector<128x16xf32>
    %79 = arith.addf %76, %78 : vector<128x16xf32>
    %c0_23 = arith.constant 0 : index
    %c0_24 = arith.constant 0 : index
    %80 = vector.load %arg4[%c0_23, %c0_24] : memref<1x16xf32, #tpu.memory_space<vmem>>, vector<1x16xf32>
    %81 = vector.broadcast %80 : vector<1x16xf32> to vector<128x16xf32>
    %82 = arith.mulf %79, %81 : vector<128x16xf32>
    %c0_25 = arith.constant 0 : index
    %c0_26 = arith.constant 0 : index
    %83 = vector.load %arg5[%c0_25, %c0_26] : memref<1x16xf32, #tpu.memory_space<vmem>>, vector<1x16xf32>
    %84 = vector.broadcast %83 : vector<1x16xf32> to vector<128x16xf32>
    %85 = arith.addf %82, %84 : vector<128x16xf32>
    %cst_27 = arith.constant 0.000000e+00 : f32
    %86 = vector.broadcast %cst_27 : f32 to vector<128x16xf32>
    %87 = arith.maximumf %85, %86 : vector<128x16xf32>
    %88 = vector.shape_cast %87 : vector<128x16xf32> to vector<4x4x8x16xf32>
    %cst_28 = arith.constant dense<0xFF800000> : vector<4x8x16xf32>
    %89 = vector.multi_reduction <maximumf>, %88, %cst_28 [1] : vector<4x4x8x16xf32> to vector<4x8x16xf32>
    %90 = vector.shape_cast %89 : vector<4x8x16xf32> to vector<32x16xf32>
    %91 = arith.truncf %90 : vector<32x16xf32> to vector<32x16xbf16>
    %c0_29 = arith.constant 0 : index
    %c0_30 = arith.constant 0 : index
    %c0_31 = arith.constant 0 : index
    %92 = vector.load %arg6[%c0_29, %c0_30, %c0_31] : memref<1x32x16xbf16, #tpu.memory_space<vmem>>, vector<1x32x16xbf16>
    %93 = vector.shape_cast %92 : vector<1x32x16xbf16> to vector<32x16xbf16>
    %94 = vector.shape_cast %91 : vector<32x16xbf16> to vector<1x32x16xbf16>
    tpu.vector_store %arg6[%c0_29, %c0_30, %c0_31], %94 {strides = array<i32>} : memref<1x32x16xbf16, #tpu.memory_space<vmem>>, vector<1x32x16xbf16>,
    return
  }
  func.func @transform_0(%arg0: i32) -> (i32, i32, i32) {
    %c0_i32 = arith.constant 0 : i32
    %c0_i32_0 = arith.constant 0 : i32
    %c0_i32_1 = arith.constant 0 : i32
    return %arg0, %c0_i32, %c0_i32_0 : i32, i32, i32
  }
  func.func @transform_1(%arg0: i32) -> (i32, i32) {
    %c0_i32 = arith.constant 0 : i32
    %c0_i32_0 = arith.constant 0 : i32
    %c0_i32_1 = arith.constant 0 : i32
    return %c0_i32, %c0_i32_0 : i32, i32
  }
  func.func @transform_2(%arg0: i32) -> (i32, i32) {
    %c0_i32 = arith.constant 0 : i32
    %c0_i32_0 = arith.constant 0 : i32
    %c0_i32_1 = arith.constant 0 : i32
    return %c0_i32, %c0_i32_0 : i32, i32
  }
  func.func @transform_3(%arg0: i32) -> (i32, i32) {
    %c0_i32 = arith.constant 0 : i32
    %c0_i32_0 = arith.constant 0 : i32
    %c0_i32_1 = arith.constant 0 : i32
    return %c0_i32, %c0_i32_0 : i32, i32
  }
  func.func @transform_4(%arg0: i32) -> (i32, i32) {
    %c0_i32 = arith.constant 0 : i32
    %c0_i32_0 = arith.constant 0 : i32
    %c0_i32_1 = arith.constant 0 : i32
    return %c0_i32, %c0_i32_0 : i32, i32
  }
  func.func @transform_5(%arg0: i32) -> (i32, i32, i32) {
    %c0_i32 = arith.constant 0 : i32
    %c0_i32_0 = arith.constant 0 : i32
    %c0_i32_1 = arith.constant 0 : i32
    return %arg0, %c0_i32, %c0_i32_0 : i32, i32, i32
  }
}

module attributes {stable_mosaic.version = 11 : i64} {
  func.func @_transition_kernel(%arg0: i32, %arg1: memref<1x32x32xbf16, #tpu.memory_space<vmem>>, %arg2: memref<1x32xf32, #tpu.memory_space<vmem>>, %arg3: memref<1x32xf32, #tpu.memory_space<vmem>>, %arg4: memref<32x16xbf16, #tpu.memory_space<vmem>>, %arg5: memref<1x8x16xbf16, #tpu.memory_space<vmem>>) attributes {dimension_semantics = [#tpu.dimension_semantics<parallel>], iteration_bounds = array<i64: 6>, scalar_prefetch = 0 : i64, scratch_operands = 0 : i64, tpu.core_type = #tpu.core_type<tc>, window_params = [{transform_indices = @transform_0, window_bounds = array<i64: 1, 32, 32>}, {pipeline_mode = #tpu.pipeline_mode<synchronous>, transform_indices = @transform_1, window_bounds = array<i64: 1, 32>}, {pipeline_mode = #tpu.pipeline_mode<synchronous>, transform_indices = @transform_2, window_bounds = array<i64: 1, 32>}, {pipeline_mode = #tpu.pipeline_mode<synchronous>, transform_indices = @transform_3, window_bounds = array<i64: 32, 16>}, {transform_indices = @transform_4, window_bounds = array<i64: 1, 8, 16>}]} {
    %c0 = arith.constant 0 : index
    %c0_0 = arith.constant 0 : index
    %c0_1 = arith.constant 0 : index
    %0 = vector.load %arg1[%c0, %c0_0, %c0_1] : memref<1x32x32xbf16, #tpu.memory_space<vmem>>, vector<1x32x32xbf16>
    %1 = vector.shape_cast %0 : vector<1x32x32xbf16> to vector<32x32xbf16>
    %2 = arith.extf %1 : vector<32x32xbf16> to vector<32x32xf32>
    %c0_2 = arith.constant 0 : index
    %c0_3 = arith.constant 0 : index
    %3 = vector.load %arg2[%c0_2, %c0_3] : memref<1x32xf32, #tpu.memory_space<vmem>>, vector<1x32xf32>
    %4 = vector.broadcast %3 : vector<1x32xf32> to vector<32x32xf32>
    %5 = arith.mulf %2, %4 : vector<32x32xf32>
    %c0_4 = arith.constant 0 : index
    %c0_5 = arith.constant 0 : index
    %6 = vector.load %arg3[%c0_4, %c0_5] : memref<1x32xf32, #tpu.memory_space<vmem>>, vector<1x32xf32>
    %7 = vector.broadcast %6 : vector<1x32xf32> to vector<32x32xf32>
    %8 = arith.addf %5, %7 : vector<32x32xf32>
    %cst = arith.constant 0.000000e+00 : f32
    %9 = vector.broadcast %cst : f32 to vector<32x32xf32>
    %10 = arith.maximumf %8, %9 : vector<32x32xf32>
    %11 = arith.truncf %10 : vector<32x32xf32> to vector<32x32xbf16>
    %c0_6 = arith.constant 0 : index
    %c0_7 = arith.constant 0 : index
    %12 = vector.load %arg4[%c0_6, %c0_7] : memref<32x16xbf16, #tpu.memory_space<vmem>>, vector<32x16xbf16>
    %cst_8 = arith.constant dense<0.000000e+00> : vector<32x16xf32>
    %13 = tpu.matmul %11, %12, %cst_8 {dimension_numbers = #tpu.dot_dimension_numbers<[1], [0], [0], [1], [0, 0, 1, 1], [], []>} : vector<32x32xbf16>, vector<32x16xbf16>, vector<32x16xf32> -> vector<32x16xf32>
    %14 = vector.shape_cast %13 : vector<32x16xf32> to vector<2x2x8x16xf32>
    %cst_9 = arith.constant dense<0.000000e+00> : vector<2x8x16xf32>
    %15 = vector.multi_reduction <add>, %14, %cst_9 [1] : vector<2x2x8x16xf32> to vector<2x8x16xf32>
    %16 = vector.shape_cast %15 : vector<2x8x16xf32> to vector<2x4x2x16xf32>
    %cst_10 = arith.constant dense<0.000000e+00> : vector<2x4x16xf32>
    %17 = vector.multi_reduction <add>, %16, %cst_10 [2] : vector<2x4x2x16xf32> to vector<2x4x16xf32>
    %cst_11 = arith.constant 2.500000e-01 : f32
    %18 = vector.broadcast %cst_11 : f32 to vector<2x4x16xf32>
    %19 = arith.mulf %17, %18 : vector<2x4x16xf32>
    %20 = vector.shape_cast %19 : vector<2x4x16xf32> to vector<8x16xf32>
    %21 = arith.truncf %20 : vector<8x16xf32> to vector<8x16xbf16>
    %c0_12 = arith.constant 0 : index
    %c0_13 = arith.constant 0 : index
    %c0_14 = arith.constant 0 : index
    %22 = vector.load %arg5[%c0_12, %c0_13, %c0_14] : memref<1x8x16xbf16, #tpu.memory_space<vmem>>, vector<1x8x16xbf16>
    %23 = vector.shape_cast %22 : vector<1x8x16xbf16> to vector<8x16xbf16>
    %24 = vector.shape_cast %21 : vector<8x16xbf16> to vector<1x8x16xbf16>
    tpu.vector_store %arg5[%c0_12, %c0_13, %c0_14], %24 {strides = array<i32>} : memref<1x8x16xbf16, #tpu.memory_space<vmem>>, vector<1x8x16xbf16>,
    return
  }
  func.func @transform_0(%arg0: i32) -> (i32, i32, i32) {
    %c0_i32 = arith.constant 0 : i32
    %c0_i32_0 = arith.constant 0 : i32
    %c0_i32_1 = arith.constant 0 : i32
    return %arg0, %c0_i32, %c0_i32_0 : i32, i32, i32
  }
  func.func @transform_1(%arg0: i32) -> (i32, i32) {
    %c0_i32 = arith.constant 0 : i32
    %c0_i32_0 = arith.constant 0 : i32
    %c0_i32_1 = arith.constant 0 : i32
    return %c0_i32, %c0_i32_0 : i32, i32
  }
  func.func @transform_2(%arg0: i32) -> (i32, i32) {
    %c0_i32 = arith.constant 0 : i32
    %c0_i32_0 = arith.constant 0 : i32
    %c0_i32_1 = arith.constant 0 : i32
    return %c0_i32, %c0_i32_0 : i32, i32
  }
  func.func @transform_3(%arg0: i32) -> (i32, i32) {
    %c0_i32 = arith.constant 0 : i32
    %c0_i32_0 = arith.constant 0 : i32
    %c0_i32_1 = arith.constant 0 : i32
    return %c0_i32, %c0_i32_0 : i32, i32
  }
  func.func @transform_4(%arg0: i32) -> (i32, i32, i32) {
    %c0_i32 = arith.constant 0 : i32
    %c0_i32_0 = arith.constant 0 : i32
    %c0_i32_1 = arith.constant 0 : i32
    return %arg0, %c0_i32, %c0_i32_0 : i32, i32, i32
  }
}

module attributes {stable_mosaic.version = 11 : i64} {
  func.func @_dense_block_kernel(%arg0: i32, %arg1: memref<1x32x16xbf16, #tpu.memory_space<vmem>>, %arg2: memref<1x16xf32, #tpu.memory_space<vmem>>, %arg3: memref<1x16xf32, #tpu.memory_space<vmem>>, %arg4: memref<16x16xbf16, #tpu.memory_space<vmem>>, %arg5: memref<1x16xf32, #tpu.memory_space<vmem>>, %arg6: memref<1x16xf32, #tpu.memory_space<vmem>>, %arg7: memref<144x8xbf16, #tpu.memory_space<vmem>>, %arg8: memref<1x24xf32, #tpu.memory_space<vmem>>, %arg9: memref<1x24xf32, #tpu.memory_space<vmem>>, %arg10: memref<24x16xbf16, #tpu.memory_space<vmem>>, %arg11: memref<1x16xf32, #tpu.memory_space<vmem>>, %arg12: memref<1x16xf32, #tpu.memory_space<vmem>>, %arg13: memref<144x8xbf16, #tpu.memory_space<vmem>>, %arg14: memref<1x32x32xbf16, #tpu.memory_space<vmem>>) attributes {dimension_semantics = [#tpu.dimension_semantics<parallel>], iteration_bounds = array<i64: 6>, scalar_prefetch = 0 : i64, scratch_operands = 0 : i64, tpu.core_type = #tpu.core_type<tc>, window_params = [{transform_indices = @transform_0, window_bounds = array<i64: 1, 32, 16>}, {pipeline_mode = #tpu.pipeline_mode<synchronous>, transform_indices = @transform_1, window_bounds = array<i64: 1, 16>}, {pipeline_mode = #tpu.pipeline_mode<synchronous>, transform_indices = @transform_2, window_bounds = array<i64: 1, 16>}, {pipeline_mode = #tpu.pipeline_mode<synchronous>, transform_indices = @transform_3, window_bounds = array<i64: 16, 16>}, {pipeline_mode = #tpu.pipeline_mode<synchronous>, transform_indices = @transform_4, window_bounds = array<i64: 1, 16>}, {pipeline_mode = #tpu.pipeline_mode<synchronous>, transform_indices = @transform_5, window_bounds = array<i64: 1, 16>}, {pipeline_mode = #tpu.pipeline_mode<synchronous>, transform_indices = @transform_6, window_bounds = array<i64: 144, 8>}, {pipeline_mode = #tpu.pipeline_mode<synchronous>, transform_indices = @transform_7, window_bounds = array<i64: 1, 24>}, {pipeline_mode = #tpu.pipeline_mode<synchronous>, transform_indices = @transform_8, window_bounds = array<i64: 1, 24>}, {pipeline_mode = #tpu.pipeline_mode<synchronous>, transform_indices = @transform_9, window_bounds = array<i64: 24, 16>}, {pipeline_mode = #tpu.pipeline_mode<synchronous>, transform_indices = @transform_10, window_bounds = array<i64: 1, 16>}, {pipeline_mode = #tpu.pipeline_mode<synchronous>, transform_indices = @transform_11, window_bounds = array<i64: 1, 16>}, {pipeline_mode = #tpu.pipeline_mode<synchronous>, transform_indices = @transform_12, window_bounds = array<i64: 144, 8>}, {transform_indices = @transform_13, window_bounds = array<i64: 1, 32, 32>}]} {
    %0 = tpu.iota {dimensions = array<i32: 0>} : vector<32x1xi32>
    %c8_i32 = arith.constant 8 : i32
    %c0_i32 = arith.constant 0 : i32
    %1 = arith.cmpi eq, %c8_i32, %c0_i32 : i32
    %c1_i32 = arith.constant 1 : i32
    %2 = arith.select %1, %c1_i32, %c8_i32 : i32
    %3 = vector.broadcast %2 : i32 to vector<32x1xi32>
    %4 = arith.remsi %0, %3 : vector<32x1xi32>
    %c0_i32_0 = arith.constant 0 : i32
    %5 = vector.broadcast %c0_i32_0 : i32 to vector<32x1xi32>
    %6 = arith.cmpi ne, %4, %5 : vector<32x1xi32>
    %c0_i32_1 = arith.constant 0 : i32
    %7 = vector.broadcast %c0_i32_1 : i32 to vector<32x1xi32>
    %8 = arith.cmpi slt, %4, %7 : vector<32x1xi32>
    %c0_i32_2 = arith.constant 0 : i32
    %9 = arith.cmpi slt, %2, %c0_i32_2 : i32
    %10 = vector.broadcast %9 : i1 to vector<32x1xi1>
    %11 = vector.broadcast %10 : vector<32x1xi1> to vector<32x1xi1>
    %12 = arith.xori %8, %11 : vector<32x1xi1>
    %13 = arith.andi %12, %6 : vector<32x1xi1>
    %14 = vector.broadcast %2 : i32 to vector<32x1xi32>
    %15 = arith.addi %4, %14 : vector<32x1xi32>
    %16 = arith.select %13, %15, %4 : vector<32x1xi1>, vector<32x1xi32>
    %c0_i32_3 = arith.constant 0 : i32
    %17 = vector.broadcast %c0_i32_3 : i32 to vector<32x1xi32>
    %18 = arith.cmpi ne, %16, %17 : vector<32x1xi32>
    %c8_i32_4 = arith.constant 8 : i32
    %c0_i32_5 = arith.constant 0 : i32
    %19 = arith.cmpi eq, %c8_i32_4, %c0_i32_5 : i32
    %c1_i32_6 = arith.constant 1 : i32
    %20 = arith.select %19, %c1_i32_6, %c8_i32_4 : i32
    %21 = vector.broadcast %20 : i32 to vector<32x1xi32>
    %22 = arith.remsi %0, %21 : vector<32x1xi32>
    %c0_i32_7 = arith.constant 0 : i32
    %23 = vector.broadcast %c0_i32_7 : i32 to vector<32x1xi32>
    %24 = arith.cmpi ne, %22, %23 : vector<32x1xi32>
    %c0_i32_8 = arith.constant 0 : i32
    %25 = vector.broadcast %c0_i32_8 : i32 to vector<32x1xi32>
    %26 = arith.cmpi slt, %22, %25 : vector<32x1xi32>
    %c0_i32_9 = arith.constant 0 : i32
    %27 = arith.cmpi slt, %20, %c0_i32_9 : i32
    %28 = vector.broadcast %27 : i1 to vector<32x1xi1>
    %29 = vector.broadcast %28 : vector<32x1xi1> to vector<32x1xi1>
    %30 = arith.xori %26, %29 : vector<32x1xi1>
    %31 = arith.andi %30, %24 : vector<32x1xi1>
    %32 = vector.broadcast %20 : i32 to vector<32x1xi32>
    %33 = arith.addi %22, %32 : vector<32x1xi32>
    %34 = arith.select %31, %33, %22 : vector<32x1xi1>, vector<32x1xi32>
    %c7_i32 = arith.constant 7 : i32
    %35 = vector.broadcast %c7_i32 : i32 to vector<32x1xi32>
    %36 = arith.cmpi ne, %34, %35 : vector<32x1xi32>
    %c0 = arith.constant 0 : index
    %c0_10 = arith.constant 0 : index
    %c0_11 = arith.constant 0 : index
    %37 = vector.load %arg1[%c0, %c0_10, %c0_11] : memref<1x32x16xbf16, #tpu.memory_space<vmem>>, vector<1x32x16xbf16>
    %38 = vector.shape_cast %37 : vector<1x32x16xbf16> to vector<32x16xbf16>
    %39 = arith.extf %38 : vector<32x16xbf16> to vector<32x16xf32>
    %c0_12 = arith.constant 0 : index
    %c0_13 = arith.constant 0 : index
    %40 = vector.load %arg2[%c0_12, %c0_13] : memref<1x16xf32, #tpu.memory_space<vmem>>, vector<1x16xf32>
    %41 = vector.broadcast %40 : vector<1x16xf32> to vector<32x16xf32>
    %42 = arith.mulf %39, %41 : vector<32x16xf32>
    %c0_14 = arith.constant 0 : index
    %c0_15 = arith.constant 0 : index
    %43 = vector.load %arg3[%c0_14, %c0_15] : memref<1x16xf32, #tpu.memory_space<vmem>>, vector<1x16xf32>
    %44 = vector.broadcast %43 : vector<1x16xf32> to vector<32x16xf32>
    %45 = arith.addf %42, %44 : vector<32x16xf32>
    %cst = arith.constant 0.000000e+00 : f32
    %46 = vector.broadcast %cst : f32 to vector<32x16xf32>
    %47 = arith.maximumf %45, %46 : vector<32x16xf32>
    %48 = arith.truncf %47 : vector<32x16xf32> to vector<32x16xbf16>
    %c0_16 = arith.constant 0 : index
    %c0_17 = arith.constant 0 : index
    %49 = vector.load %arg4[%c0_16, %c0_17] : memref<16x16xbf16, #tpu.memory_space<vmem>>, vector<16x16xbf16>
    %cst_18 = arith.constant dense<0.000000e+00> : vector<32x16xf32>
    %50 = tpu.matmul %48, %49, %cst_18 {dimension_numbers = #tpu.dot_dimension_numbers<[1], [0], [0], [1], [0, 0, 1, 1], [], []>} : vector<32x16xbf16>, vector<16x16xbf16>, vector<32x16xf32> -> vector<32x16xf32>
    %c0_19 = arith.constant 0 : index
    %c0_20 = arith.constant 0 : index
    %51 = vector.load %arg5[%c0_19, %c0_20] : memref<1x16xf32, #tpu.memory_space<vmem>>, vector<1x16xf32>
    %52 = vector.broadcast %51 : vector<1x16xf32> to vector<32x16xf32>
    %53 = arith.mulf %50, %52 : vector<32x16xf32>
    %c0_21 = arith.constant 0 : index
    %c0_22 = arith.constant 0 : index
    %54 = vector.load %arg6[%c0_21, %c0_22] : memref<1x16xf32, #tpu.memory_space<vmem>>, vector<1x16xf32>
    %55 = vector.broadcast %54 : vector<1x16xf32> to vector<32x16xf32>
    %56 = arith.addf %53, %55 : vector<32x16xf32>
    %cst_23 = arith.constant 0.000000e+00 : f32
    %57 = vector.broadcast %cst_23 : f32 to vector<32x16xf32>
    %58 = arith.maximumf %56, %57 : vector<32x16xf32>
    %59 = arith.truncf %58 : vector<32x16xf32> to vector<32x16xbf16>
    %cst_24 = arith.constant 0.000000e+00 : bf16
    %60 = vector.broadcast %cst_24 : bf16 to vector<9x16xbf16>
    %61 = tpu.concatenate %60, %59, %60 in 0 : vector<9x16xbf16>, vector<32x16xbf16>, vector<9x16xbf16> -> vector<50x16xbf16>
    %62 = vector.extract_strided_slice %61 {offsets = [0, 0], sizes = [32, 16], strides = [1, 1]} : vector<50x16xbf16> to vector<32x16xbf16>
    %cst_25 = arith.constant 0.000000e+00 : bf16
    %63 = vector.broadcast %cst_25 : bf16 to vector<32x16xbf16>
    %64 = vector.shape_cast %18 : vector<32x1xi1> to vector<32x1xi1>
    %65 = vector.broadcast %64 : vector<32x1xi1> to vector<32x16xi1>
    %66 = arith.select %65, %62, %63 : vector<32x16xi1>, vector<32x16xbf16>
    %67 = vector.extract_strided_slice %61 {offsets = [1, 0], sizes = [32, 16], strides = [1, 1]} : vector<50x16xbf16> to vector<32x16xbf16>
    %68 = vector.extract_strided_slice %61 {offsets = [2, 0], sizes = [32, 16], strides = [1, 1]} : vector<50x16xbf16> to vector<32x16xbf16>
    %cst_26 = arith.constant 0.000000e+00 : bf16
    %69 = vector.broadcast %cst_26 : bf16 to vector<32x16xbf16>
    %70 = vector.shape_cast %36 : vector<32x1xi1> to vector<32x1xi1>
    %71 = vector.broadcast %70 : vector<32x1xi1> to vector<32x16xi1>
    %72 = arith.select %71, %68, %69 : vector<32x16xi1>, vector<32x16xbf16>
    %73 = vector.extract_strided_slice %61 {offsets = [8, 0], sizes = [32, 16], strides = [1, 1]} : vector<50x16xbf16> to vector<32x16xbf16>
    %cst_27 = arith.constant 0.000000e+00 : bf16
    %74 = vector.broadcast %cst_27 : bf16 to vector<32x16xbf16>
    %75 = vector.shape_cast %18 : vector<32x1xi1> to vector<32x1xi1>
    %76 = vector.broadcast %75 : vector<32x1xi1> to vector<32x16xi1>
    %77 = arith.select %76, %73, %74 : vector<32x16xi1>, vector<32x16xbf16>
    %78 = vector.extract_strided_slice %61 {offsets = [9, 0], sizes = [32, 16], strides = [1, 1]} : vector<50x16xbf16> to vector<32x16xbf16>
    %79 = vector.extract_strided_slice %61 {offsets = [10, 0], sizes = [32, 16], strides = [1, 1]} : vector<50x16xbf16> to vector<32x16xbf16>
    %cst_28 = arith.constant 0.000000e+00 : bf16
    %80 = vector.broadcast %cst_28 : bf16 to vector<32x16xbf16>
    %81 = vector.shape_cast %36 : vector<32x1xi1> to vector<32x1xi1>
    %82 = vector.broadcast %81 : vector<32x1xi1> to vector<32x16xi1>
    %83 = arith.select %82, %79, %80 : vector<32x16xi1>, vector<32x16xbf16>
    %84 = vector.extract_strided_slice %61 {offsets = [16, 0], sizes = [32, 16], strides = [1, 1]} : vector<50x16xbf16> to vector<32x16xbf16>
    %cst_29 = arith.constant 0.000000e+00 : bf16
    %85 = vector.broadcast %cst_29 : bf16 to vector<32x16xbf16>
    %86 = vector.shape_cast %18 : vector<32x1xi1> to vector<32x1xi1>
    %87 = vector.broadcast %86 : vector<32x1xi1> to vector<32x16xi1>
    %88 = arith.select %87, %84, %85 : vector<32x16xi1>, vector<32x16xbf16>
    %89 = vector.extract_strided_slice %61 {offsets = [17, 0], sizes = [32, 16], strides = [1, 1]} : vector<50x16xbf16> to vector<32x16xbf16>
    %90 = vector.extract_strided_slice %61 {offsets = [18, 0], sizes = [32, 16], strides = [1, 1]} : vector<50x16xbf16> to vector<32x16xbf16>
    %cst_30 = arith.constant 0.000000e+00 : bf16
    %91 = vector.broadcast %cst_30 : bf16 to vector<32x16xbf16>
    %92 = vector.shape_cast %36 : vector<32x1xi1> to vector<32x1xi1>
    %93 = vector.broadcast %92 : vector<32x1xi1> to vector<32x16xi1>
    %94 = arith.select %93, %90, %91 : vector<32x16xi1>, vector<32x16xbf16>
    %95 = tpu.concatenate %66, %67, %72, %77, %78, %83, %88, %89, %94 in 1 : vector<32x16xbf16>, vector<32x16xbf16>, vector<32x16xbf16>, vector<32x16xbf16>, vector<32x16xbf16>, vector<32x16xbf16>, vector<32x16xbf16>, vector<32x16xbf16>, vector<32x16xbf16> -> vector<32x144xbf16>
    %c0_31 = arith.constant 0 : index
    %c0_32 = arith.constant 0 : index
    %96 = vector.load %arg7[%c0_31, %c0_32] : memref<144x8xbf16, #tpu.memory_space<vmem>>, vector<144x8xbf16>
    %cst_33 = arith.constant dense<0.000000e+00> : vector<32x8xf32>
    %97 = tpu.matmul %95, %96, %cst_33 {dimension_numbers = #tpu.dot_dimension_numbers<[1], [0], [0], [1], [0, 0, 1, 1], [], []>} : vector<32x144xbf16>, vector<144x8xbf16>, vector<32x8xf32> -> vector<32x8xf32>
    %98 = arith.truncf %97 : vector<32x8xf32> to vector<32x8xbf16>
    %99 = tpu.concatenate %38, %98 in 1 : vector<32x16xbf16>, vector<32x8xbf16> -> vector<32x24xbf16>
    %100 = arith.extf %99 : vector<32x24xbf16> to vector<32x24xf32>
    %c0_34 = arith.constant 0 : index
    %c0_35 = arith.constant 0 : index
    %101 = vector.load %arg8[%c0_34, %c0_35] : memref<1x24xf32, #tpu.memory_space<vmem>>, vector<1x24xf32>
    %102 = vector.broadcast %101 : vector<1x24xf32> to vector<32x24xf32>
    %103 = arith.mulf %100, %102 : vector<32x24xf32>
    %c0_36 = arith.constant 0 : index
    %c0_37 = arith.constant 0 : index
    %104 = vector.load %arg9[%c0_36, %c0_37] : memref<1x24xf32, #tpu.memory_space<vmem>>, vector<1x24xf32>
    %105 = vector.broadcast %104 : vector<1x24xf32> to vector<32x24xf32>
    %106 = arith.addf %103, %105 : vector<32x24xf32>
    %cst_38 = arith.constant 0.000000e+00 : f32
    %107 = vector.broadcast %cst_38 : f32 to vector<32x24xf32>
    %108 = arith.maximumf %106, %107 : vector<32x24xf32>
    %109 = arith.truncf %108 : vector<32x24xf32> to vector<32x24xbf16>
    %c0_39 = arith.constant 0 : index
    %c0_40 = arith.constant 0 : index
    %110 = vector.load %arg10[%c0_39, %c0_40] : memref<24x16xbf16, #tpu.memory_space<vmem>>, vector<24x16xbf16>
    %cst_41 = arith.constant dense<0.000000e+00> : vector<32x16xf32>
    %111 = tpu.matmul %109, %110, %cst_41 {dimension_numbers = #tpu.dot_dimension_numbers<[1], [0], [0], [1], [0, 0, 1, 1], [], []>} : vector<32x24xbf16>, vector<24x16xbf16>, vector<32x16xf32> -> vector<32x16xf32>
    %c0_42 = arith.constant 0 : index
    %c0_43 = arith.constant 0 : index
    %112 = vector.load %arg11[%c0_42, %c0_43] : memref<1x16xf32, #tpu.memory_space<vmem>>, vector<1x16xf32>
    %113 = vector.broadcast %112 : vector<1x16xf32> to vector<32x16xf32>
    %114 = arith.mulf %111, %113 : vector<32x16xf32>
    %c0_44 = arith.constant 0 : index
    %c0_45 = arith.constant 0 : index
    %115 = vector.load %arg12[%c0_44, %c0_45] : memref<1x16xf32, #tpu.memory_space<vmem>>, vector<1x16xf32>
    %116 = vector.broadcast %115 : vector<1x16xf32> to vector<32x16xf32>
    %117 = arith.addf %114, %116 : vector<32x16xf32>
    %cst_46 = arith.constant 0.000000e+00 : f32
    %118 = vector.broadcast %cst_46 : f32 to vector<32x16xf32>
    %119 = arith.maximumf %117, %118 : vector<32x16xf32>
    %120 = arith.truncf %119 : vector<32x16xf32> to vector<32x16xbf16>
    %cst_47 = arith.constant 0.000000e+00 : bf16
    %121 = vector.broadcast %cst_47 : bf16 to vector<9x16xbf16>
    %122 = tpu.concatenate %121, %120, %121 in 0 : vector<9x16xbf16>, vector<32x16xbf16>, vector<9x16xbf16> -> vector<50x16xbf16>
    %123 = vector.extract_strided_slice %122 {offsets = [0, 0], sizes = [32, 16], strides = [1, 1]} : vector<50x16xbf16> to vector<32x16xbf16>
    %cst_48 = arith.constant 0.000000e+00 : bf16
    %124 = vector.broadcast %cst_48 : bf16 to vector<32x16xbf16>
    %125 = vector.shape_cast %18 : vector<32x1xi1> to vector<32x1xi1>
    %126 = vector.broadcast %125 : vector<32x1xi1> to vector<32x16xi1>
    %127 = arith.select %126, %123, %124 : vector<32x16xi1>, vector<32x16xbf16>
    %128 = vector.extract_strided_slice %122 {offsets = [1, 0], sizes = [32, 16], strides = [1, 1]} : vector<50x16xbf16> to vector<32x16xbf16>
    %129 = vector.extract_strided_slice %122 {offsets = [2, 0], sizes = [32, 16], strides = [1, 1]} : vector<50x16xbf16> to vector<32x16xbf16>
    %cst_49 = arith.constant 0.000000e+00 : bf16
    %130 = vector.broadcast %cst_49 : bf16 to vector<32x16xbf16>
    %131 = vector.shape_cast %36 : vector<32x1xi1> to vector<32x1xi1>
    %132 = vector.broadcast %131 : vector<32x1xi1> to vector<32x16xi1>
    %133 = arith.select %132, %129, %130 : vector<32x16xi1>, vector<32x16xbf16>
    %134 = vector.extract_strided_slice %122 {offsets = [8, 0], sizes = [32, 16], strides = [1, 1]} : vector<50x16xbf16> to vector<32x16xbf16>
    %cst_50 = arith.constant 0.000000e+00 : bf16
    %135 = vector.broadcast %cst_50 : bf16 to vector<32x16xbf16>
    %136 = vector.shape_cast %18 : vector<32x1xi1> to vector<32x1xi1>
    %137 = vector.broadcast %136 : vector<32x1xi1> to vector<32x16xi1>
    %138 = arith.select %137, %134, %135 : vector<32x16xi1>, vector<32x16xbf16>
    %139 = vector.extract_strided_slice %122 {offsets = [9, 0], sizes = [32, 16], strides = [1, 1]} : vector<50x16xbf16> to vector<32x16xbf16>
    %140 = vector.extract_strided_slice %122 {offsets = [10, 0], sizes = [32, 16], strides = [1, 1]} : vector<50x16xbf16> to vector<32x16xbf16>
    %cst_51 = arith.constant 0.000000e+00 : bf16
    %141 = vector.broadcast %cst_51 : bf16 to vector<32x16xbf16>
    %142 = vector.shape_cast %36 : vector<32x1xi1> to vector<32x1xi1>
    %143 = vector.broadcast %142 : vector<32x1xi1> to vector<32x16xi1>
    %144 = arith.select %143, %140, %141 : vector<32x16xi1>, vector<32x16xbf16>
    %145 = vector.extract_strided_slice %122 {offsets = [16, 0], sizes = [32, 16], strides = [1, 1]} : vector<50x16xbf16> to vector<32x16xbf16>
    %cst_52 = arith.constant 0.000000e+00 : bf16
    %146 = vector.broadcast %cst_52 : bf16 to vector<32x16xbf16>
    %147 = vector.shape_cast %18 : vector<32x1xi1> to vector<32x1xi1>
    %148 = vector.broadcast %147 : vector<32x1xi1> to vector<32x16xi1>
    %149 = arith.select %148, %145, %146 : vector<32x16xi1>, vector<32x16xbf16>
    %150 = vector.extract_strided_slice %122 {offsets = [17, 0], sizes = [32, 16], strides = [1, 1]} : vector<50x16xbf16> to vector<32x16xbf16>
    %151 = vector.extract_strided_slice %122 {offsets = [18, 0], sizes = [32, 16], strides = [1, 1]} : vector<50x16xbf16> to vector<32x16xbf16>
    %cst_53 = arith.constant 0.000000e+00 : bf16
    %152 = vector.broadcast %cst_53 : bf16 to vector<32x16xbf16>
    %153 = vector.shape_cast %36 : vector<32x1xi1> to vector<32x1xi1>
    %154 = vector.broadcast %153 : vector<32x1xi1> to vector<32x16xi1>
    %155 = arith.select %154, %151, %152 : vector<32x16xi1>, vector<32x16xbf16>
    %156 = tpu.concatenate %127, %128, %133, %138, %139, %144, %149, %150, %155 in 1 : vector<32x16xbf16>, vector<32x16xbf16>, vector<32x16xbf16>, vector<32x16xbf16>, vector<32x16xbf16>, vector<32x16xbf16>, vector<32x16xbf16>, vector<32x16xbf16>, vector<32x16xbf16> -> vector<32x144xbf16>
    %c0_54 = arith.constant 0 : index
    %c0_55 = arith.constant 0 : index
    %157 = vector.load %arg13[%c0_54, %c0_55] : memref<144x8xbf16, #tpu.memory_space<vmem>>, vector<144x8xbf16>
    %cst_56 = arith.constant dense<0.000000e+00> : vector<32x8xf32>
    %158 = tpu.matmul %156, %157, %cst_56 {dimension_numbers = #tpu.dot_dimension_numbers<[1], [0], [0], [1], [0, 0, 1, 1], [], []>} : vector<32x144xbf16>, vector<144x8xbf16>, vector<32x8xf32> -> vector<32x8xf32>
    %159 = arith.truncf %158 : vector<32x8xf32> to vector<32x8xbf16>
    %160 = tpu.concatenate %99, %159 in 1 : vector<32x24xbf16>, vector<32x8xbf16> -> vector<32x32xbf16>
    %c0_57 = arith.constant 0 : index
    %c0_58 = arith.constant 0 : index
    %c0_59 = arith.constant 0 : index
    %161 = vector.load %arg14[%c0_57, %c0_58, %c0_59] : memref<1x32x32xbf16, #tpu.memory_space<vmem>>, vector<1x32x32xbf16>
    %162 = vector.shape_cast %161 : vector<1x32x32xbf16> to vector<32x32xbf16>
    %163 = vector.shape_cast %160 : vector<32x32xbf16> to vector<1x32x32xbf16>
    tpu.vector_store %arg14[%c0_57, %c0_58, %c0_59], %163 {strides = array<i32>} : memref<1x32x32xbf16, #tpu.memory_space<vmem>>, vector<1x32x32xbf16>,
    return
  }
  func.func @transform_0(%arg0: i32) -> (i32, i32, i32) {
    %c0_i32 = arith.constant 0 : i32
    %c0_i32_0 = arith.constant 0 : i32
    %c0_i32_1 = arith.constant 0 : i32
    return %arg0, %c0_i32, %c0_i32_0 : i32, i32, i32
  }
  func.func @transform_1(%arg0: i32) -> (i32, i32) {
    %c0_i32 = arith.constant 0 : i32
    %c0_i32_0 = arith.constant 0 : i32
    %c0_i32_1 = arith.constant 0 : i32
    return %c0_i32, %c0_i32_0 : i32, i32
  }
  func.func @transform_2(%arg0: i32) -> (i32, i32) {
    %c0_i32 = arith.constant 0 : i32
    %c0_i32_0 = arith.constant 0 : i32
    %c0_i32_1 = arith.constant 0 : i32
    return %c0_i32, %c0_i32_0 : i32, i32
  }
  func.func @transform_3(%arg0: i32) -> (i32, i32) {
    %c0_i32 = arith.constant 0 : i32
    %c0_i32_0 = arith.constant 0 : i32
    %c0_i32_1 = arith.constant 0 : i32
    return %c0_i32, %c0_i32_0 : i32, i32
  }
  func.func @transform_4(%arg0: i32) -> (i32, i32) {
    %c0_i32 = arith.constant 0 : i32
    %c0_i32_0 = arith.constant 0 : i32
    %c0_i32_1 = arith.constant 0 : i32
    return %c0_i32, %c0_i32_0 : i32, i32
  }
  func.func @transform_5(%arg0: i32) -> (i32, i32) {
    %c0_i32 = arith.constant 0 : i32
    %c0_i32_0 = arith.constant 0 : i32
    %c0_i32_1 = arith.constant 0 : i32
    return %c0_i32, %c0_i32_0 : i32, i32
  }
  func.func @transform_6(%arg0: i32) -> (i32, i32) {
    %c0_i32 = arith.constant 0 : i32
    %c0_i32_0 = arith.constant 0 : i32
    %c0_i32_1 = arith.constant 0 : i32
    return %c0_i32, %c0_i32_0 : i32, i32
  }
  func.func @transform_7(%arg0: i32) -> (i32, i32) {
    %c0_i32 = arith.constant 0 : i32
    %c0_i32_0 = arith.constant 0 : i32
    %c0_i32_1 = arith.constant 0 : i32
    return %c0_i32, %c0_i32_0 : i32, i32
  }
  func.func @transform_8(%arg0: i32) -> (i32, i32) {
    %c0_i32 = arith.constant 0 : i32
    %c0_i32_0 = arith.constant 0 : i32
    %c0_i32_1 = arith.constant 0 : i32
    return %c0_i32, %c0_i32_0 : i32, i32
  }
  func.func @transform_9(%arg0: i32) -> (i32, i32) {
    %c0_i32 = arith.constant 0 : i32
    %c0_i32_0 = arith.constant 0 : i32
    %c0_i32_1 = arith.constant 0 : i32
    return %c0_i32, %c0_i32_0 : i32, i32
  }
  func.func @transform_10(%arg0: i32) -> (i32, i32) {
    %c0_i32 = arith.constant 0 : i32
    %c0_i32_0 = arith.constant 0 : i32
    %c0_i32_1 = arith.constant 0 : i32
    return %c0_i32, %c0_i32_0 : i32, i32
  }
  func.func @transform_11(%arg0: i32) -> (i32, i32) {
    %c0_i32 = arith.constant 0 : i32
    %c0_i32_0 = arith.constant 0 : i32
    %c0_i32_1 = arith.constant 0 : i32
    return %c0_i32, %c0_i32_0 : i32, i32
  }
  func.func @transform_12(%arg0: i32) -> (i32, i32) {
    %c0_i32 = arith.constant 0 : i32
    %c0_i32_0 = arith.constant 0 : i32
    %c0_i32_1 = arith.constant 0 : i32
    return %c0_i32, %c0_i32_0 : i32, i32
  }
  func.func @transform_13(%arg0: i32) -> (i32, i32, i32) {
    %c0_i32 = arith.constant 0 : i32
    %c0_i32_0 = arith.constant 0 : i32
    %c0_i32_1 = arith.constant 0 : i32
    return %arg0, %c0_i32, %c0_i32_0 : i32, i32, i32
  }
}

module attributes {stable_mosaic.version = 11 : i64} {
  func.func @_dense_block_kernel(%arg0: i32, %arg1: memref<1x8x16xbf16, #tpu.memory_space<vmem>>, %arg2: memref<1x16xf32, #tpu.memory_space<vmem>>, %arg3: memref<1x16xf32, #tpu.memory_space<vmem>>, %arg4: memref<16x16xbf16, #tpu.memory_space<vmem>>, %arg5: memref<1x16xf32, #tpu.memory_space<vmem>>, %arg6: memref<1x16xf32, #tpu.memory_space<vmem>>, %arg7: memref<144x8xbf16, #tpu.memory_space<vmem>>, %arg8: memref<1x24xf32, #tpu.memory_space<vmem>>, %arg9: memref<1x24xf32, #tpu.memory_space<vmem>>, %arg10: memref<24x16xbf16, #tpu.memory_space<vmem>>, %arg11: memref<1x16xf32, #tpu.memory_space<vmem>>, %arg12: memref<1x16xf32, #tpu.memory_space<vmem>>, %arg13: memref<144x8xbf16, #tpu.memory_space<vmem>>, %arg14: memref<1x8x32xbf16, #tpu.memory_space<vmem>>) attributes {dimension_semantics = [#tpu.dimension_semantics<parallel>], iteration_bounds = array<i64: 6>, scalar_prefetch = 0 : i64, scratch_operands = 0 : i64, tpu.core_type = #tpu.core_type<tc>, window_params = [{transform_indices = @transform_0, window_bounds = array<i64: 1, 8, 16>}, {pipeline_mode = #tpu.pipeline_mode<synchronous>, transform_indices = @transform_1, window_bounds = array<i64: 1, 16>}, {pipeline_mode = #tpu.pipeline_mode<synchronous>, transform_indices = @transform_2, window_bounds = array<i64: 1, 16>}, {pipeline_mode = #tpu.pipeline_mode<synchronous>, transform_indices = @transform_3, window_bounds = array<i64: 16, 16>}, {pipeline_mode = #tpu.pipeline_mode<synchronous>, transform_indices = @transform_4, window_bounds = array<i64: 1, 16>}, {pipeline_mode = #tpu.pipeline_mode<synchronous>, transform_indices = @transform_5, window_bounds = array<i64: 1, 16>}, {pipeline_mode = #tpu.pipeline_mode<synchronous>, transform_indices = @transform_6, window_bounds = array<i64: 144, 8>}, {pipeline_mode = #tpu.pipeline_mode<synchronous>, transform_indices = @transform_7, window_bounds = array<i64: 1, 24>}, {pipeline_mode = #tpu.pipeline_mode<synchronous>, transform_indices = @transform_8, window_bounds = array<i64: 1, 24>}, {pipeline_mode = #tpu.pipeline_mode<synchronous>, transform_indices = @transform_9, window_bounds = array<i64: 24, 16>}, {pipeline_mode = #tpu.pipeline_mode<synchronous>, transform_indices = @transform_10, window_bounds = array<i64: 1, 16>}, {pipeline_mode = #tpu.pipeline_mode<synchronous>, transform_indices = @transform_11, window_bounds = array<i64: 1, 16>}, {pipeline_mode = #tpu.pipeline_mode<synchronous>, transform_indices = @transform_12, window_bounds = array<i64: 144, 8>}, {transform_indices = @transform_13, window_bounds = array<i64: 1, 8, 32>}]} {
    %0 = tpu.iota {dimensions = array<i32: 0>} : vector<8x1xi32>
    %c4_i32 = arith.constant 4 : i32
    %c0_i32 = arith.constant 0 : i32
    %1 = arith.cmpi eq, %c4_i32, %c0_i32 : i32
    %c1_i32 = arith.constant 1 : i32
    %2 = arith.select %1, %c1_i32, %c4_i32 : i32
    %3 = vector.broadcast %2 : i32 to vector<8x1xi32>
    %4 = arith.remsi %0, %3 : vector<8x1xi32>
    %c0_i32_0 = arith.constant 0 : i32
    %5 = vector.broadcast %c0_i32_0 : i32 to vector<8x1xi32>
    %6 = arith.cmpi ne, %4, %5 : vector<8x1xi32>
    %c0_i32_1 = arith.constant 0 : i32
    %7 = vector.broadcast %c0_i32_1 : i32 to vector<8x1xi32>
    %8 = arith.cmpi slt, %4, %7 : vector<8x1xi32>
    %c0_i32_2 = arith.constant 0 : i32
    %9 = arith.cmpi slt, %2, %c0_i32_2 : i32
    %10 = vector.broadcast %9 : i1 to vector<8x1xi1>
    %11 = vector.broadcast %10 : vector<8x1xi1> to vector<8x1xi1>
    %12 = arith.xori %8, %11 : vector<8x1xi1>
    %13 = arith.andi %12, %6 : vector<8x1xi1>
    %14 = vector.broadcast %2 : i32 to vector<8x1xi32>
    %15 = arith.addi %4, %14 : vector<8x1xi32>
    %16 = arith.select %13, %15, %4 : vector<8x1xi1>, vector<8x1xi32>
    %c0_i32_3 = arith.constant 0 : i32
    %17 = vector.broadcast %c0_i32_3 : i32 to vector<8x1xi32>
    %18 = arith.cmpi ne, %16, %17 : vector<8x1xi32>
    %c4_i32_4 = arith.constant 4 : i32
    %c0_i32_5 = arith.constant 0 : i32
    %19 = arith.cmpi eq, %c4_i32_4, %c0_i32_5 : i32
    %c1_i32_6 = arith.constant 1 : i32
    %20 = arith.select %19, %c1_i32_6, %c4_i32_4 : i32
    %21 = vector.broadcast %20 : i32 to vector<8x1xi32>
    %22 = arith.remsi %0, %21 : vector<8x1xi32>
    %c0_i32_7 = arith.constant 0 : i32
    %23 = vector.broadcast %c0_i32_7 : i32 to vector<8x1xi32>
    %24 = arith.cmpi ne, %22, %23 : vector<8x1xi32>
    %c0_i32_8 = arith.constant 0 : i32
    %25 = vector.broadcast %c0_i32_8 : i32 to vector<8x1xi32>
    %26 = arith.cmpi slt, %22, %25 : vector<8x1xi32>
    %c0_i32_9 = arith.constant 0 : i32
    %27 = arith.cmpi slt, %20, %c0_i32_9 : i32
    %28 = vector.broadcast %27 : i1 to vector<8x1xi1>
    %29 = vector.broadcast %28 : vector<8x1xi1> to vector<8x1xi1>
    %30 = arith.xori %26, %29 : vector<8x1xi1>
    %31 = arith.andi %30, %24 : vector<8x1xi1>
    %32 = vector.broadcast %20 : i32 to vector<8x1xi32>
    %33 = arith.addi %22, %32 : vector<8x1xi32>
    %34 = arith.select %31, %33, %22 : vector<8x1xi1>, vector<8x1xi32>
    %c3_i32 = arith.constant 3 : i32
    %35 = vector.broadcast %c3_i32 : i32 to vector<8x1xi32>
    %36 = arith.cmpi ne, %34, %35 : vector<8x1xi32>
    %c0 = arith.constant 0 : index
    %c0_10 = arith.constant 0 : index
    %c0_11 = arith.constant 0 : index
    %37 = vector.load %arg1[%c0, %c0_10, %c0_11] : memref<1x8x16xbf16, #tpu.memory_space<vmem>>, vector<1x8x16xbf16>
    %38 = vector.shape_cast %37 : vector<1x8x16xbf16> to vector<8x16xbf16>
    %39 = arith.extf %38 : vector<8x16xbf16> to vector<8x16xf32>
    %c0_12 = arith.constant 0 : index
    %c0_13 = arith.constant 0 : index
    %40 = vector.load %arg2[%c0_12, %c0_13] : memref<1x16xf32, #tpu.memory_space<vmem>>, vector<1x16xf32>
    %41 = vector.broadcast %40 : vector<1x16xf32> to vector<8x16xf32>
    %42 = arith.mulf %39, %41 : vector<8x16xf32>
    %c0_14 = arith.constant 0 : index
    %c0_15 = arith.constant 0 : index
    %43 = vector.load %arg3[%c0_14, %c0_15] : memref<1x16xf32, #tpu.memory_space<vmem>>, vector<1x16xf32>
    %44 = vector.broadcast %43 : vector<1x16xf32> to vector<8x16xf32>
    %45 = arith.addf %42, %44 : vector<8x16xf32>
    %cst = arith.constant 0.000000e+00 : f32
    %46 = vector.broadcast %cst : f32 to vector<8x16xf32>
    %47 = arith.maximumf %45, %46 : vector<8x16xf32>
    %48 = arith.truncf %47 : vector<8x16xf32> to vector<8x16xbf16>
    %c0_16 = arith.constant 0 : index
    %c0_17 = arith.constant 0 : index
    %49 = vector.load %arg4[%c0_16, %c0_17] : memref<16x16xbf16, #tpu.memory_space<vmem>>, vector<16x16xbf16>
    %cst_18 = arith.constant dense<0.000000e+00> : vector<8x16xf32>
    %50 = tpu.matmul %48, %49, %cst_18 {dimension_numbers = #tpu.dot_dimension_numbers<[1], [0], [0], [1], [0, 0, 1, 1], [], []>} : vector<8x16xbf16>, vector<16x16xbf16>, vector<8x16xf32> -> vector<8x16xf32>
    %c0_19 = arith.constant 0 : index
    %c0_20 = arith.constant 0 : index
    %51 = vector.load %arg5[%c0_19, %c0_20] : memref<1x16xf32, #tpu.memory_space<vmem>>, vector<1x16xf32>
    %52 = vector.broadcast %51 : vector<1x16xf32> to vector<8x16xf32>
    %53 = arith.mulf %50, %52 : vector<8x16xf32>
    %c0_21 = arith.constant 0 : index
    %c0_22 = arith.constant 0 : index
    %54 = vector.load %arg6[%c0_21, %c0_22] : memref<1x16xf32, #tpu.memory_space<vmem>>, vector<1x16xf32>
    %55 = vector.broadcast %54 : vector<1x16xf32> to vector<8x16xf32>
    %56 = arith.addf %53, %55 : vector<8x16xf32>
    %cst_23 = arith.constant 0.000000e+00 : f32
    %57 = vector.broadcast %cst_23 : f32 to vector<8x16xf32>
    %58 = arith.maximumf %56, %57 : vector<8x16xf32>
    %59 = arith.truncf %58 : vector<8x16xf32> to vector<8x16xbf16>
    %cst_24 = arith.constant 0.000000e+00 : bf16
    %60 = vector.broadcast %cst_24 : bf16 to vector<5x16xbf16>
    %61 = tpu.concatenate %60, %59, %60 in 0 : vector<5x16xbf16>, vector<8x16xbf16>, vector<5x16xbf16> -> vector<18x16xbf16>
    %62 = vector.extract_strided_slice %61 {offsets = [0, 0], sizes = [8, 16], strides = [1, 1]} : vector<18x16xbf16> to vector<8x16xbf16>
    %cst_25 = arith.constant 0.000000e+00 : bf16
    %63 = vector.broadcast %cst_25 : bf16 to vector<8x16xbf16>
    %64 = vector.shape_cast %18 : vector<8x1xi1> to vector<8x1xi1>
    %65 = vector.broadcast %64 : vector<8x1xi1> to vector<8x16xi1>
    %66 = arith.select %65, %62, %63 : vector<8x16xi1>, vector<8x16xbf16>
    %67 = vector.extract_strided_slice %61 {offsets = [1, 0], sizes = [8, 16], strides = [1, 1]} : vector<18x16xbf16> to vector<8x16xbf16>
    %68 = vector.extract_strided_slice %61 {offsets = [2, 0], sizes = [8, 16], strides = [1, 1]} : vector<18x16xbf16> to vector<8x16xbf16>
    %cst_26 = arith.constant 0.000000e+00 : bf16
    %69 = vector.broadcast %cst_26 : bf16 to vector<8x16xbf16>
    %70 = vector.shape_cast %36 : vector<8x1xi1> to vector<8x1xi1>
    %71 = vector.broadcast %70 : vector<8x1xi1> to vector<8x16xi1>
    %72 = arith.select %71, %68, %69 : vector<8x16xi1>, vector<8x16xbf16>
    %73 = vector.extract_strided_slice %61 {offsets = [4, 0], sizes = [8, 16], strides = [1, 1]} : vector<18x16xbf16> to vector<8x16xbf16>
    %cst_27 = arith.constant 0.000000e+00 : bf16
    %74 = vector.broadcast %cst_27 : bf16 to vector<8x16xbf16>
    %75 = vector.shape_cast %18 : vector<8x1xi1> to vector<8x1xi1>
    %76 = vector.broadcast %75 : vector<8x1xi1> to vector<8x16xi1>
    %77 = arith.select %76, %73, %74 : vector<8x16xi1>, vector<8x16xbf16>
    %78 = vector.extract_strided_slice %61 {offsets = [5, 0], sizes = [8, 16], strides = [1, 1]} : vector<18x16xbf16> to vector<8x16xbf16>
    %79 = vector.extract_strided_slice %61 {offsets = [6, 0], sizes = [8, 16], strides = [1, 1]} : vector<18x16xbf16> to vector<8x16xbf16>
    %cst_28 = arith.constant 0.000000e+00 : bf16
    %80 = vector.broadcast %cst_28 : bf16 to vector<8x16xbf16>
    %81 = vector.shape_cast %36 : vector<8x1xi1> to vector<8x1xi1>
    %82 = vector.broadcast %81 : vector<8x1xi1> to vector<8x16xi1>
    %83 = arith.select %82, %79, %80 : vector<8x16xi1>, vector<8x16xbf16>
    %84 = vector.extract_strided_slice %61 {offsets = [8, 0], sizes = [8, 16], strides = [1, 1]} : vector<18x16xbf16> to vector<8x16xbf16>
    %cst_29 = arith.constant 0.000000e+00 : bf16
    %85 = vector.broadcast %cst_29 : bf16 to vector<8x16xbf16>
    %86 = vector.shape_cast %18 : vector<8x1xi1> to vector<8x1xi1>
    %87 = vector.broadcast %86 : vector<8x1xi1> to vector<8x16xi1>
    %88 = arith.select %87, %84, %85 : vector<8x16xi1>, vector<8x16xbf16>
    %89 = vector.extract_strided_slice %61 {offsets = [9, 0], sizes = [8, 16], strides = [1, 1]} : vector<18x16xbf16> to vector<8x16xbf16>
    %90 = vector.extract_strided_slice %61 {offsets = [10, 0], sizes = [8, 16], strides = [1, 1]} : vector<18x16xbf16> to vector<8x16xbf16>
    %cst_30 = arith.constant 0.000000e+00 : bf16
    %91 = vector.broadcast %cst_30 : bf16 to vector<8x16xbf16>
    %92 = vector.shape_cast %36 : vector<8x1xi1> to vector<8x1xi1>
    %93 = vector.broadcast %92 : vector<8x1xi1> to vector<8x16xi1>
    %94 = arith.select %93, %90, %91 : vector<8x16xi1>, vector<8x16xbf16>
    %95 = tpu.concatenate %66, %67, %72, %77, %78, %83, %88, %89, %94 in 1 : vector<8x16xbf16>, vector<8x16xbf16>, vector<8x16xbf16>, vector<8x16xbf16>, vector<8x16xbf16>, vector<8x16xbf16>, vector<8x16xbf16>, vector<8x16xbf16>, vector<8x16xbf16> -> vector<8x144xbf16>
    %c0_31 = arith.constant 0 : index
    %c0_32 = arith.constant 0 : index
    %96 = vector.load %arg7[%c0_31, %c0_32] : memref<144x8xbf16, #tpu.memory_space<vmem>>, vector<144x8xbf16>
    %cst_33 = arith.constant dense<0.000000e+00> : vector<8x8xf32>
    %97 = tpu.matmul %95, %96, %cst_33 {dimension_numbers = #tpu.dot_dimension_numbers<[1], [0], [0], [1], [0, 0, 1, 1], [], []>} : vector<8x144xbf16>, vector<144x8xbf16>, vector<8x8xf32> -> vector<8x8xf32>
    %98 = arith.truncf %97 : vector<8x8xf32> to vector<8x8xbf16>
    %99 = tpu.concatenate %38, %98 in 1 : vector<8x16xbf16>, vector<8x8xbf16> -> vector<8x24xbf16>
    %100 = arith.extf %99 : vector<8x24xbf16> to vector<8x24xf32>
    %c0_34 = arith.constant 0 : index
    %c0_35 = arith.constant 0 : index
    %101 = vector.load %arg8[%c0_34, %c0_35] : memref<1x24xf32, #tpu.memory_space<vmem>>, vector<1x24xf32>
    %102 = vector.broadcast %101 : vector<1x24xf32> to vector<8x24xf32>
    %103 = arith.mulf %100, %102 : vector<8x24xf32>
    %c0_36 = arith.constant 0 : index
    %c0_37 = arith.constant 0 : index
    %104 = vector.load %arg9[%c0_36, %c0_37] : memref<1x24xf32, #tpu.memory_space<vmem>>, vector<1x24xf32>
    %105 = vector.broadcast %104 : vector<1x24xf32> to vector<8x24xf32>
    %106 = arith.addf %103, %105 : vector<8x24xf32>
    %cst_38 = arith.constant 0.000000e+00 : f32
    %107 = vector.broadcast %cst_38 : f32 to vector<8x24xf32>
    %108 = arith.maximumf %106, %107 : vector<8x24xf32>
    %109 = arith.truncf %108 : vector<8x24xf32> to vector<8x24xbf16>
    %c0_39 = arith.constant 0 : index
    %c0_40 = arith.constant 0 : index
    %110 = vector.load %arg10[%c0_39, %c0_40] : memref<24x16xbf16, #tpu.memory_space<vmem>>, vector<24x16xbf16>
    %cst_41 = arith.constant dense<0.000000e+00> : vector<8x16xf32>
    %111 = tpu.matmul %109, %110, %cst_41 {dimension_numbers = #tpu.dot_dimension_numbers<[1], [0], [0], [1], [0, 0, 1, 1], [], []>} : vector<8x24xbf16>, vector<24x16xbf16>, vector<8x16xf32> -> vector<8x16xf32>
    %c0_42 = arith.constant 0 : index
    %c0_43 = arith.constant 0 : index
    %112 = vector.load %arg11[%c0_42, %c0_43] : memref<1x16xf32, #tpu.memory_space<vmem>>, vector<1x16xf32>
    %113 = vector.broadcast %112 : vector<1x16xf32> to vector<8x16xf32>
    %114 = arith.mulf %111, %113 : vector<8x16xf32>
    %c0_44 = arith.constant 0 : index
    %c0_45 = arith.constant 0 : index
    %115 = vector.load %arg12[%c0_44, %c0_45] : memref<1x16xf32, #tpu.memory_space<vmem>>, vector<1x16xf32>
    %116 = vector.broadcast %115 : vector<1x16xf32> to vector<8x16xf32>
    %117 = arith.addf %114, %116 : vector<8x16xf32>
    %cst_46 = arith.constant 0.000000e+00 : f32
    %118 = vector.broadcast %cst_46 : f32 to vector<8x16xf32>
    %119 = arith.maximumf %117, %118 : vector<8x16xf32>
    %120 = arith.truncf %119 : vector<8x16xf32> to vector<8x16xbf16>
    %cst_47 = arith.constant 0.000000e+00 : bf16
    %121 = vector.broadcast %cst_47 : bf16 to vector<5x16xbf16>
    %122 = tpu.concatenate %121, %120, %121 in 0 : vector<5x16xbf16>, vector<8x16xbf16>, vector<5x16xbf16> -> vector<18x16xbf16>
    %123 = vector.extract_strided_slice %122 {offsets = [0, 0], sizes = [8, 16], strides = [1, 1]} : vector<18x16xbf16> to vector<8x16xbf16>
    %cst_48 = arith.constant 0.000000e+00 : bf16
    %124 = vector.broadcast %cst_48 : bf16 to vector<8x16xbf16>
    %125 = vector.shape_cast %18 : vector<8x1xi1> to vector<8x1xi1>
    %126 = vector.broadcast %125 : vector<8x1xi1> to vector<8x16xi1>
    %127 = arith.select %126, %123, %124 : vector<8x16xi1>, vector<8x16xbf16>
    %128 = vector.extract_strided_slice %122 {offsets = [1, 0], sizes = [8, 16], strides = [1, 1]} : vector<18x16xbf16> to vector<8x16xbf16>
    %129 = vector.extract_strided_slice %122 {offsets = [2, 0], sizes = [8, 16], strides = [1, 1]} : vector<18x16xbf16> to vector<8x16xbf16>
    %cst_49 = arith.constant 0.000000e+00 : bf16
    %130 = vector.broadcast %cst_49 : bf16 to vector<8x16xbf16>
    %131 = vector.shape_cast %36 : vector<8x1xi1> to vector<8x1xi1>
    %132 = vector.broadcast %131 : vector<8x1xi1> to vector<8x16xi1>
    %133 = arith.select %132, %129, %130 : vector<8x16xi1>, vector<8x16xbf16>
    %134 = vector.extract_strided_slice %122 {offsets = [4, 0], sizes = [8, 16], strides = [1, 1]} : vector<18x16xbf16> to vector<8x16xbf16>
    %cst_50 = arith.constant 0.000000e+00 : bf16
    %135 = vector.broadcast %cst_50 : bf16 to vector<8x16xbf16>
    %136 = vector.shape_cast %18 : vector<8x1xi1> to vector<8x1xi1>
    %137 = vector.broadcast %136 : vector<8x1xi1> to vector<8x16xi1>
    %138 = arith.select %137, %134, %135 : vector<8x16xi1>, vector<8x16xbf16>
    %139 = vector.extract_strided_slice %122 {offsets = [5, 0], sizes = [8, 16], strides = [1, 1]} : vector<18x16xbf16> to vector<8x16xbf16>
    %140 = vector.extract_strided_slice %122 {offsets = [6, 0], sizes = [8, 16], strides = [1, 1]} : vector<18x16xbf16> to vector<8x16xbf16>
    %cst_51 = arith.constant 0.000000e+00 : bf16
    %141 = vector.broadcast %cst_51 : bf16 to vector<8x16xbf16>
    %142 = vector.shape_cast %36 : vector<8x1xi1> to vector<8x1xi1>
    %143 = vector.broadcast %142 : vector<8x1xi1> to vector<8x16xi1>
    %144 = arith.select %143, %140, %141 : vector<8x16xi1>, vector<8x16xbf16>
    %145 = vector.extract_strided_slice %122 {offsets = [8, 0], sizes = [8, 16], strides = [1, 1]} : vector<18x16xbf16> to vector<8x16xbf16>
    %cst_52 = arith.constant 0.000000e+00 : bf16
    %146 = vector.broadcast %cst_52 : bf16 to vector<8x16xbf16>
    %147 = vector.shape_cast %18 : vector<8x1xi1> to vector<8x1xi1>
    %148 = vector.broadcast %147 : vector<8x1xi1> to vector<8x16xi1>
    %149 = arith.select %148, %145, %146 : vector<8x16xi1>, vector<8x16xbf16>
    %150 = vector.extract_strided_slice %122 {offsets = [9, 0], sizes = [8, 16], strides = [1, 1]} : vector<18x16xbf16> to vector<8x16xbf16>
    %151 = vector.extract_strided_slice %122 {offsets = [10, 0], sizes = [8, 16], strides = [1, 1]} : vector<18x16xbf16> to vector<8x16xbf16>
    %cst_53 = arith.constant 0.000000e+00 : bf16
    %152 = vector.broadcast %cst_53 : bf16 to vector<8x16xbf16>
    %153 = vector.shape_cast %36 : vector<8x1xi1> to vector<8x1xi1>
    %154 = vector.broadcast %153 : vector<8x1xi1> to vector<8x16xi1>
    %155 = arith.select %154, %151, %152 : vector<8x16xi1>, vector<8x16xbf16>
    %156 = tpu.concatenate %127, %128, %133, %138, %139, %144, %149, %150, %155 in 1 : vector<8x16xbf16>, vector<8x16xbf16>, vector<8x16xbf16>, vector<8x16xbf16>, vector<8x16xbf16>, vector<8x16xbf16>, vector<8x16xbf16>, vector<8x16xbf16>, vector<8x16xbf16> -> vector<8x144xbf16>
    %c0_54 = arith.constant 0 : index
    %c0_55 = arith.constant 0 : index
    %157 = vector.load %arg13[%c0_54, %c0_55] : memref<144x8xbf16, #tpu.memory_space<vmem>>, vector<144x8xbf16>
    %cst_56 = arith.constant dense<0.000000e+00> : vector<8x8xf32>
    %158 = tpu.matmul %156, %157, %cst_56 {dimension_numbers = #tpu.dot_dimension_numbers<[1], [0], [0], [1], [0, 0, 1, 1], [], []>} : vector<8x144xbf16>, vector<144x8xbf16>, vector<8x8xf32> -> vector<8x8xf32>
    %159 = arith.truncf %158 : vector<8x8xf32> to vector<8x8xbf16>
    %160 = tpu.concatenate %99, %159 in 1 : vector<8x24xbf16>, vector<8x8xbf16> -> vector<8x32xbf16>
    %c0_57 = arith.constant 0 : index
    %c0_58 = arith.constant 0 : index
    %c0_59 = arith.constant 0 : index
    %161 = vector.load %arg14[%c0_57, %c0_58, %c0_59] : memref<1x8x32xbf16, #tpu.memory_space<vmem>>, vector<1x8x32xbf16>
    %162 = vector.shape_cast %161 : vector<1x8x32xbf16> to vector<8x32xbf16>
    %163 = vector.shape_cast %160 : vector<8x32xbf16> to vector<1x8x32xbf16>
    tpu.vector_store %arg14[%c0_57, %c0_58, %c0_59], %163 {strides = array<i32>} : memref<1x8x32xbf16, #tpu.memory_space<vmem>>, vector<1x8x32xbf16>,
    return
  }
  func.func @transform_0(%arg0: i32) -> (i32, i32, i32) {
    %c0_i32 = arith.constant 0 : i32
    %c0_i32_0 = arith.constant 0 : i32
    %c0_i32_1 = arith.constant 0 : i32
    return %arg0, %c0_i32, %c0_i32_0 : i32, i32, i32
  }
  func.func @transform_1(%arg0: i32) -> (i32, i32) {
    %c0_i32 = arith.constant 0 : i32
    %c0_i32_0 = arith.constant 0 : i32
    %c0_i32_1 = arith.constant 0 : i32
    return %c0_i32, %c0_i32_0 : i32, i32
  }
  func.func @transform_2(%arg0: i32) -> (i32, i32) {
    %c0_i32 = arith.constant 0 : i32
    %c0_i32_0 = arith.constant 0 : i32
    %c0_i32_1 = arith.constant 0 : i32
    return %c0_i32, %c0_i32_0 : i32, i32
  }
  func.func @transform_3(%arg0: i32) -> (i32, i32) {
    %c0_i32 = arith.constant 0 : i32
    %c0_i32_0 = arith.constant 0 : i32
    %c0_i32_1 = arith.constant 0 : i32
    return %c0_i32, %c0_i32_0 : i32, i32
  }
  func.func @transform_4(%arg0: i32) -> (i32, i32) {
    %c0_i32 = arith.constant 0 : i32
    %c0_i32_0 = arith.constant 0 : i32
    %c0_i32_1 = arith.constant 0 : i32
    return %c0_i32, %c0_i32_0 : i32, i32
  }
  func.func @transform_5(%arg0: i32) -> (i32, i32) {
    %c0_i32 = arith.constant 0 : i32
    %c0_i32_0 = arith.constant 0 : i32
    %c0_i32_1 = arith.constant 0 : i32
    return %c0_i32, %c0_i32_0 : i32, i32
  }
  func.func @transform_6(%arg0: i32) -> (i32, i32) {
    %c0_i32 = arith.constant 0 : i32
    %c0_i32_0 = arith.constant 0 : i32
    %c0_i32_1 = arith.constant 0 : i32
    return %c0_i32, %c0_i32_0 : i32, i32
  }
  func.func @transform_7(%arg0: i32) -> (i32, i32) {
    %c0_i32 = arith.constant 0 : i32
    %c0_i32_0 = arith.constant 0 : i32
    %c0_i32_1 = arith.constant 0 : i32
    return %c0_i32, %c0_i32_0 : i32, i32
  }
  func.func @transform_8(%arg0: i32) -> (i32, i32) {
    %c0_i32 = arith.constant 0 : i32
    %c0_i32_0 = arith.constant 0 : i32
    %c0_i32_1 = arith.constant 0 : i32
    return %c0_i32, %c0_i32_0 : i32, i32
  }
  func.func @transform_9(%arg0: i32) -> (i32, i32) {
    %c0_i32 = arith.constant 0 : i32
    %c0_i32_0 = arith.constant 0 : i32
    %c0_i32_1 = arith.constant 0 : i32
    return %c0_i32, %c0_i32_0 : i32, i32
  }
  func.func @transform_10(%arg0: i32) -> (i32, i32) {
    %c0_i32 = arith.constant 0 : i32
    %c0_i32_0 = arith.constant 0 : i32
    %c0_i32_1 = arith.constant 0 : i32
    return %c0_i32, %c0_i32_0 : i32, i32
  }
  func.func @transform_11(%arg0: i32) -> (i32, i32) {
    %c0_i32 = arith.constant 0 : i32
    %c0_i32_0 = arith.constant 0 : i32
    %c0_i32_1 = arith.constant 0 : i32
    return %c0_i32, %c0_i32_0 : i32, i32
  }
  func.func @transform_12(%arg0: i32) -> (i32, i32) {
    %c0_i32 = arith.constant 0 : i32
    %c0_i32_0 = arith.constant 0 : i32
    %c0_i32_1 = arith.constant 0 : i32
    return %c0_i32, %c0_i32_0 : i32, i32
  }
  func.func @transform_13(%arg0: i32) -> (i32, i32, i32) {
    %c0_i32 = arith.constant 0 : i32
    %c0_i32_0 = arith.constant 0 : i32
    %c0_i32_1 = arith.constant 0 : i32
    return %arg0, %c0_i32, %c0_i32_0 : i32, i32, i32
  }
}

module attributes {stable_mosaic.version = 11 : i64} {
  func.func @_head_kernel(%arg0: i32, %arg1: memref<6x8x32xbf16, #tpu.memory_space<vmem>>, %arg2: memref<1x32xf32, #tpu.memory_space<vmem>>, %arg3: memref<1x32xf32, #tpu.memory_space<vmem>>, %arg4: memref<32x10xf32, #tpu.memory_space<vmem>>, %arg5: memref<1x10xf32, #tpu.memory_space<vmem>>, %arg6: memref<6x10xf32, #tpu.memory_space<vmem>>) attributes {dimension_semantics = [#tpu.dimension_semantics<arbitrary>], iteration_bounds = array<i64: 1>, scalar_prefetch = 0 : i64, scratch_operands = 0 : i64, tpu.core_type = #tpu.core_type<tc>, window_params = [{pipeline_mode = #tpu.pipeline_mode<synchronous>, transform_indices = @transform_0, window_bounds = array<i64: 6, 8, 32>}, {pipeline_mode = #tpu.pipeline_mode<synchronous>, transform_indices = @transform_1, window_bounds = array<i64: 1, 32>}, {pipeline_mode = #tpu.pipeline_mode<synchronous>, transform_indices = @transform_2, window_bounds = array<i64: 1, 32>}, {pipeline_mode = #tpu.pipeline_mode<synchronous>, transform_indices = @transform_3, window_bounds = array<i64: 32, 10>}, {pipeline_mode = #tpu.pipeline_mode<synchronous>, transform_indices = @transform_4, window_bounds = array<i64: 1, 10>}, {pipeline_mode = #tpu.pipeline_mode<synchronous>, transform_indices = @transform_5, window_bounds = array<i64: 6, 10>}]} {
    %c0 = arith.constant 0 : index
    %c0_0 = arith.constant 0 : index
    %c0_1 = arith.constant 0 : index
    %0 = vector.load %arg1[%c0, %c0_0, %c0_1] : memref<6x8x32xbf16, #tpu.memory_space<vmem>>, vector<6x8x32xbf16>
    %1 = arith.extf %0 : vector<6x8x32xbf16> to vector<6x8x32xf32>
    %c0_2 = arith.constant 0 : index
    %c0_3 = arith.constant 0 : index
    %2 = vector.load %arg2[%c0_2, %c0_3] : memref<1x32xf32, #tpu.memory_space<vmem>>, vector<1x32xf32>
    %3 = vector.shape_cast %2 : vector<1x32xf32> to vector<1x1x32xf32>
    %4 = vector.broadcast %3 : vector<1x1x32xf32> to vector<6x8x32xf32>
    %5 = arith.mulf %1, %4 : vector<6x8x32xf32>
    %c0_4 = arith.constant 0 : index
    %c0_5 = arith.constant 0 : index
    %6 = vector.load %arg3[%c0_4, %c0_5] : memref<1x32xf32, #tpu.memory_space<vmem>>, vector<1x32xf32>
    %7 = vector.shape_cast %6 : vector<1x32xf32> to vector<1x1x32xf32>
    %8 = vector.broadcast %7 : vector<1x1x32xf32> to vector<6x8x32xf32>
    %9 = arith.addf %5, %8 : vector<6x8x32xf32>
    %cst = arith.constant 0.000000e+00 : f32
    %10 = vector.broadcast %cst : f32 to vector<6x8x32xf32>
    %11 = arith.maximumf %9, %10 : vector<6x8x32xf32>
    %cst_6 = arith.constant dense<0.000000e+00> : vector<6x32xf32>
    %12 = vector.multi_reduction <add>, %11, %cst_6 [1] : vector<6x8x32xf32> to vector<6x32xf32>
    %cst_7 = arith.constant 8.000000e+00 : f32
    %13 = vector.broadcast %cst_7 : f32 to vector<6x32xf32>
    %14 = arith.divf %12, %13 : vector<6x32xf32>
    %c0_8 = arith.constant 0 : index
    %c0_9 = arith.constant 0 : index
    %15 = vector.load %arg4[%c0_8, %c0_9] : memref<32x10xf32, #tpu.memory_space<vmem>>, vector<32x10xf32>
    %cst_10 = arith.constant dense<0.000000e+00> : vector<6x10xf32>
    %16 = tpu.matmul %14, %15, %cst_10 {dimension_numbers = #tpu.dot_dimension_numbers<[1], [0], [0], [1], [0, 0, 1, 1], [], []>} : vector<6x32xf32>, vector<32x10xf32>, vector<6x10xf32> -> vector<6x10xf32>
    %c0_11 = arith.constant 0 : index
    %c0_12 = arith.constant 0 : index
    %17 = vector.load %arg5[%c0_11, %c0_12] : memref<1x10xf32, #tpu.memory_space<vmem>>, vector<1x10xf32>
    %18 = vector.broadcast %17 : vector<1x10xf32> to vector<6x10xf32>
    %19 = arith.addf %16, %18 : vector<6x10xf32>
    %c0_13 = arith.constant 0 : index
    %c0_14 = arith.constant 0 : index
    %20 = vector.load %arg6[%c0_13, %c0_14] : memref<6x10xf32, #tpu.memory_space<vmem>>, vector<6x10xf32>
    tpu.vector_store %arg6[%c0_13, %c0_14], %19 {strides = array<i32>} : memref<6x10xf32, #tpu.memory_space<vmem>>, vector<6x10xf32>,
    return
  }
  func.func @transform_0(%arg0: i32) -> (i32, i32, i32) {
    %c0_i32 = arith.constant 0 : i32
    %c0_i32_0 = arith.constant 0 : i32
    %c0_i32_1 = arith.constant 0 : i32
    %c0_i32_2 = arith.constant 0 : i32
    return %c0_i32, %c0_i32_0, %c0_i32_1 : i32, i32, i32
  }
  func.func @transform_1(%arg0: i32) -> (i32, i32) {
    %c0_i32 = arith.constant 0 : i32
    %c0_i32_0 = arith.constant 0 : i32
    %c0_i32_1 = arith.constant 0 : i32
    return %c0_i32, %c0_i32_0 : i32, i32
  }
  func.func @transform_2(%arg0: i32) -> (i32, i32) {
    %c0_i32 = arith.constant 0 : i32
    %c0_i32_0 = arith.constant 0 : i32
    %c0_i32_1 = arith.constant 0 : i32
    return %c0_i32, %c0_i32_0 : i32, i32
  }
  func.func @transform_3(%arg0: i32) -> (i32, i32) {
    %c0_i32 = arith.constant 0 : i32
    %c0_i32_0 = arith.constant 0 : i32
    %c0_i32_1 = arith.constant 0 : i32
    return %c0_i32, %c0_i32_0 : i32, i32
  }
  func.func @transform_4(%arg0: i32) -> (i32, i32) {
    %c0_i32 = arith.constant 0 : i32
    %c0_i32_0 = arith.constant 0 : i32
    %c0_i32_1 = arith.constant 0 : i32
    return %c0_i32, %c0_i32_0 : i32, i32
  }
  func.func @transform_5(%arg0: i32) -> (i32, i32) {
    %c0_i32 = arith.constant 0 : i32
    %c0_i32_0 = arith.constant 0 : i32
    %c0_i32_1 = arith.constant 0 : i32
    return %c0_i32, %c0_i32_0 : i32, i32
  }
}

module attributes {stable_mosaic.version = 11 : i64} {
  func.func @_attention_kernel(%arg0: i32, %arg1: memref<2x3x10xf32, #tpu.memory_space<vmem>>, %arg2: memref<10x10xf32, #tpu.memory_space<vmem>>, %arg3: memref<1x10xf32, #tpu.memory_space<vmem>>, %arg4: memref<2x1x10xf32, #tpu.memory_space<vmem>>) attributes {dimension_semantics = [#tpu.dimension_semantics<arbitrary>], iteration_bounds = array<i64: 1>, scalar_prefetch = 0 : i64, scratch_operands = 0 : i64, tpu.core_type = #tpu.core_type<tc>, window_params = [{pipeline_mode = #tpu.pipeline_mode<synchronous>, transform_indices = @transform_0, window_bounds = array<i64: 2, 3, 10>}, {pipeline_mode = #tpu.pipeline_mode<synchronous>, transform_indices = @transform_1, window_bounds = array<i64: 10, 10>}, {pipeline_mode = #tpu.pipeline_mode<synchronous>, transform_indices = @transform_2, window_bounds = array<i64: 1, 10>}, {pipeline_mode = #tpu.pipeline_mode<synchronous>, transform_indices = @transform_3, window_bounds = array<i64: 2, 1, 10>}]} {
    %c0 = arith.constant 0 : index
    %c0_0 = arith.constant 0 : index
    %c0_1 = arith.constant 0 : index
    %0 = vector.load %arg1[%c0, %c0_0, %c0_1] : memref<2x3x10xf32, #tpu.memory_space<vmem>>, vector<2x3x10xf32>
    %cst = arith.constant dense<0xFF800000> : vector<2x3xf32>
    %1 = vector.multi_reduction <maximumf>, %0, %cst [2] : vector<2x3x10xf32> to vector<2x3xf32>
    %2 = vector.shape_cast %1 : vector<2x3xf32> to vector<2x3x1xf32>
    %3 = vector.broadcast %2 : vector<2x3x1xf32> to vector<2x3x10xf32>
    %4 = arith.subf %0, %3 : vector<2x3x10xf32>
    %5 = math.exp %4 : vector<2x3x10xf32>
    %cst_2 = arith.constant dense<0.000000e+00> : vector<2x3xf32>
    %6 = vector.multi_reduction <add>, %5, %cst_2 [2] : vector<2x3x10xf32> to vector<2x3xf32>
    %7 = vector.shape_cast %6 : vector<2x3xf32> to vector<2x3x1xf32>
    %8 = math.log %7 : vector<2x3x1xf32>
    %9 = vector.broadcast %8 : vector<2x3x1xf32> to vector<2x3x10xf32>
    %10 = arith.subf %4, %9 : vector<2x3x10xf32>
    %11 = math.exp %10 : vector<2x3x10xf32>
    %12 = vector.shape_cast %11 : vector<2x3x10xf32> to vector<6x10xf32>
    %c0_3 = arith.constant 0 : index
    %c0_4 = arith.constant 0 : index
    %13 = vector.load %arg2[%c0_3, %c0_4] : memref<10x10xf32, #tpu.memory_space<vmem>>, vector<10x10xf32>
    %cst_5 = arith.constant dense<0.000000e+00> : vector<6x10xf32>
    %14 = tpu.matmul %12, %13, %cst_5 {dimension_numbers = #tpu.dot_dimension_numbers<[1], [0], [0], [1], [0, 0, 1, 1], [], []>} : vector<6x10xf32>, vector<10x10xf32>, vector<6x10xf32> -> vector<6x10xf32>
    %cst_6 = arith.constant 0.000000e+00 : f32
    %15 = vector.broadcast %cst_6 : f32 to vector<6x10xf32>
    %16 = arith.maximumf %14, %15 : vector<6x10xf32>
    %17 = vector.shape_cast %16 : vector<6x10xf32> to vector<2x3x10xf32>
    %c0_7 = arith.constant 0 : index
    %c0_8 = arith.constant 0 : index
    %18 = vector.load %arg3[%c0_7, %c0_8] : memref<1x10xf32, #tpu.memory_space<vmem>>, vector<1x10xf32>
    %19 = vector.shape_cast %18 : vector<1x10xf32> to vector<1x1x10xf32>
    %20 = vector.broadcast %19 : vector<1x1x10xf32> to vector<2x3x10xf32>
    %21 = arith.mulf %17, %20 : vector<2x3x10xf32>
    %cst_9 = arith.constant dense<0.000000e+00> : vector<2x3xf32>
    %22 = vector.multi_reduction <add>, %21, %cst_9 [2] : vector<2x3x10xf32> to vector<2x3xf32>
    %23 = vector.shape_cast %22 : vector<2x3xf32> to vector<2x3x1xf32>
    %cst_10 = arith.constant dense<0xFF800000> : vector<2x1xf32>
    %24 = vector.multi_reduction <maximumf>, %23, %cst_10 [1] : vector<2x3x1xf32> to vector<2x1xf32>
    %25 = vector.shape_cast %24 : vector<2x1xf32> to vector<2x1x1xf32>
    %26 = vector.broadcast %25 : vector<2x1x1xf32> to vector<2x3x1xf32>
    %27 = arith.subf %23, %26 : vector<2x3x1xf32>
    %28 = math.exp %27 : vector<2x3x1xf32>
    %cst_11 = arith.constant dense<0.000000e+00> : vector<2x1xf32>
    %29 = vector.multi_reduction <add>, %28, %cst_11 [1] : vector<2x3x1xf32> to vector<2x1xf32>
    %30 = vector.shape_cast %29 : vector<2x1xf32> to vector<2x1x1xf32>
    %31 = math.log %30 : vector<2x1x1xf32>
    %32 = vector.broadcast %31 : vector<2x1x1xf32> to vector<2x3x1xf32>
    %33 = arith.subf %27, %32 : vector<2x3x1xf32>
    %34 = vector.broadcast %33 : vector<2x3x1xf32> to vector<2x3x10xf32>
    %35 = arith.addf %34, %10 : vector<2x3x10xf32>
    %cst_12 = arith.constant dense<0xFF800000> : vector<2x10xf32>
    %36 = vector.multi_reduction <maximumf>, %35, %cst_12 [1] : vector<2x3x10xf32> to vector<2x10xf32>
    %37 = vector.shape_cast %36 : vector<2x10xf32> to vector<2x1x10xf32>
    %38 = vector.broadcast %37 : vector<2x1x10xf32> to vector<2x3x10xf32>
    %39 = arith.subf %35, %38 : vector<2x3x10xf32>
    %40 = math.exp %39 : vector<2x3x10xf32>
    %cst_13 = arith.constant dense<0.000000e+00> : vector<2x10xf32>
    %41 = vector.multi_reduction <add>, %40, %cst_13 [1] : vector<2x3x10xf32> to vector<2x10xf32>
    %42 = vector.shape_cast %41 : vector<2x10xf32> to vector<2x1x10xf32>
    %43 = math.log %42 : vector<2x1x10xf32>
    %44 = arith.addf %37, %43 : vector<2x1x10xf32>
    %c0_14 = arith.constant 0 : index
    %c0_15 = arith.constant 0 : index
    %c0_16 = arith.constant 0 : index
    %45 = vector.load %arg4[%c0_14, %c0_15, %c0_16] : memref<2x1x10xf32, #tpu.memory_space<vmem>>, vector<2x1x10xf32>
    tpu.vector_store %arg4[%c0_14, %c0_15, %c0_16], %44 {strides = array<i32>} : memref<2x1x10xf32, #tpu.memory_space<vmem>>, vector<2x1x10xf32>,
    return
  }
  func.func @transform_0(%arg0: i32) -> (i32, i32, i32) {
    %c0_i32 = arith.constant 0 : i32
    %c0_i32_0 = arith.constant 0 : i32
    %c0_i32_1 = arith.constant 0 : i32
    %c0_i32_2 = arith.constant 0 : i32
    return %c0_i32, %c0_i32_0, %c0_i32_1 : i32, i32, i32
  }
  func.func @transform_1(%arg0: i32) -> (i32, i32) {
    %c0_i32 = arith.constant 0 : i32
    %c0_i32_0 = arith.constant 0 : i32
    %c0_i32_1 = arith.constant 0 : i32
    return %c0_i32, %c0_i32_0 : i32, i32
  }
  func.func @transform_2(%arg0: i32) -> (i32, i32) {
    %c0_i32 = arith.constant 0 : i32
    %c0_i32_0 = arith.constant 0 : i32
    %c0_i32_1 = arith.constant 0 : i32
    return %c0_i32, %c0_i32_0 : i32, i32
  }
  func.func @transform_3(%arg0: i32) -> (i32, i32, i32) {
    %c0_i32 = arith.constant 0 : i32
    %c0_i32_0 = arith.constant 0 : i32
    %c0_i32_1 = arith.constant 0 : i32
    %c0_i32_2 = arith.constant 0 : i32
    return %c0_i32, %c0_i32_0, %c0_i32_1 : i32, i32, i32
  }
}

</mosaic_0001>

<bundles_post_ra>
// kernel: _lambda_.8
= control target key start
LH: loop header
LB: loop body
LE: loop exit
PB: predicated region body
PF: predicated region fallthrough
CT: control target
= control target key end

     0   :  { %s631_s15 = smov 0   ;;  %s672_s0 = inlined_call_operand.vmem [shape: bf16[6,32,32], index: 0, kind: input, shape index: {}]   ;;  %s673_s1 = inlined_call_operand.vmem [shape: f32[1,32], index: 1, kind: input, shape index: {}]   ;;  %s674_s2 = inlined_call_operand.vmem [shape: f32[1,32], index: 2, kind: input, shape index: {}]   ;;  %s675_s3 = inlined_call_operand.vmem [shape: bf16[32,16], index: 3, kind: input, shape index: {}]   ;;  %s676_s4 = inlined_call_operand.vmem [shape: bf16[6,8,16], index: 4, kind: output, shape index: {}]  }
   0x1 LB: > { %s532_s16 = sadd.s32 4294967295, %s603_s15   ;;  %p536_p0 = scmp.ge.s32.totalorder %s603_s15, 1  ;;  %s603_s15 = sphi %s631_s15, %s14_s15  }
   0x2   : > { %p162_p1 = scmp.lt.s32.totalorder %s603_s15, 7 }
   0x4   : > { %p163_p2 = pnand %p536_p0, %p162_p1 }
   0x5   : > { %p187_p3 = scmp.lt.s32.totalorder (!%p163_p2), %s532_s16, 5 }
   0x6   : > { %166 = sbr.rel (%p163_p2) target bundleno = 264 (0x108), region = 36 }
   0xb   : > { %v595_v0 = vld [vmem:[%s675_s3 + $0x8] sm:$0xff]   ;;  %v596_v1 = vld [vmem:[%s675_s3] sm:$0xff]   ;;  %s678_s16 = smov (!%p187_p3, %s532_s16), 5  ;;  %vm249_vm0 = vcmask 261120   ;;  %v605_v24 = vmov 1983009808   ;;  %v318_v26 = vlaneseq }
   0xc   : > { %578 = vmatprep.subr.bf16.mxu0 %v595_v0  ;;  %s556_s21 = sshll.u32 %s678_s16, 4  ;;  %v540_v4 = vld [vmem:[%s673_s1] ss:$0 sm:$0xff]  ;;  %v316_v25 = vunpack.c.l.s4 %v605_v24  ;;  %vm305_vm1 = vcmask 130048   ;;  %vm356_vm2 = vcmask 123904   ;;  %vm461_vm3 = vcmask 1041409  }
   0xd   : > { %579 = vmatpush3.bf16.msra.mxu0 %v595_v0  ;;  %s191_s24 = scalar_lea.vmem %s672_s0, %s556_s21  ;;  %v541_v9 = vld [vmem:[%s674_s2] ss:$0 sm:$0xff]  ;;  %v319_v29 = vshrl.u32 %v318_v26, 7  ;;  %vm463_vm4 = vcmask 1042434   ;;  %vm465_vm5 = vcmask 1043459   ;;  %vm467_vm6 = vcmask 1044484  }
   0xe   : > { %580 = vmatprep.subr.bf16.mxu0 %v596_v1  ;;  %v566_v2 = vld [vmem:[%s191_s24] sm:$0xff]   ;;  %v573_v3 = vld [vmem:[%s191_s24 + $0x8] sm:$0xff]   ;;  %v317_v28 = vunpack.c.0.s8 %v316_v25  ;;  %vm469_vm7 = vcmask 1045509   ;;  %vm471_vm8 = vcmask 1046534   ;;  %s539_s29 = sshll.u32 %s678_s16, 2  ;;  %vm473_vm9 = vcmask 1047559  }
   0xf   : > { %v567_v5 = vunpack.c.l.bf16 %v566_v2  ;;  %v568_v6 = vunpack.c.h.bf16 %v566_v2  ;;  %v571_v7 = vunpack.c.l.bf16 %v573_v3  ;;  %v572_v8 = vunpack.c.h.bf16 %v573_v3  ;;  %s195_s6 = scalar_lea.vmem %s676_s4, %s539_s29 }
  0x10   : > { %v320_v32 = vsub.s32 %v317_v28, %v319_v29  ;;  %vm477_vm10 = vcmask 125952  }
  0x11   : > { %581 = vmatpush3.bf16.msra.mxu0 %v596_v1  ;;  %v212_v10 = vmul.f32 %v567_v5, %v540_v4  ;;  %v213_v11 = vmul.f32 %v568_v6, %v540_v4  ;;  %v214_v12 = vmul.f32 %v571_v7, %v540_v4  ;;  %v215_v13 = vmul.f32 %v572_v8, %v540_v4 }
  0x13   : > { %v223_v14 = vadd.f32 %v541_v9, %v212_v10  ;;  %v224_v15 = vadd.f32 %v541_v9, %v213_v11  ;;  %v225_v16 = vadd.f32 %v541_v9, %v214_v12  ;;  %v226_v17 = vadd.f32 %v541_v9, %v215_v13 }
  0x15   : > { %v227_v18 = vmax.f32 %v223_v14, 0.0  ;;  %v228_v19 = vmax.f32 %v224_v15, 0.0  ;;  %v229_v20 = vmax.f32 %v225_v16, 0.0  ;;  %v230_v21 = vmax.f32 %v226_v17, 0.0 }
  0x17   : > { %v231_v22 = vpack.c.bf16 %v228_v19, %v227_v18  ;;  %v232_v23 = vpack.c.bf16 %v230_v21, %v229_v20 }
  0x19   : > { %582 = vmatprep.mubr.msk.bf16.mxu0 %vm249_vm0, %v231_v22 }
  0x1a   : > { %583 = vmatmul.mubr.msk.bf16.vlgmr.msra.gmra.mxu0 %vm249_vm0, %v232_v23 }
  0xda   : > { %v584_v27 = vpop.f32.mrf.mxu0 }
  0xdb   : > { %v309_v33 = vsel %vm305_vm1, %v584_v27, 0.0 }
  0xdc   : > { %v290_v30 = vpop.f32.mrf.mxu0 }
  0xdd   : > { %v306_v37 = vsel %vm305_vm1, %v290_v30, 0.0 }
  0xde   : > { %v585_v31 = vpop.f32.mrf.mxu0 }
  0xdf   : > { %v310_v34 = vsel %vm305_vm1, %v585_v31, 0.0 }
  0xe0   : > { %v311_v35 = vadd.f32 %v310_v34, %v309_v33  ;;  %v293_v36 = vpop.f32.mrf.mxu0 }
  0xe1   : > { %v307_v38 = vsel %vm305_vm1, %v293_v36, 0.0 }
  0xe2   : > { %v331_v39 = vcombine.high %v311_v35, %v311_v35  ;;  %v338_v40 = vrot.slane %v311_v35, %v320_v32  ;;  %v308_v41 = vadd.f32 %v307_v38, %v306_v37 }
  0xe4   : > { %v345_v42 = vrot.slane %v331_v39, %v320_v32  ;;  %v346_v43 = vcombine.high %v338_v40, %v338_v40  ;;  %v385_v44 = vsel %vm356_vm2, %v338_v40, 0.0  ;;  %v314_v45 = vcombine.high %v308_v41, %v308_v41 }
  0xe5   : > { %v386_v46 = vrot.slane %v385_v44, 4  ;;  %v321_v47 = vrot.slane %v308_v41, %v320_v32 }
  0xe6   : > { %v347_v48 = vcombine.high %v345_v42, %v345_v42  ;;  %v392_v49 = vsel %vm356_vm2, %v346_v43, 0.0  ;;  %v399_v50 = vsel %vm356_vm2, %v345_v42, 0.0  ;;  %v328_v51 = vrot.slane %v314_v45, %v320_v32 }
  0xe7   : > { %v387_v52 = vadd.f32 %v386_v46, %v385_v44  ;;  %v393_v53 = vrot.slane %v392_v49, 4  ;;  %v400_v54 = vrot.slane %v399_v50, 4  ;;  %v329_v55 = vcombine.high %v321_v47, %v321_v47 }
  0xe8   : > { %v406_v56 = vsel %vm356_vm2, %v347_v48, 0.0  ;;  %v330_v57 = vcombine.high %v328_v51, %v328_v51  ;;  %v357_v58 = vsel %vm356_vm2, %v321_v47, 0.0  ;;  %v371_v59 = vsel %vm356_vm2, %v328_v51, 0.0 }
  0xe9   : > { %v388_v60 = vrot.slane %v387_v52, 2  ;;  %v394_v61 = vadd.f32 %v393_v53, %v392_v49  ;;  %v401_v62 = vadd.f32 %v400_v54, %v399_v50  ;;  %v407_v63 = vrot.slane %v406_v56, 4 }
  0xea   : > { %v358_v0 = vrot.slane %v357_v58, 4  ;;  %v364_v1 = vsel %vm356_vm2, %v329_v55, 0.0  ;;  %v372_v2 = vrot.slane %v371_v59, 4  ;;  %v378_v3 = vsel %vm356_vm2, %v330_v57, 0.0 }
  0xeb   : > { %v389_v4 = vadd.f32 %v388_v60, %v387_v52  ;;  %v395_v5 = vrot.slane %v394_v61, 2  ;;  %v402_v6 = vrot.slane %v401_v62, 2  ;;  %v408_v7 = vadd.f32 %v407_v63, %v406_v56 }
  0xec   : > { %v359_v8 = vadd.f32 %v358_v0, %v357_v58  ;;  %v365_v9 = vrot.slane %v364_v1, 4  ;;  %v373_v10 = vadd.f32 %v372_v2, %v371_v59  ;;  %v379_v11 = vrot.slane %v378_v3, 4 }
  0xed   : > { %v396_v12 = vadd.f32 %v395_v5, %v394_v61  ;;  %v403_v13 = vadd.f32 %v402_v6, %v401_v62  ;;  %v409_v14 = vrot.slane %v408_v7, 2  ;;  %v390_v19 = vrot.slane %v389_v4, 1 }
  0xee   : > { %v360_v15 = vrot.slane %v359_v8, 2  ;;  %v366_v16 = vadd.f32 %v365_v9, %v364_v1  ;;  %v374_v17 = vrot.slane %v373_v10, 2  ;;  %v380_v18 = vadd.f32 %v379_v11, %v378_v3 }
  0xef   : > { %v397_v20 = vrot.slane %v396_v12, 1  ;;  %v410_v21 = vadd.f32 %v409_v14, %v408_v7  ;;  %v404_v26 = vrot.slane %v403_v13, 1  ;;  %v391_v32 = vadd.f32 %v390_v19, %v389_v4 }
  0xf0   : > { %v361_v22 = vadd.f32 %v360_v15, %v359_v8  ;;  %v367_v23 = vrot.slane %v366_v16, 2  ;;  %v375_v24 = vadd.f32 %v374_v17, %v373_v10  ;;  %v381_v25 = vrot.slane %v380_v18, 2 }
  0xf1   : > { %v411_v27 = vrot.slane %v410_v21, 1  ;;  %v398_v33 = vadd.f32 %v397_v20, %v396_v12  ;;  %v405_v38 = vadd.f32 %v404_v26, %v403_v13  ;;  %v417_v44 = vmul.f32 0.25, %v391_v32 }
  0xf2   : > { %v362_v28 = vrot.slane %v361_v22, 1  ;;  %v368_v29 = vadd.f32 %v367_v23, %v366_v16  ;;  %v376_v30 = vrot.slane %v375_v24, 1  ;;  %v382_v31 = vadd.f32 %v381_v25, %v380_v18 }
  0xf3   : > { %v412_v39 = vadd.f32 %v411_v27, %v410_v21  ;;  %v418_v45 = vmul.f32 0.25, %v398_v33  ;;  %v419_v50 = vmul.f32 0.25, %v405_v38  ;;  %v561_v54 = vpack.c.bf16 %v417_v44, %v417_v44 }
  0xf4   : > { %v363_v34 = vadd.f32 %v362_v28, %v361_v22  ;;  %v369_v35 = vrot.slane %v368_v29, 1  ;;  %v377_v36 = vadd.f32 %v376_v30, %v375_v24  ;;  %v383_v37 = vrot.slane %v382_v31, 1 }
  0xf5   : > { %v420_v51 = vmul.f32 0.25, %v412_v39  ;;  %v562_v56 = vpack.c.bf16 %v418_v45, %v418_v45  ;;  %v563_v60 = vpack.c.bf16 %v419_v50, %v419_v50  ;;  %v457_v63 = vunpack.c.l.b16 %v561_v54 }
  0xf6   : > { %v370_v40 = vadd.f32 %v369_v35, %v368_v29  ;;  %v384_v41 = vadd.f32 %v383_v37, %v382_v31  ;;  %v413_v42 = vmul.f32 0.25, %v363_v34  ;;  %v415_v43 = vmul.f32 0.25, %v377_v36 }
  0xf7   : > { %v564_v61 = vpack.c.bf16 %v420_v51, %v420_v51  ;;  %v458_v1 = vunpack.c.l.b16 %v562_v56  ;;  %v459_v3 = vunpack.c.l.b16 %v563_v60 }
  0xf8   : > { %v414_v46 = vmul.f32 0.25, %v370_v40  ;;  %v416_v47 = vmul.f32 0.25, %v384_v41  ;;  %v557_v48 = vpack.c.bf16 %v413_v42, %v413_v42  ;;  %v559_v49 = vpack.c.bf16 %v415_v43, %v415_v43 }
  0xf9   : > { %v460_v5 = vunpack.c.l.b16 %v564_v61 }
  0xfa   : > { %v558_v52 = vpack.c.bf16 %v414_v46, %v414_v46  ;;  %v560_v53 = vpack.c.bf16 %v416_v47, %v416_v47  ;;  %v455_v55 = vunpack.c.l.b16 %v559_v49  ;;  %v453_v57 = vunpack.c.l.b16 %v557_v48 }
  0xfc   : > { %v454_v58 = vunpack.c.l.b16 %v558_v52  ;;  %v456_v59 = vunpack.c.l.b16 %v560_v53 }
  0xfe   : > { %v462_v62 = vsel %vm461_vm3, %v454_v58, %v453_v57 }
  0xff   : > { %v464_v0 = vsel %vm463_vm4, %v455_v55, %v462_v62 }
 0x100   : > { %v466_v2 = vsel %vm465_vm5, %v456_v59, %v464_v0 }
 0x101   : > { %v468_v4 = vsel %vm467_vm6, %v457_v63, %v466_v2 }
 0x102   : > { %v470_v6 = vsel %vm469_vm7, %v458_v1, %v468_v4 }
 0x103   : > { %v472_v7 = vsel %vm471_vm8, %v459_v3, %v470_v6 }
 0x104   : > { %v474_v8 = vsel %vm473_vm9, %v460_v5, %v472_v7 }
 0x105   : > { %v475_v9 = vpack.c.b16 %v474_v8, %v474_v8 }
 0x107   : > { %478 = vst.msk [vmem:[%s195_s6] sm:$0xf] %vm477_vm10, %v475_v9 }
 0x108 PF: > { %s14_s15 = sadd.s32 1, %s603_s15  }
 0x109   : > { %p11_p4 = scmp.ge.s32.totalorder %s14_s15, 8  }
 0x10b   :  { %13 = sbr.rel (!%p11_p4) target bundleno = 1 (0x1), region = 66 }

// kernel: _lambda_.6
= control target key start
LH: loop header
LB: loop body
LE: loop exit
PB: predicated region body
PF: predicated region fallthrough
CT: control target
= control target key end

     0   :  { %s1892_s18 = smov 0   ;;  %s3182_s0 = inlined_call_operand.vmem [shape: bf16[6,128,2], index: 0, kind: input, shape index: {}]   ;;  %s3183_s1 = inlined_call_operand.vmem [shape: bf16[18,16], index: 1, kind: input, shape index: {}]   ;;  %s3184_s2 = inlined_call_operand.vmem [shape: f32[1,16], index: 2, kind: input, shape index: {}]   ;;  %s3185_s3 = inlined_call_operand.vmem [shape: f32[1,16], index: 3, kind: input, shape index: {}]   ;;  %s3186_s4 = inlined_call_operand.vmem [shape: f32[1,16], index: 4, kind: input, shape index: {}]   ;;  %s3187_s5 = inlined_call_operand.vmem [shape: bf16[6,32,16], index: 5, kind: output, shape index: {}]  }
   0x1 LB: > { %s1715_s19 = sadd.s32 4294967295, %s1851_s18   ;;  %p1719_p0 = scmp.ge.s32.totalorder %s1851_s18, 1  ;;  %s1851_s18 = sphi %s1892_s18, %s15_s18  }
   0x2   : > { %p187_p1 = scmp.lt.s32.totalorder %s1851_s18, 7 }
   0x4   : > { %p188_p2 = pnand %p1719_p0, %p187_p1 }
   0x6   : > { %191 = sbr.rel (%p188_p2) target bundleno = 523 (0x20b), region = 40 }
   0xb   : > { %p215_p3 = scmp.lt.s32.totalorder %s1715_s19, 5  ;;  %v244_v0 = vlaneseq  ;;  %vm525_vm0 = vsmask.f32 4352  ;;  %vm3215_vm11 = vcmask 1043456   ;;  %v3195_v30 = vmov 0   ;;  %s1854_s24 = smov 6  }
   0xc   : > { %vm606_vm14 = vcmask 1044480   ;;  %s1855_s25 = smov 4   ;;  %s1856_s26 = smov 2  }
   0xd   : > { %s3389_s19 = smov (!%p215_p3, %s1715_s19), 5  ;;  %v1902_v1 = vshrl.u32 %v244_v0, 7  ;;  %s1857_s27 = smov 8  }
   0xe   : > { %s1776_s20 = sshll.u32 %s3389_s19, 6  ;;  %s1858_s28 = smov 10  }
   0xf   : > { %v252_v2 = vadd.s32 56, %v1902_v1  ;;  %v253_v3 = vadd.s32 64, %v1902_v1  ;;  %v254_v4 = vadd.s32 72, %v1902_v1  ;;  %v255_v5 = vadd.s32 80, %v1902_v1  ;;  %s1912_s23 = scalar_lea.vmem %s3182_s0, %s1776_s20  ;;  %s1859_s29 = smov 12  }
  0x10   : > { %v1915_v6 = vadd.s32 8, %v1902_v1  ;;  %v1918_v7 = vadd.s32 16, %v1902_v1  ;;  %v1835_v12 = vld [vmem:[%s1912_s23 + $0x18] sm:$0xff]   ;;  %v1836_v13 = vld [vmem:[%s1912_s23 + $0x20] sm:$0xff]   ;;  %v1837_v14 = vld [vmem:[%s1912_s23 + $0x28] sm:$0xff]   ;;  %v265_v15 = vand.u32 7, %v1902_v1 }
  0x11   : > { %v314_v8 = vand.u32 7, %v252_v2  ;;  %v321_v9 = vand.u32 7, %v253_v3  ;;  %v328_v10 = vand.u32 7, %v254_v4  ;;  %v335_v11 = vand.u32 7, %v255_v5  ;;  %v1838_v48 = vld [vmem:[%s1912_s23] sm:$0xff]   ;;  %v1839_v49 = vld [vmem:[%s1912_s23 + $0x8] sm:$0xff]  }
  0x12   : > { %v553_v24 = vshrl.u32 %v1835_v12, 16  ;;  %v556_v25 = vshll.u32 %v1835_v12, 16  ;;  %v562_v26 = vshrl.u32 %v1836_v13, 16  ;;  %v565_v27 = vshll.u32 %v1836_v13, 16  ;;  %v1840_v54 = vld [vmem:[%s1912_s23 + $0x30] sm:$0xff]   ;;  %v1841_v58 = vld [vmem:[%s1912_s23 + $0x38] sm:$0xff]  }
  0x13   : > { %vm1924_vm1 = vcmp.ne.s32.totalorder %v314_v8, 0  ;;  %vm1928_vm2 = vcmp.ne.s32.totalorder %v321_v9, 0  ;;  %vm1932_vm3 = vcmp.ne.s32.totalorder %v328_v10, 0  ;;  %vm1936_vm4 = vcmp.ne.s32.totalorder %v335_v11, 0  ;;  %s1860_s7 = smov 14   ;;  %s1861_s8 = smov 16  }
  0x14   : > { %vm1940_vm5 = vcmp.ne.s32.totalorder %v314_v8, 7  ;;  %vm1944_vm6 = vcmp.ne.s32.totalorder %v321_v9, 7  ;;  %vm1948_vm7 = vcmp.ne.s32.totalorder %v328_v10, 7  ;;  %vm1952_vm8 = vcmp.ne.s32.totalorder %v335_v11, 7  ;;  %vm649_vm9 = vmpackc.low %vm1924_vm1, %vm1924_vm1  ;;  %s1777_s17 = sshll.u32 %s3389_s19, 4 }
  0x15   : > { %vm650_vm10 = vmpackc.low %vm1928_vm2, %vm1928_vm2  ;;  %v571_v28 = vshrl.u32 %v1837_v14, 16  ;;  %v574_v29 = vshll.u32 %v1837_v14, 16  ;;  %v1966_v31 = vsel %vm649_vm9, 65537, %v3195_v30  ;;  %v555_v33 = vrot.slane %v553_v24, 3  ;;  %s3136_s22 = scalar_lea.vmem %s3187_s5, %s1777_s17 }
  0x16   : > { %vm651_vm12 = vmpackc.low %vm1932_vm3, %vm1932_vm3  ;;  %3250 = vst [vmem:[#allocation2_spill] sm:$0xff] %v1966_v31  ;;  %v1969_v32 = vsel %vm650_vm10, 65537, %v3195_v30  ;;  %v558_v34 = vrot.slane %v556_v25, 4  ;;  %v564_v35 = vrot.slane %v562_v26, 3  ;;  %v567_v36 = vrot.slane %v565_v27, 4 }
  0x17   : > { %vm652_vm13 = vmpackc.low %vm1936_vm4, %vm1936_vm4  ;;  %v573_v37 = vrot.slane %v571_v28, 3  ;;  %v576_v38 = vrot.slane %v574_v29, 4  ;;  %v1975_v39 = vsel %vm651_vm12, 65537, %v3195_v30  ;;  %v1752_v43 = vcombine.low %v1966_v31, %v1969_v32 }
  0x18   : > { %v1978_v40 = vsel %vm652_vm13, 65537, %v3195_v30  ;;  %vm753_vm15 = vmpackc.low %vm1940_vm5, %vm1940_vm5  ;;  %v1983_v41 = vor.u32 %v558_v34, %v555_v33  ;;  %v568_v42 = vor.u32 %v567_v36, %v564_v35  ;;  %v272_v44 = vand.u32 7, %v1915_v6 }
  0x19   : > { %vm754_vm1 = vmpackc.low %vm1944_vm6, %vm1944_vm6  ;;  %v1991_v45 = vor.u32 %v576_v38, %v573_v37  ;;  %v1753_v46 = vcombine.low %v1975_v39, %v1978_v40  ;;  %v279_v47 = vand.u32 7, %v1918_v7  ;;  %v2002_v50 = vadd.s32 88, %v1902_v1 }
  0x1a   : > { %vm755_vm2 = vmpackc.low %vm1948_vm7, %vm1948_vm7  ;;  %v2006_v51 = vsel %vm525_vm0, %v1983_v41, %v568_v42  ;;  %v2017_v52 = vsel %vm753_vm15, 65537, %v3195_v30  ;;  %v2020_v53 = vsel %vm754_vm1, 65537, %v3195_v30  ;;  %vm849_vm4 = vcmp.ne.s16.totalorder %v1752_v43, 0  ;;  %v1842_v43 = vld [vmem:[%s1912_s23 + $0x10] sm:$0xff]  }
  0x1b   : > { %vm756_vm3 = vmpackc.low %vm1952_vm8, %vm1952_vm8  ;;  %v2025_v55 = vsel %vm525_vm0, %v568_v42, %v1991_v45  ;;  %vm850_vm6 = vcmp.ne.s16.totalorder %v1753_v46, 0  ;;  %v858_v56 = vsel %vm849_vm4, %v2006_v51, 0  ;;  %vm2030_vm8 = vcmp.ne.s32.totalorder %v265_v15, 0 }
  0x1c   : > { %v2041_v59 = vsel %vm755_vm2, 65537, %v3195_v30  ;;  %v859_v60 = vsel %vm850_vm6, %v2025_v55, 0  ;;  %v2044_v61 = vrot.slane %v858_v56, 4  ;;  %vm2046_vm5 = vcmp.ne.s32.totalorder %v272_v44, 0  ;;  %vm642_vm10 = vmpackc.low %vm2030_vm8, %vm2030_vm8 }
  0x1d   : > { %v2051_v63 = vsel %vm756_vm3, 65537, %v3195_v30  ;;  %v2053_v0 = vrot.slane %v859_v60, 4  ;;  %vm2055_vm9 = vcmp.ne.s32.totalorder %v279_v47, 0  ;;  %vm2059_vm7 = vcmp.ne.s32.totalorder %v279_v47, 7  ;;  %vm643_vm12 = vmpackc.low %vm2046_vm5, %vm2046_vm5 }
  0x1e   : > { %3253 = vst [vmem:[#allocation3_spill] sm:$0xff] %v2044_v61  ;;  %v527_v4 = vshrl.u32 %v1838_v48, 16  ;;  %v530_v5 = vshll.u32 %v1838_v48, 16  ;;  %v535_v6 = vshrl.u32 %v1839_v49, 16  ;;  %v538_v7 = vshll.u32 %v1839_v49, 16  ;;  %vm644_vm13 = vmpackc.low %vm2055_vm9, %vm2055_vm9 }
  0x1f   : > { %v1060_v8 = vsel %vm3215_vm11, %v2044_v61, %v2053_v0  ;;  %v580_v9 = vshrl.u32 %v1840_v54, 16  ;;  %v583_v10 = vshll.u32 %v1840_v54, 16  ;;  %v589_v11 = vshrl.u32 %v1841_v58, 16  ;;  %vm2078_vm15 = vmand %vm606_vm14, %vm525_vm0 }
  0x20   : > { %1075 = vrot.lane.b32.xlu1 %v1060_v8, %s1854_s24  ;;  %v529_v12 = vrot.slane %v527_v4, 3  ;;  %v532_v13 = vrot.slane %v530_v5, 4  ;;  %v537_v14 = vrot.slane %v535_v6, 3  ;;  %v540_v16 = vrot.slane %v538_v7, 4  ;;  %vm748_vm3 = vmpackc.low %vm2059_vm7, %vm2059_vm7 }
  0x21   : > { %v582_v17 = vrot.slane %v580_v9, 3  ;;  %v585_v18 = vrot.slane %v583_v10, 4  ;;  %v591_v19 = vrot.slane %v589_v11, 3  ;;  %v592_v20 = vshll.u32 %v1841_v58, 16 }
  0x22   : > { %v533_v22 = vor.u32 %v532_v13, %v529_v12  ;;  %v2082_v23 = vor.u32 %v540_v16, %v537_v14  ;;  %v2090_v24 = vsel %vm642_vm10, 65537, %v3195_v30  ;;  %v2098_v25 = vsel %vm643_vm12, 65537, %v3195_v30 }
  0x23   : > { %vm2102_vm1 = vcmp.ne.s32.totalorder %v265_v15, 7  ;;  %vm2106_vm2 = vcmp.ne.s32.totalorder %v272_v44, 7  ;;  %v594_v28 = vrot.slane %v592_v20, 4  ;;  %v2111_v29 = vsel %vm644_vm13, 65537, %v3195_v30 }
  0x24   : > { %v2115_v33 = vsel %vm525_vm0, %v533_v22, %v2082_v23  ;;  %v2119_v34 = vsel %vm2078_vm15, 0, %v533_v22  ;;  %v1748_v15 = vcombine.low %v2090_v24, %v2090_v24  ;;  %v1749_v35 = vcombine.low %v2098_v25, %v2111_v29  ;;  %vm746_vm8 = vmpackc.low %vm2102_vm1, %vm2102_vm1 }
  0x25   : > { %3266 = vst [vmem:[#allocation4_spill] sm:$0xff] %v2115_v33  ;;  %v2128_v36 = vor.u32 %v585_v18, %v582_v17  ;;  %v2130_v37 = vor.u32 %v594_v28, %v591_v19  ;;  %v257_v38 = vadd.s32 96, %v1902_v1  ;;  %v342_v42 = vand.u32 7, %v2002_v50 }
  0x26   : > { %vm845_vm4 = vcmp.ne.s16.totalorder %v1748_v15, 0  ;;  %vm846_vm6 = vcmp.ne.s16.totalorder %v1749_v35, 0  ;;  %v248_v44 = vadd.s32 24, %v1902_v1  ;;  %v2137_v46 = vadd.s32 32, %v1902_v1 }
  0x27   : > { %v2142_v47 = vsel %vm2078_vm15, %v2130_v37, 0  ;;  %v764_v48 = vsel %vm748_vm3, 65537, %v3195_v30  ;;  %v854_v49 = vsel %vm845_vm4, %v2119_v34, 0  ;;  %v855_v54 = vsel %vm846_vm6, %v2115_v33, 0 }
  0x28   : > { %v1050_v50 = vrot.slane %v854_v49, 4  ;;  %v2150_v56 = vrot.slane %v855_v54, 4  ;;  %v349_v57 = vand.u32 7, %v257_v38  ;;  %vm464_vm5 = vcmp.ne.s32.totalorder %v342_v42, 0 }
  0x29   : > { %vm802_vm9 = vcmask 1040384   ;;  %vm2152_vm7 = vcmp.ne.s32.totalorder %v342_v42, 7  ;;  %vm653_vm10 = vmpackc.low %vm464_vm5, %vm464_vm5  ;;  %v286_v60 = vand.u32 7, %v248_v44  ;;  %v293_v62 = vand.u32 7, %v2137_v46 }
  0x2a   : > { %v544_v2 = vshrl.u32 %v1842_v43, 16  ;;  %v1052_v3 = vsel %vm3215_vm11, %v1050_v50, %v2150_v56  ;;  %vm465_vm12 = vcmp.ne.s32.totalorder %v349_v57, 0  ;;  %v2162_v4 = vsel %vm525_vm0, %v1991_v45, %v2128_v36  ;;  %vm757_vm13 = vmpackc.low %vm2152_vm7, %vm2152_vm7 }
  0x2b   : > { %3269 = vst [vmem:[#allocation5_spill] sm:$0xff] %v2162_v4  ;;  %v2165_v5 = vsel %vm653_vm10, 65537, %v3195_v30  ;;  %1067 = vrot.lane.b32.xlu0 %v1052_v3, %s1854_s24  ;;  %vm2171_vm15 = vcmp.ne.s32.totalorder %v349_v57, 7  ;;  %vm654_vm3 = vmpackc.low %vm465_vm12, %vm465_vm12  ;;  %vm2175_vm4 = vcmp.ne.s32.totalorder %v286_v60, 0  ;;  %vm2179_vm6 = vcmp.ne.s32.totalorder %v293_v62, 0 }
  0x2c   : > { %vm2183_vm5 = vcmp.ne.s32.totalorder %v286_v60, 7  ;;  %vm747_vm7 = vmpackc.low %vm2106_vm2, %vm2106_vm2  ;;  %v2191_v9 = vsel %vm654_vm3, 65537, %v3195_v30  ;;  %v546_v10 = vrot.slane %v544_v2, 3  ;;  %v547_v11 = vshll.u32 %v1842_v43, 16 }
  0x2d   : > { %3278 = vst [vmem:[#allocation6_spill] sm:$0xff] %v2191_v9  ;;  %v2194_v12 = vadd.s32 48, %v1902_v1  ;;  %v1754_v13 = vcombine.low %v2165_v5, %v2191_v9  ;;  %vm645_vm10 = vmpackc.low %vm2175_vm4, %vm2175_vm4  ;;  %v773_v14 = vsel %vm757_vm13, 65537, %v3195_v30  ;;  %v2204_v16 = vcombine.low %v2020_v53, %v2041_v59 }
  0x2e   : > { %v762_v17 = vsel %vm746_vm8, 65537, %v3195_v30  ;;  %v549_v18 = vrot.slane %v547_v11, 4  ;;  %vm646_vm12 = vmpackc.low %vm2179_vm6, %vm2179_vm6  ;;  %v2216_v19 = vsel %vm645_vm10, 65537, %v3195_v30  ;;  %v2220_v53 = vcombine.low %v2051_v63, %v773_v14 }
  0x2f   : > { %3279 = vst [vmem:[#allocation7_spill] sm:$0xff] %v2194_v12  ;;  %v3189_v20 = vand.u32 7, %v2194_v12  ;;  %vm851_vm13 = vcmp.ne.s16.totalorder %v1754_v13, 0  ;;  %v2223_v59 = vsel %vm646_vm12, 65537, %v3195_v30  ;;  %vm749_vm1 = vmpackc.low %vm2183_vm5, %vm2183_vm5  ;;  %v810_v21 = vrot.slane %v2204_v16, 7 }
  0x30   : > { %3280 = vst [vmem:[#allocation8_spill] sm:$0xff] %v2223_v59  ;;  %v763_v22 = vsel %vm747_vm7, 65537, %v3195_v30  ;;  %v860_v63 = vsel %vm851_vm13, %v2162_v4, 0  ;;  %v2236_v26 = vor.u32 %v549_v18, %v546_v10  ;;  %v1750_v28 = vcombine.low %v2216_v19, %v2223_v59  ;;  %vm758_vm7 = vmpackc.low %vm2171_vm15, %vm2171_vm15 }
  0x31   : > { %vm475_vm8 = vcmp.ne.s32.totalorder %v3189_v20, 7  ;;  %vm3216_vm3 = vcmask 1046528   ;;  %v2242_v15 = vrot.slane %v860_v63, 4  ;;  %v812_v35 = vrot.slane %v2220_v53, 7 }
  0x32   : > { %vm752_vm4 = vmpackc.low %vm475_vm8, %vm475_vm8  ;;  %v765_v27 = vsel %vm749_vm1, 65537, %v3195_v30  ;;  %v2246_v38 = vcombine.low %v762_v17, %v763_v22  ;;  %v2251_v42 = vsel %vm525_vm0, %v2082_v23, %v2236_v26  ;;  %vm847_vm2 = vcmp.ne.s16.totalorder %v1750_v28, 0 }
  0x33   : > { %3281 = vst [vmem:[#allocation9_spill] sm:$0xff] %v2242_v15  ;;  %3282 = vst [vmem:[#allocation10_spill] sm:$0xff] %v2251_v42  ;;  %v768_v43 = vsel %vm752_vm4, 65537, %v3195_v30  ;;  %v2254_v44 = vcombine.low %v764_v48, %v765_v27  ;;  %v1062_v46 = vsel %vm3215_vm11, %v2053_v0, %v2242_v15  ;;  %v856_v49 = vsel %vm847_vm2, %v2251_v42, 0 }
  0x34   : > { %v2261_v54 = vcombine.low %v768_v43, %v2017_v52  ;;  %v2266_v50 = vsel %vm802_vm9, %v810_v21, %v812_v35  ;;  %1077 = vrot.lane.b32.xlu1 %v1062_v46, %s1854_s24  ;;  %v2269_v23 = vrot.slane %v856_v49, 4  ;;  %v803_v48 = vrot.slane %v2246_v38, 7 }
  0x35   : > { %vm823_vm6 = vcmp.ne.s16.totalorder %v2266_v50, 0  ;;  %v3198_v0 = vrot.slane %v2254_v44, 7  ;;  %vm2274_vm5 = vcmp.ne.s32.totalorder %v293_v62, 7  ;;  %v2285_v60 = vadd.s32 104, %v1902_v1 }
  0x36   : > { %3283 = vst [vmem:[#allocation11_spill] sm:$0xff] %v2269_v23  ;;  %v3192_v52 = vrot.slane %v2261_v54, 7  ;;  %v2282_v58 = vsel %vm823_vm6, %v2025_v55, 0  ;;  %v1054_v62 = vsel %vm3215_vm11, %v2150_v56, %v2269_v23  ;;  %vm2299_vm10 = vcmp.ne.s16.totalorder %v803_v48, 0  ;;  %vm750_vm1 = vmpackc.low %vm2274_vm5, %vm2274_vm5 }
  0x37   : > { %3286 = vst [vmem:[#allocation12_spill] sm:$0xff] %v2285_v60  ;;  %v3197_v2 = vrot.slane %v2282_v58, 1  ;;  %v2297_v3 = vsel %vm802_vm9, %v803_v48, %v3198_v0  ;;  %1069 = vrot.lane.b32.xlu0 %v1054_v62, %s1854_s24  ;;  %v827_v56 = vsel %vm2299_vm10, %v2119_v34, 0  ;;  %v3191_v8 = vand.u32 7, %v2285_v60 }
  0x38   : > { %v2307_v45 = vsel %vm802_vm9, %v3192_v52, %v810_v21  ;;  %vm819_vm12 = vcmp.ne.s16.totalorder %v2297_v3, 0  ;;  %vm3221_vm13 = vsmask.f32 7424  ;;  %v1007_v11 = vrot.slane %v827_v56, 1 }
  0x39   : > { %vm822_vm8 = vcmp.ne.s16.totalorder %v2307_v45, 0  ;;  %v2321_v10 = vsel %vm819_vm12, %v2115_v33, 0  ;;  %v2324_v13 = vadd.s32 40, %v1902_v1  ;;  %vm482_vm4 = vcmp.ne.s32.totalorder %v3191_v8, 7 }
  0x3a   : > { %v2329_v14 = vsel %vm822_vm8, %v2006_v51, 0  ;;  %v3194_v17 = vrot.slane %v2321_v10, 1  ;;  %v774_v18 = vsel %vm758_vm7, 65537, %v3195_v30  ;;  %vm759_vm2 = vmpackc.low %vm482_vm4, %vm482_vm4  ;;  %v921_v63 = vshll.u32 %v2115_v33, 16 }
  0x3b   : > { %3289 = vst [vmem:[#allocation13_spill] sm:$0xff] %v2324_v13  ;;  %3290 = vst [vmem:[#allocation14_spill] sm:$0xff] %v2329_v14  ;;  %v3188_v21 = vrot.slane %v2329_v14, 1  ;;  %v3190_v22 = vand.u32 7, %v2324_v13  ;;  %v925_v28 = vshrl.u32 %v2115_v33, 16  ;;  %v775_v43 = vsel %vm759_vm2, 65537, %v3195_v30 }
  0x3c   : > { %v1009_v27 = vsel %vm3216_vm3, %v1007_v11, %v3194_v17  ;;  %v766_v6 = vsel %vm750_vm1, 65537, %v3195_v30  ;;  %v3193_v46 = vshll.u32 %v2251_v42, 16  ;;  %v2361_v48 = vcombine.low %v774_v18, %v775_v43 }
  0x3d   : > { %v1017_v49 = vsel %vm3216_vm3, %v3188_v21, %v3197_v2  ;;  %1024 = vrot.lane.b32.xlu0 %v1009_v27, %s1855_s25  ;;  %vm474_vm15 = vcmp.ne.s32.totalorder %v3190_v22, 7  ;;  %v923_v62 = vrot.slane %v921_v63, 1  ;;  %v914_v56 = vshrl.u32 %v2119_v34, 16 }
  0x3e   : > { %1032 = vrot.lane.b32.xlu1 %v1017_v49, %s1855_s25  ;;  %vm751_vm5 = vmpackc.low %vm474_vm15, %vm474_vm15  ;;  %v2368_v57 = vrot.slane %v3193_v46, 1  ;;  %v916_v11 = vshll.u32 %v2119_v34, 16  ;;  %v953_v21 = vshll.u32 %v2025_v55, 16  ;;  %v3199_v18 = vrot.slane %v2361_v48, 7 }
  0x3f   : > { %v767_v27 = vsel %vm751_vm5, 65537, %v3195_v30  ;;  %v927_v43 = vor.u32 %v925_v28, %v923_v62  ;;  %v957_v20 = vshrl.u32 %v2025_v55, 16  ;;  %v961_v52 = vshll.u32 %v2162_v4, 16 }
  0x40   : > { %v2376_v22 = vcombine.low %v766_v6, %v767_v27  ;;  %v918_v49 = vrot.slane %v916_v11, 1  ;;  %v955_v8 = vrot.slane %v953_v21, 1  ;;  %v2384_v46 = vsel %vm802_vm9, %v812_v35, %v3199_v18 }
  0x41   : > { %v945_v17 = vshll.u32 %v2006_v51, 16  ;;  %vm824_vm7 = vcmp.ne.s16.totalorder %v2384_v46, 0  ;;  %v2396_v27 = vsel %vm3221_vm13, %v927_v43, %v2368_v57  ;;  %v949_v0 = vshrl.u32 %v2006_v51, 16 }
  0x42   : > { %v3206_v30 = vrot.slane %v2376_v22, 7  ;;  %v2392_v6 = vsel %vm824_vm7, %v2162_v4, 0  ;;  %v919_v2 = vor.u32 %v918_v49, %v914_v56  ;;  %v3292_v18 = vrot.slane %v2254_v44, 7 }
  0x43   : > { %3291 = vst [vmem:[#allocation15_spill] sm:$0xff] %v2392_v6  ;;  %v3211_v35 = vrot.slane %v2392_v6, 1  ;;  %v959_v31 = vor.u32 %v957_v20, %v955_v8  ;;  %v2407_v59 = vrot.slane %v961_v52, 1  ;;  %vm1083_vm1 = vsmask.f32 3328 }
  0x44   : > { %v2405_v61 = vsel %vm802_vm9, %v3292_v18, %v3206_v30  ;;  %v2410_v43 = vrot.slane %v945_v17, 1  ;;  %v1099_v49 = vrot.slane %v949_v0, 4  ;;  %v1100_v9 = vrot.slane %v945_v17, 5 }
  0x45   : > { %3293 = vst [vmem:[#allocation16_spill] sm:$0xff] %v2405_v61  ;;  %vm3214_vm4 = vcmp.ne.s16.totalorder %v2405_v61, 0  ;;  %v3294_v23 = vrot.slane %v2282_v58, 1  ;;  %v1103_v30 = vrot.slane %v957_v20, 4  ;;  %v1104_v14 = vrot.slane %v953_v21, 5 }
  0x46   : > { %v2420_v18 = vsel %vm3214_vm4, %v2251_v42, 0  ;;  %v924_v13 = vsel %vm3221_vm13, %v919_v2, %v923_v62  ;;  %v1084_v17 = vrot.slane %v914_v56, 4  ;;  %v1085_v60 = vrot.slane %v916_v11, 5 }
  0x47   : > { %v1019_v15 = vsel %vm3216_vm3, %v3294_v23, %v3211_v35  ;;  %v3217_v12 = vrot.slane %v2420_v18, 1  ;;  %v2427_v58 = vsel %vm3221_vm13, %v959_v31, %v2407_v59  ;;  %v1087_v23 = vrot.slane %v925_v28, 4 }
  0x48   : > { %1034 = vrot.lane.b32.xlu1 %v1019_v15, %s1855_s25  ;;  %v1088_v35 = vrot.slane %v921_v63, 5  ;;  %v965_v6 = vshrl.u32 %v2162_v4, 16  ;;  %v3295_v20 = vrot.slane %v2321_v10, 1  ;;  %v951_v21 = vor.u32 %v949_v0, %v2410_v43 }
  0x49   : > { %v1108_v61 = vrot.slane %v961_v52, 5  ;;  %v933_v2 = vshrl.u32 %v2251_v42, 16  ;;  %v2438_v62 = vor.u32 %v1100_v9, %v1099_v49  ;;  %v1105_v31 = vor.u32 %v1104_v14, %v1103_v30 }
  0x4a   : > { %v1011_v15 = vsel %vm3216_vm3, %v3295_v20, %v3217_v12  ;;  %v1107_v63 = vrot.slane %v965_v6, 4  ;;  %v3226_v28 = vrot.slane %v2261_v54, 3  ;;  %v1086_v10 = vor.u32 %v1085_v60, %v1084_v17 }
  0x4b   : > { %1026 = vrot.lane.b32.xlu0 %v1011_v15, %s1855_s25  ;;  %v870_v0 = vrot.slane %v2204_v16, 3  ;;  %v872_v52 = vrot.slane %v2220_v53, 3  ;;  %v863_v56 = vrot.slane %v2246_v38, 3  ;;  %v1089_v11 = vor.u32 %v1088_v35, %v1087_v23 }
  0x4c   : > { %983 = vrot.lane.b32.xlu1 %v2396_v27, %s1856_s26  ;;  %v1091_v30 = vrot.slane %v933_v2, 4  ;;  %v3296_v9 = vshll.u32 %v2251_v42, 16  ;;  %v864_v49 = vrot.slane %v2254_v44, 3  ;;  %v2453_v20 = vor.u32 %v1108_v61, %v1107_v63 }
  0x4d   : > { %v871_v60 = vsel %vm606_vm14, %v3226_v28, %v870_v0  ;;  %v873_v16 = vsel %vm606_vm14, %v870_v0, %v872_v52  ;;  %v3227_v53 = vrot.slane %v2361_v48, 3  ;;  %v2465_v61 = vsel %vm3221_vm13, %v951_v21, %v955_v8 }
  0x4e   : > { %v1092_v14 = vrot.slane %v3296_v9, 5  ;;  %vm882_vm2 = vcmp.ne.s16.totalorder %v871_v60, 0  ;;  %vm883_vm15 = vcmp.ne.s16.totalorder %v873_v16, 0  ;;  %v865_v38 = vsel %vm606_vm14, %v863_v56, %v864_v49 }
  0x4f   : > { %981 = vrot.lane.b32.xlu0 %v924_v13, %s1856_s26  ;;  %v1106_v44 = vsel %vm1083_vm1, %v2438_v62, %v1105_v31  ;;  %v2470_v35 = vsel %vm882_vm2, %v2006_v51, 0  ;;  %v892_v17 = vsel %vm883_vm15, %v2025_v55, 0  ;;  %v1090_v13 = vsel %vm1083_vm1, %v1086_v10, %v1089_v11 }
  0x50   : > { %991 = vrot.lane.b32.xlu1 %v2427_v58, %s1856_s26  ;;  %v2474_v23 = vor.u32 %v1092_v14, %v1091_v30  ;;  %vm2476_vm5 = vcmp.ne.s16.totalorder %v863_v56, 0  ;;  %vm879_vm4 = vcmp.ne.s16.totalorder %v865_v38, 0  ;;  %v1110_v8 = vsel %vm1083_vm1, %v1105_v31, %v2453_v20 }
  0x51   : > { %v3218_v21 = vrot.slane %v2470_v35, 5  ;;  %v875_v63 = vsel %vm606_vm14, %v872_v52, %v3227_v53  ;;  %v3225_v0 = vrot.slane %v2376_v22, 3  ;;  %v1156_v10 = vrot.slane %v892_v17, 5 }
  0x52   : > { %vm884_vm2 = vcmp.ne.s16.totalorder %v875_v63, 0  ;;  %v1736_v56 = vcombine.low %v1969_v32, %v1975_v39  ;;  %v1732_v30 = vcombine.low %v2090_v24, %v2098_v25  ;;  %v887_v31 = vsel %vm2476_vm5, %v2119_v34, 0 }
  0x53   : > { %989 = vrot.lane.b32.xlu0 %v2465_v61, %s1856_s26  ;;  %v888_v52 = vsel %vm879_vm4, %v2115_v33, 0  ;;  %v867_v9 = vsel %vm606_vm14, %v864_v49, %v3225_v0  ;;  %v1737_v14 = vcombine.low %v1978_v40, %v2165_v5  ;;  %v2504_v32 = vsel %vm884_vm2, %v2162_v4, 0  ;;  %v3323_v0 = vld [vmem:[#allocation14_spill] sm:$0xff] }
  0x54   : > { %1129 = vrot.lane.b32.xlu1 %v1106_v44, %s1857_s27  ;;  %vm880_vm15 = vcmp.ne.s16.totalorder %v867_v9, 0  ;;  %vm2506_vm11 = vcmp.ne.s16.totalorder %v1736_v56, 0  ;;  %vm2510_vm3 = vcmp.ne.s16.totalorder %v1732_v30, 0  ;;  %v2517_v25 = vsel %vm525_vm0, %v2128_v36, %v2130_v37  ;;  %v3384_v36 = vld [vmem:[#allocation4_spill] sm:$0xff] }
  0x55   : > { %vm1146_vm4 = vcmask 1042432   ;;  %v900_v40 = vsel %vm2506_vm11, %v2025_v55, 0  ;;  %v1094_v49 = vsel %vm1083_vm1, %v1089_v11, %v2474_v23  ;;  %v1147_v60 = vrot.slane %v887_v31, 5 }
  0x56   : > { %v2529_v16 = vsel %vm880_vm15, %v2251_v42, 0  ;;  %vm2531_vm5 = vcmp.ne.s16.totalorder %v1737_v14, 0  ;;  %v1148_v37 = vrot.slane %v888_v52, 5  ;;  %v3224_v38 = vrot.slane %v2504_v32, 5 }
  0x57   : > { %1121 = vrot.lane.b32.xlu0 %v1090_v13, %s1857_s27  ;;  %v1733_v11 = vcombine.low %v2111_v29, %v2216_v19  ;;  %v1157_v17 = vsel %vm1146_vm4, %v3218_v21, %v1156_v10  ;;  %v969_v13 = vshll.u32 %v2517_v25, 16  ;;  %v2549_v15 = vsel %vm525_vm0, %v2236_v26, %v1983_v41 }
  0x58   : > { %1131 = vrot.lane.b32.xlu1 %v1110_v8, %s1857_s27  ;;  %v3222_v8 = vrot.slane %v2529_v16, 5  ;;  %v967_v29 = vor.u32 %v965_v6, %v2407_v59  ;;  %v937_v19 = vshll.u32 %v2549_v15, 16  ;;  %v2569_v26 = vsel %vm822_vm8, %v2025_v55, 0 }
  0x59   : > { %vm2552_vm2 = vcmp.ne.s16.totalorder %v1733_v11, 0  ;;  %v971_v41 = vrot.slane %v969_v13, 1  ;;  %v2574_v59 = vsel %vm823_vm6, %v2162_v4, 0  ;;  %v1149_v6 = vsel %vm1146_vm4, %v1147_v60, %v1148_v37 }
  0x5a   : > { %v1159_v30 = vsel %vm1146_vm4, %v1156_v10, %v3224_v38  ;;  %v896_v45 = vsel %vm2510_vm3, %v2115_v33, 0  ;;  %v904_v31 = vsel %vm2299_vm10, %v2115_v33, 0  ;;  %v901_v50 = vsel %vm2531_vm5, %v2162_v4, 0 }
  0x5b   : > { %1123 = vrot.lane.b32.xlu0 %v1094_v49, %s1857_s27  ;;  %v935_v52 = vor.u32 %v933_v2, %v2368_v57  ;;  %v2595_v9 = vrot.slane %v937_v19, 1  ;;  %v2600_v10 = vsel %vm819_vm12, %v2251_v42, 0  ;;  %v1151_v7 = vsel %vm1146_vm4, %v1148_v37, %v3222_v8 }
  0x5c   : > { %1172 = vrot.lane.b32.xlu1 %v1157_v17, %s1858_s28  ;;  %v897_v14 = vsel %vm2552_vm2, %v2251_v42, 0  ;;  %v3219_v49 = vrot.slane %v2569_v26, 1  ;;  %v3220_v57 = vrot.slane %v2574_v59, 1  ;;  %v2612_v2 = vsel %vm3221_vm13, %v967_v29, %v971_v41 }
  0x5d   : > { %v2614_v3 = vrot.slane %v904_v31, 1  ;;  %v973_v60 = vshrl.u32 %v2517_v25, 16  ;;  %v977_v11 = vshll.u32 %v2142_v47, 16  ;;  %v2623_v17 = vsel %vm824_vm7, %v2517_v25, 0 }
  0x5e   : > { %v260_v29 = vadd.s32 120, %v1902_v1  ;;  %v2629_v31 = vsel %vm3221_vm13, %v935_v52, %v2595_v9  ;;  %v3308_v5 = vrot.slane %v2376_v22, 7  ;;  %vm3309_vm0 = vcmask 1046528  }
  0x5f   : > { %1164 = vrot.lane.b32.xlu0 %v1149_v6, %s1858_s28  ;;  %v259_v6 = vadd.s32 112, %v1902_v1  ;;  %v975_v56 = vor.u32 %v973_v60, %v971_v41  ;;  %v2631_v44 = vrot.slane %v977_v11, 1  ;;  %v2645_v1 = vsel %vm3309_vm0, %v3219_v49, %v3220_v57  ;;  %v2725_v41 = vld [vmem:[%s3183_s1 + $0x8] ss:$0 sps:$4 sm:$0x11]  }
  0x60   : > { %1174 = vrot.lane.b32.xlu1 %v1159_v30, %s1858_s28  ;;  %v3307_v30 = vrot.slane %v2261_v54, 7  ;;  %v370_v52 = vand.u32 7, %v260_v29  ;;  %v3314_v29 = vmov 0   ;;  %v3324_v28 = vrot.slane %v3323_v0, 1  ;;  %1816 = vmatprep.subr.msk.bf16.mxu0 %vm802_vm9, %v2725_v41 }
  0x61   : > { %v363_v46 = vand.u32 7, %v259_v6  ;;  %v2652_v21 = vsel %vm3221_vm13, %v975_v56, %v2631_v44  ;;  %v3229_v6 = vshrl.u32 %v2549_v15, 16  ;;  %v1112_v0 = vrot.slane %v969_v13, 5  ;;  %1817 = vmatprep.subr.msk.bf16.mxu1 %vm802_vm9, %v2725_v41 }
  0x62   : > { %v2638_v12 = vsel %vm802_vm9, %v3308_v5, %v3307_v30  ;;  %v3310_v30 = vld [vmem:[#allocation12_spill] sm:$0xff]  ;;  %vm484_vm8 = vcmp.ne.s32.totalorder %v370_v52, 7  ;;  %v3230_v56 = vshrl.u32 %v2142_v47, 16  ;;  %v3383_v24 = vsel %vm2531_vm5, %v2025_v55, 0 }
  0x63   : > { %vm3223_vm6 = vcmp.ne.s16.totalorder %v2638_v12, 0  ;;  %1166 = vrot.lane.b32.xlu0 %v1151_v7, %s1858_s28  ;;  %v3311_v49 = vand.u32 7, %v3310_v30  ;;  %vm483_vm12 = vcmp.ne.s32.totalorder %v363_v46, 7  ;;  %vm2664_vm0 = vcmp.ne.s32.totalorder %v363_v46, 0  ;;  %v3315_v30 = vld [vmem:[#allocation13_spill] sm:$0xff] }
  0x64   : > { %v2657_v5 = vsel %vm3223_vm6, %v2549_v15, 0  ;;  %1196 = vrot.lane.b32.xlu1 %v900_v40, %s1859_s29  ;;  %vm760_vm15 = vmpackc.low %vm483_vm12, %vm483_vm12  ;;  %v3319_v40 = vld [vmem:[#allocation7_spill] sm:$0xff]  ;;  %vm3325_vm12 = vcmask 1046528   ;;  %v1117_v38 = vrot.slane %v3230_v56, 4  ;;  %v3329_v56 = vld [vmem:[#allocation9_spill] sm:$0xff]  ;;  %v3385_v55 = vsel %vm2552_vm2, %v3384_v36, 0 }
  0x65   : > { %vm466_vm10 = vcmp.ne.s32.totalorder %v3311_v49, 0  ;;  %v3228_v7 = vrot.slane %v2657_v5, 1  ;;  %v3316_v49 = vand.u32 7, %v3315_v30  ;;  %v3320_v8 = vand.u32 7, %v3319_v40 }
  0x66   : > { %vm655_vm7 = vmpackc.low %vm466_vm10, %vm466_vm10  ;;  %v776_v46 = vsel %vm760_vm15, 65537, %v3314_v29  ;;  %v1118_v40 = vrot.slane %v977_v11, 5  ;;  %vm1655_vm5 = vcmask 125952  }
  0x67   : > { %v2669_v57 = vsel %vm655_vm7, 65537, %v3314_v29  ;;  %vm2673_vm13 = vcmp.ne.s32.totalorder %v3316_v49, 0  ;;  %vm2679_vm6 = vcmp.ne.s32.totalorder %v3320_v8, 0  ;;  %vm761_vm10 = vmpackc.low %vm484_vm8, %vm484_vm8  ;;  %v2689_v53 = vsel %vm3325_vm12, %v3228_v7, %v3324_v28  ;;  %1188 = vrot.lane.b32.xlu0 %v896_v45, %s1859_s29 }
  0x68   : > { %vm2691_vm7 = vcmp.ne.s32.totalorder %v370_v52, 0  ;;  %v1111_v49 = vrot.slane %v973_v60, 4  ;;  %v777_v8 = vsel %vm761_vm10, 65537, %v3314_v29  ;;  %vm656_vm8 = vmpackc.low %vm2664_vm0, %vm2664_vm0  ;;  %v1095_v28 = vrot.slane %v3229_v6, 4  ;;  %1198 = vrot.lane.b32.xlu1 %v901_v50, %s1859_s29  ;;  %v3333_v6 = vld [vmem:[#allocation16_spill] sm:$0xff] }
  0x69   : > { %v1096_v52 = vrot.slane %v937_v19, 5  ;;  %v1747_v60 = vcombine.low %v776_v46, %v777_v8  ;;  %v2708_v45 = vsel %vm656_vm8, 65537, %v3314_v29  ;;  %vm647_vm15 = vmpackc.low %vm2673_vm13, %vm2673_vm13  ;;  %v1119_v42 = vor.u32 %v1118_v40, %v1117_v38 }
  0x6a   : > { %v1755_v13 = vcombine.low %v2669_v57, %v2708_v45  ;;  %vm648_vm0 = vmpackc.low %vm2679_vm6, %vm2679_vm6  ;;  %v2720_v19 = vsel %vm647_vm15, 65537, %v3314_v29  ;;  %v1113_v50 = vor.u32 %v1112_v0, %v1111_v49  ;;  %vm3330_vm15 = vcmask 1043456  }
  0x6b   : > { %v1097_v46 = vor.u32 %v1096_v52, %v1095_v28  ;;  %v816_v8 = vrot.slane %v1747_v60, 7  ;;  %v2728_v11 = vsel %vm648_vm0, 65537, %v3314_v29  ;;  %vm657_vm13 = vmpackc.low %vm2691_vm7, %vm2691_vm7  ;;  %v876_v7 = vrot.slane %v1747_v60, 3  ;;  %1190 = vrot.lane.b32.xlu0 %v897_v14, %s1859_s29 }
  0x6c   : > { %vm852_vm6 = vcmp.ne.s16.totalorder %v1755_v13, 0  ;;  %v1751_v49 = vcombine.low %v2720_v19, %v2728_v11  ;;  %v673_v0 = vsel %vm657_vm13, 65537, %v3314_v29  ;;  %v2745_v30 = vsel %vm1083_vm1, %v2453_v20, %v1113_v50  ;;  %1218 = vrot.lane.b32.xlu1 %v2427_v58, %s1860_s7 }
  0x6d   : > { %v3328_v28 = vrot.slane %v2361_v48, 7  ;;  %vm826_vm10 = vcmp.ne.s16.totalorder %v816_v8, 0  ;;  %v861_v52 = vsel %vm852_vm6, %v2517_v25, 0  ;;  %v1756_v60 = vcombine.low %v673_v0, %v673_v0 }
  0x6e   : > { %v835_v20 = vsel %vm826_vm10, %v2142_v47, 0  ;;  %v1063_v13 = vrot.slane %v861_v52, 4  ;;  %vm848_vm7 = vcmp.ne.s16.totalorder %v1751_v49, 0  ;;  %vm3332_vm0 = vcmask 1046528   ;;  %vm3338_vm10 = vmmov %vm3330_vm15 }
  0x6f   : > { %v2754_v14 = vsel %vm802_vm9, %v3328_v28, %v816_v8  ;;  %v1022_v28 = vrot.slane %v835_v20, 1  ;;  %v857_v8 = vsel %vm848_vm7, %v2549_v15, 0  ;;  %vm853_vm8 = vcmp.ne.s16.totalorder %v1756_v60, 0  ;;  %1210 = vrot.lane.b32.xlu0 %v2396_v27, %s1860_s7  ;;  %vm3336_vm6 = vmmov %vm3332_vm0 }
  0x70   : > { %vm825_vm12 = vcmp.ne.s16.totalorder %v2754_v14, 0  ;;  %v2772_v37 = vsel %vm3330_vm15, %v3329_v56, %v1063_v13  ;;  %v2774_v52 = vrot.slane %v857_v8, 4  ;;  %v862_v49 = vsel %vm853_vm8, %v2142_v47, 0  ;;  %1220 = vrot.lane.b32.xlu1 %v2612_v2, %s1860_s7  ;;  %vm3339_vm7 = vmmov %vm3338_vm10 }
  0x71   : > { %v2764_v58 = vsel %vm825_vm12, %v2517_v25, 0  ;;  %v1065_v20 = vrot.slane %v862_v49, 4  ;;  %v2781_v60 = vsel %vm1083_vm1, %v2474_v23, %v1097_v46  ;;  %v2785_v27 = vsel %vm1083_vm1, %v1097_v46, %v2438_v62  ;;  %v3337_v23 = vld [vmem:[#allocation11_spill] sm:$0xff] }
  0x72   : > { %v3331_v56 = vrot.slane %v2600_v10, 1  ;;  %vm3334_vm13 = vcmp.ne.s16.totalorder %v3333_v6, 0  ;;  %v3335_v49 = vrot.slane %v2764_v58, 1  ;;  %v2802_v40 = vsel %vm3338_vm10, %v3337_v23, %v2774_v52 }
  0x73   : > { %v906_v4 = vsel %vm3334_vm13, %v2549_v15, 0  ;;  %v2805_v62 = vsel %vm3339_vm7, %v1063_v13, %v1065_v20  ;;  %v2808_v46 = vsel %vm1083_vm1, %v1113_v50, %v1119_v42  ;;  %v3341_v38 = vrot.slane %v2261_v54, 3  ;;  %1212 = vrot.lane.b32.xlu0 %v2629_v31, %s1860_s7  ;;  %v3343_v13 = vld [vmem:[#allocation6_spill] sm:$0xff]  ;;  %v3344_v50 = vld [vmem:[#allocation8_spill] sm:$0xff] }
  0x74   : > { %v1237_v8 = vsel %vm3332_vm0, %v2614_v3, %v3331_v56  ;;  %v2797_v33 = vsel %vm3336_vm6, %v3335_v49, %v1022_v28  ;;  %v3340_v3 = vrot.slane %v2361_v48, 3  ;;  %v3342_v28 = vrot.slane %v2376_v22, 3  ;;  %1260 = vrot.lane.b32.xlu1 %v2645_v1, %s1861_s8 }
  0x75   : > { %vm886_vm0 = vcmp.ne.s16.totalorder %v876_v7, 0  ;;  %v1738_v42 = vcombine.low %v3343_v13, %v2669_v57  ;;  %v1734_v20 = vcombine.low %v3344_v50, %v2720_v19  ;;  %v3349_v19 = vrot.slane %v2504_v32, 5 }
  0x76   : > { %v877_v6 = vsel %vm606_vm14, %v3340_v3, %v876_v7  ;;  %v869_v56 = vsel %vm606_vm14, %v3342_v28, %v3341_v38  ;;  %v895_v22 = vsel %vm886_vm0, %v2142_v47, 0  ;;  %v3350_v28 = vrot.slane %v2529_v16, 5  ;;  %v3354_v16 = vld [vmem:[#allocation2_spill] sm:$0xff] }
  0x77   : > { %vm885_vm8 = vcmp.ne.s16.totalorder %v877_v6, 0  ;;  %vm881_vm15 = vcmp.ne.s16.totalorder %v869_v56, 0  ;;  %v1162_v3 = vrot.slane %v895_v22, 5  ;;  %vm2829_vm14 = vcmp.ne.s16.totalorder %v1738_v42, 0  ;;  %1252 = vrot.lane.b32.xlu0 %v1237_v8, %s1861_s8 }
  0x78   : > { %v894_v48 = vsel %vm885_vm8, %v2517_v25, 0  ;;  %v890_v54 = vsel %vm881_vm15, %v2549_v15, 0  ;;  %v902_v57 = vsel %vm2829_vm14, %v2517_v25, 0  ;;  %vm2836_vm1 = vcmp.ne.s16.totalorder %v1734_v20, 0  ;;  %993 = vrot.lane.b32.xlu1 %v2612_v2, %s1856_s26 }
  0x79   : > { %v1160_v49 = vrot.slane %v894_v48, 5  ;;  %v1152_v23 = vrot.slane %v890_v54, 5  ;;  %v1739_v6 = vcombine.low %v2708_v45, %v673_v0  ;;  %v3351_v42 = vrot.slane %v2470_v35, 5 }
  0x7a   : > { %v1238_v45 = vrot.slane %v906_v4, 1  ;;  %v898_v32 = vsel %vm2836_vm1, %v2549_v15, 0  ;;  %v1735_v8 = vcombine.low %v2728_v11, %v3354_v16  ;;  %v3355_v54 = vrot.slane %v2623_v17, 1 }
  0x7b   : > { %v1161_v38 = vsel %vm1146_vm4, %v3349_v19, %v1160_v49  ;;  %v1153_v56 = vsel %vm1146_vm4, %v3350_v28, %v1152_v23  ;;  %v1163_v13 = vsel %vm1146_vm4, %v1160_v49, %v1162_v3  ;;  %v1155_v48 = vsel %vm1146_vm4, %v1152_v23, %v3351_v42  ;;  %vm3357_vm4 = vmmov %vm3336_vm6  ;;  %985 = vrot.lane.b32.xlu0 %v2629_v31, %s1856_s26  ;;  %v1844_v42 = vld [vmem:[%s3183_s1] sm:$0xff]  }
  0x7c   : > { %vm2857_vm13 = vcmp.ne.s16.totalorder %v1739_v6, 0  ;;  %v3356_v35 = vrot.slane %v2574_v59, 1  ;;  %v3358_v2 = vshrl.u32 %v2142_v47, 16  ;;  %v2875_v20 = vrot.slane %v3314_v29, 1  ;;  %vm3367_vm8 = vmmov %vm3357_vm4 }
  0x7d   : > { %v713_v4 = vsel %vm2857_vm13, %v2517_v25, 0  ;;  %vm2877_vm6 = vcmp.ne.s16.totalorder %v1735_v8, 0  ;;  %v911_v59 = vsel %vm825_vm12, %v2142_v47, 0  ;;  %vm3361_vm10 = vcmp.ne.s16.totalorder %v2638_v12, 0  ;;  %vm3364_vm12 = vmmov %vm3357_vm4 }
  0x7e   : > { %v1247_v22 = vsel %vm3357_vm4, %v3356_v35, %v3355_v54  ;;  %v1204_v50 = vor.u32 %v3358_v2, %v2631_v44  ;;  %v907_v11 = vsel %vm3361_vm10, %v2006_v51, 0  ;;  %v709_v44 = vsel %vm2877_vm6, %v2549_v15, 0  ;;  %vm3368_vm15 = vmmov %vm3357_vm4  ;;  %v3373_v35 = vld [vmem:[#allocation15_spill] sm:$0xff] }
  0x7f   : > { %vm3362_vm7 = vsmask.f32 7424  ;;  %v1248_v23 = vrot.slane %v911_v59, 1  ;;  %1262 = vrot.lane.b32.xlu1 %v1247_v22, %s1861_s8  ;;  %v3363_v14 = vrot.slane %v2600_v10, 1  ;;  %v3365_v12 = vshrl.u32 %v2549_v15, 16  ;;  %vm3370_vm0 = vmmov %vm3357_vm4 }
  0x80   : > { %v1209_v29 = vsel %vm3362_vm7, %v1204_v50, %v2875_v20  ;;  %v1240_v19 = vrot.slane %v907_v11, 1  ;;  %v3366_v31 = vmov %v3355_v54  ;;  %v3369_v8 = vrot.slane %v2569_v26, 1  ;;  %vm3371_vm4 = vmmov %vm3362_vm7 }
  0x81   : > { %v1239_v3 = vsel %vm3364_vm12, %v3363_v14, %v1238_v45  ;;  %v943_v6 = vor.u32 %v3365_v12, %v2595_v9  ;;  %v1249_v28 = vsel %vm3367_vm8, %v3366_v31, %v1248_v23  ;;  %v1450_v9 = vsel %vm802_vm9, %v2725_v41, 0  ;;  %vm3375_vm10 = vmmov %vm3370_vm0 }
  0x82   : > { %v1241_v16 = vsel %vm3368_vm15, %v1238_v45, %v1240_v19  ;;  %v1243_v10 = vsel %vm3370_vm0, %v1240_v19, %v3369_v8  ;;  %1254 = vrot.lane.b32.xlu0 %v1239_v3, %s1861_s8  ;;  %1793 = vmatpush3.bf16.msra.mxu0 %v1450_v9  ;;  %v3372_v54 = vrot.slane %v2764_v58, 1  ;;  %v3374_v45 = vrot.slane %v3373_v35, 1  ;;  %vm3378_vm9 = vmmov %vm3370_vm0 }
  0x83   : > { %995 = vrot.lane.b32.xlu1 %v2652_v21, %s1856_s26  ;;  %v948_v17 = vsel %vm3371_vm4, %v943_v6, %v2410_v43  ;;  %1814 = vmatpush3.bf16.msra.mxu1 %v1450_v9  ;;  %v3376_v41 = vrot.slane %v2657_v5, 1  ;;  %v3377_v22 = vrot.slane %v2420_v18, 1  ;;  %v3379_v18 = vld [vmem:[#allocation3_spill] sm:$0xff]  ;;  %vm3380_vm7 = vcmask 1043456   ;;  %vm3381_vm12 = vmmov %vm3370_vm0 }
  0x84   : > { %v1021_v26 = vsel %vm3375_vm10, %v3374_v45, %v3372_v54  ;;  %1794 = vmatprep.subr.bf16.mxu0 %v1844_v42  ;;  %1813 = vmatprep.subr.bf16.mxu1 %v1844_v42  ;;  %v1058_v5 = vsel %vm3380_vm7, %v2774_v52, %v3379_v18  ;;  %v710_v11 = vsel %vm2506_vm11, %v2006_v51, 0  ;;  %vm1268_vm8 = vcmask 15360   ;;  %v3386_v18 = vld [vmem:[#allocation5_spill] sm:$0xff] }
  0x85   : > { %v1013_v43 = vsel %vm3378_vm9, %v3377_v22, %v3376_v41  ;;  %vm1293_vm15 = vcmask 31744   ;;  %v3382_v19 = vsel %vm2510_vm3, %v2119_v34, 0  ;;  %vm1310_vm0 = vcmask 48128  }
  0x86   : > { %987 = vrot.lane.b32.xlu0 %v948_v17, %s1856_s26  ;;  %1795 = vmatpush3.bf16.msra.mxu0 %v1844_v42  ;;  %vm1327_vm4 = vcmask 64512   ;;  %vm1344_vm11 = vcmask 80896   ;;  %vm1361_vm10 = vcmask 97280   ;;  %vm1378_vm9 = vcmask 113664  }
  0x87   : > { %1036 = vrot.lane.b32.xlu1 %v1021_v26, %s1855_s25  ;;  %1815 = vmatpush3.bf16.msra.mxu1 %v1844_v42  ;;  %vm1395_vm3 = vcmask 130048   ;;  %vm1431_vm7 = vcmask 146432  }
  0x8a   : > { %1028 = vrot.lane.b32.xlu0 %v1013_v43, %s1855_s25 }
  0x8b   : > { %1038 = vrot.lane.b32.xlu1 %v2797_v33, %s1855_s25  ;;  %v903_v33 = vsel %vm2857_vm13, %v2142_v47, 0 }
  0x8e   : > { %1030 = vrot.lane.b32.xlu0 %v2689_v53, %s1855_s25  ;;  %v899_v53 = vsel %vm2877_vm6, %v2006_v51, 0 }
  0x8f   : > { %1079 = vrot.lane.b32.xlu1 %v2772_v37, %s1854_s24 }
  0x92   : > { %1071 = vrot.lane.b32.xlu0 %v2802_v40, %s1854_s24  ;;  %v1076_v37 = vpop.permute.xlu1 %1075 }
  0x93   : > { %1081 = vrot.lane.b32.xlu1 %v2805_v62, %s1854_s24 }
  0x96   : > { %1073 = vrot.lane.b32.xlu0 %v1058_v5, %s1854_s24  ;;  %v712_v5 = vsel %vm2829_vm14, %v3386_v18, 0 }
  0x97   : > { %1133 = vrot.lane.b32.xlu1 %v2745_v30, %s1857_s27 }
  0x9a   : > { %1125 = vrot.lane.b32.xlu0 %v2781_v60, %s1857_s27  ;;  %v1251_v60 = vsel %vm3381_vm12, %v1248_v23, %v2875_v20 }
  0x9b   : > { %1135 = vrot.lane.b32.xlu1 %v2808_v46, %s1857_s27 }
  0x9d   : > { %v1068_v30 = vpop.permute.xlu0 %1067 }
  0x9e   : > { %1127 = vrot.lane.b32.xlu0 %v2785_v27, %s1857_s27 }
  0x9f   : > { %1176 = vrot.lane.b32.xlu1 %v1161_v38, %s1858_s28 }
  0xa2   : > { %1168 = vrot.lane.b32.xlu0 %v1153_v56, %s1858_s28 }
  0xa3   : > { %1178 = vrot.lane.b32.xlu1 %v1163_v13, %s1858_s28 }
  0xa6   : > { %1170 = vrot.lane.b32.xlu0 %v1155_v48, %s1858_s28  ;;  %v2969_v58 = vpop.permute.xlu1 %1077 }
  0xa7   : > { %1200 = vrot.lane.b32.xlu1 %v902_v57, %s1859_s29 }
  0xa9   : > { %v2973_v47 = vpop.permute.xlu0 %1069 }
  0xaa   : > { %1192 = vrot.lane.b32.xlu0 %v898_v32, %s1859_s29 }
  0xab   : > { %1202 = vrot.lane.b32.xlu1 %v903_v33, %s1859_s29 }
  0xae   : > { %1194 = vrot.lane.b32.xlu0 %v899_v53, %s1859_s29 }
  0xaf   : > { %1222 = vrot.lane.b32.xlu1 %v2652_v21, %s1860_s7  ;;  %v1025_v21 = vpop.permute.xlu0 %1024 }
  0xb0   : > { %v1033_v52 = vpop.permute.xlu1 %1032 }
  0xb2   : > { %1214 = vrot.lane.b32.xlu0 %v948_v17, %s1860_s7 }
  0xb3   : > { %1224 = vrot.lane.b32.xlu1 %v1209_v29, %s1860_s7 }
  0xb6   : > { %1216 = vrot.lane.b32.xlu0 %v2465_v61, %s1860_s7 }
  0xb7   : > { %1264 = vrot.lane.b32.xlu1 %v1249_v28, %s1861_s8 }
  0xba   : > { %1256 = vrot.lane.b32.xlu0 %v1241_v16, %s1861_s8  ;;  %v1035_v27 = vpop.permute.xlu1 %1034 }
  0xbb   : > { %1266 = vrot.lane.b32.xlu1 %v1251_v60, %s1861_s8 }
  0xbd   : > { %v1027_v40 = vpop.permute.xlu0 %1026 }
  0xbe   : > { %1258 = vrot.lane.b32.xlu0 %v1243_v10, %s1861_s8  ;;  %v984_v62 = vpop.permute.xlu1 %983 }
  0xbf   : > { %v1274_v26 = vsel %vm1268_vm8, %v3385_v55, %v984_v62 }
  0xc1   : > { %v982_v46 = vpop.permute.xlu0 %981 }
  0xc2   : > { %v992_v57 = vpop.permute.xlu1 %991  ;;  %v1271_v31 = vsel %vm1268_vm8, %v3382_v19, %v982_v46 }
  0xc3   : > { %v1295_v28 = vsel %vm1293_vm15, %v1271_v31, %v1025_v21  ;;  %v1286_v34 = vsel %vm1268_vm8, %v3383_v24, %v992_v57  ;;  %v3387_v21 = vld [vmem:[#allocation10_spill] sm:$0xff] }
  0xc4   : > { %v1312_v10 = vsel %vm1310_vm0, %v1295_v28, %v1068_v30  ;;  %v1305_v41 = vsel %vm1293_vm15, %v1286_v34, %v1035_v27  ;;  %v708_v7 = vsel %vm2836_vm1, %v3387_v21, 0 }
  0xc5   : > { %v990_v38 = vpop.permute.xlu0 %989  ;;  %v1322_v30 = vsel %vm1310_vm0, %v1305_v41, %v2969_v58 }
  0xc6   : > { %v1130_v61 = vpop.permute.xlu1 %1129  ;;  %v1283_v23 = vsel %vm1268_vm8, %v710_v11, %v990_v38 }
  0xc7   : > { %v1303_v3 = vsel %vm1293_vm15, %v1283_v23, %v1033_v52 }
  0xc8   : > { %v1320_v51 = vsel %vm1310_vm0, %v1303_v3, %v1076_v37  ;;  %v1297_v37 = vsel %vm1293_vm15, %v1274_v26, %v1027_v40 }
  0xc9   : > { %v1122_v56 = vpop.permute.xlu0 %1121  ;;  %v1337_v16 = vsel %vm1327_vm4, %v1320_v51, %v1130_v61  ;;  %v1314_v40 = vsel %vm1310_vm0, %v1297_v37, %v2973_v47 }
  0xca   : > { %v1132_v13 = vpop.permute.xlu1 %1131  ;;  %v1329_v54 = vsel %vm1327_vm4, %v1312_v10, %v1122_v56 }
  0xcb   : > { %v1339_v27 = vsel %vm1327_vm4, %v1322_v30, %v1132_v13 }
  0xcd   : > { %v1124_v48 = vpop.permute.xlu0 %1123 }
  0xce   : > { %v1173_v32 = vpop.permute.xlu1 %1172  ;;  %v1331_v38 = vsel %vm1327_vm4, %v1314_v40, %v1124_v48 }
  0xcf   : > { %v1354_v8 = vsel %vm1344_vm11, %v1337_v16, %v1173_v32 }
  0xd1   : > { %v1165_v2 = vpop.permute.xlu0 %1164 }
  0xd2   : > { %v1175_v50 = vpop.permute.xlu1 %1174  ;;  %v1346_v22 = vsel %vm1344_vm11, %v1329_v54, %v1165_v2 }
  0xd3   : > { %v1356_v46 = vsel %vm1344_vm11, %v1339_v27, %v1175_v50 }
  0xd5   : > { %v1167_v20 = vpop.permute.xlu0 %1166 }
  0xd6   : > { %v1197_v59 = vpop.permute.xlu1 %1196  ;;  %v1348_v13 = vsel %vm1344_vm11, %v1331_v38, %v1167_v20 }
  0xd7   : > { %v1371_v9 = vsel %vm1361_vm10, %v1354_v8, %v1197_v59 }
  0xd9   : > { %v1189_v29 = vpop.permute.xlu0 %1188 }
  0xda   : > { %v1199_v14 = vpop.permute.xlu1 %1198  ;;  %v1363_v33 = vsel %vm1361_vm10, %v1346_v22, %v1189_v29 }
  0xdb   : > { %v1373_v58 = vsel %vm1361_vm10, %v1356_v46, %v1199_v14 }
  0xdd   : > { %v1191_v12 = vpop.permute.xlu0 %1190 }
  0xde   : > { %v1219_v6 = vpop.permute.xlu1 %1218  ;;  %v1365_v2 = vsel %vm1361_vm10, %v1348_v13, %v1191_v12 }
  0xdf   : > { %v1388_v35 = vsel %vm1378_vm9, %v1371_v9, %v1219_v6 }
  0xe1   : > { %v1211_v39 = vpop.permute.xlu0 %1210 }
  0xe2   : > { %v1221_v42 = vpop.permute.xlu1 %1220  ;;  %v1380_v63 = vsel %vm1378_vm9, %v1363_v33, %v1211_v39 }
  0xe3   : > { %v1390_v61 = vsel %vm1378_vm9, %v1373_v58, %v1221_v42 }
  0xe5   : > { %v1213_v17 = vpop.permute.xlu0 %1212 }
  0xe6   : > { %v1261_v45 = vpop.permute.xlu1 %1260  ;;  %v1382_v47 = vsel %vm1378_vm9, %v1365_v2, %v1213_v17  ;;  %v3089_v2 = vld [vmem:[%s3184_s2] ss:$0 sm:$0xff] }
  0xe7   : > { %v1405_v43 = vsel %vm1395_vm3, %v1388_v35, %v1261_v45 }
  0xe8   : > { %1804 = vmatprep.mubr.msk.bf16.mxu1 %vm1431_vm7, %v1405_v43 }
  0xe9   : > { %v1253_v53 = vpop.permute.xlu0 %1252 }
  0xea   : > { %v1397_v52 = vsel %vm1395_vm3, %v1380_v63, %v1253_v53  ;;  %v994_v60 = vpop.permute.xlu1 %993 }
  0xeb   : > { %1796 = vmatprep.mubr.msk.bf16.mxu0 %vm1431_vm7, %v1397_v52  ;;  %v1289_v62 = vsel %vm1268_vm8, %v712_v5, %v994_v60 }
  0xed   : > { %v986_v57 = vpop.permute.xlu0 %985 }
  0xee   : > { %v1277_v1 = vsel %vm1268_vm8, %v708_v7, %v986_v57 }
  0xf1   : > { %v1263_v56 = vpop.permute.xlu1 %1262 }
  0xf2   : > { %v1407_v32 = vsel %vm1395_vm3, %v1390_v61, %v1263_v56 }
  0xf3   : > { %1805 = vmatmul.mubr.msk.bf16.vlgmr.msra.gmra.mxu1 %vm1431_vm7, %v1407_v32 }
  0xf4   : > { %v1255_v50 = vpop.permute.xlu0 %1254 }
  0xf5   : > { %v1399_v59 = vsel %vm1395_vm3, %v1382_v47, %v1255_v50  ;;  %v996_v11 = vpop.permute.xlu1 %995 }
  0xf6   : > { %1797 = vmatmul.mubr.msk.bf16.vlgmr.msra.gmra.mxu0 %vm1431_vm7, %v1399_v59  ;;  %v1292_v48 = vsel %vm1268_vm8, %v713_v4, %v996_v11  ;;  %v3095_v59 = vld [vmem:[%s3185_s3] ss:$0 sm:$0xff] }
  0xf8   : > { %v988_v20 = vpop.permute.xlu0 %987 }
  0xf9   : > { %v1280_v29 = vsel %vm1268_vm8, %v709_v44, %v988_v20  ;;  %v1037_v23 = vpop.permute.xlu1 %1036 }
  0xfa   : > { %v1307_v14 = vsel %vm1293_vm15, %v1289_v62, %v1037_v23 }
  0xfc   : > { %v1029_v3 = vpop.permute.xlu0 %1028 }
  0xfd   : > { %v1299_v12 = vsel %vm1293_vm15, %v1277_v1, %v1029_v3  ;;  %v1039_v6 = vpop.permute.xlu1 %1038 }
  0xfe   : > { %v1309_v0 = vsel %vm1293_vm15, %v1292_v48, %v1039_v6 }
 0x100   : > { %v1031_v19 = vpop.permute.xlu0 %1030 }
 0x101   : > { %v1301_v25 = vsel %vm1293_vm15, %v1280_v29, %v1031_v19  ;;  %v1080_v4 = vpop.permute.xlu1 %1079 }
 0x102   : > { %v1324_v45 = vsel %vm1310_vm0, %v1307_v14, %v1080_v4 }
 0x104   : > { %v1072_v31 = vpop.permute.xlu0 %1071 }
 0x105   : > { %v1082_v51 = vpop.permute.xlu1 %1081  ;;  %v1316_v41 = vsel %vm1310_vm0, %v1299_v12, %v1072_v31 }
 0x106   : > { %v1326_v18 = vsel %vm1310_vm0, %v1309_v0, %v1082_v51  ;;  %v3105_v0 = vld [vmem:[%s3186_s4] ss:$0 sm:$0xff] }
 0x108   : > { %v1074_v49 = vpop.permute.xlu0 %1073 }
 0x109   : > { %v1134_v39 = vpop.permute.xlu1 %1133  ;;  %v1318_v21 = vsel %vm1310_vm0, %v1301_v25, %v1074_v49 }
 0x10a   : > { %v1341_v55 = vsel %vm1327_vm4, %v1324_v45, %v1134_v39 }
 0x10c   : > { %v1126_v15 = vpop.permute.xlu0 %1125 }
 0x10d   : > { %v1136_v28 = vpop.permute.xlu1 %1135  ;;  %v1333_v5 = vsel %vm1327_vm4, %v1316_v41, %v1126_v15 }
 0x10e   : > { %v1343_v53 = vsel %vm1327_vm4, %v1326_v18, %v1136_v28 }
 0x110   : > { %v1128_v44 = vpop.permute.xlu0 %1127 }
 0x111   : > { %v1177_v42 = vpop.permute.xlu1 %1176  ;;  %v1335_v46 = vsel %vm1327_vm4, %v1318_v21, %v1128_v44 }
 0x112   : > { %v1358_v26 = vsel %vm1344_vm11, %v1341_v55, %v1177_v42 }
 0x114   : > { %v1169_v16 = vpop.permute.xlu0 %1168 }
 0x115   : > { %v1179_v24 = vpop.permute.xlu1 %1178  ;;  %v1350_v37 = vsel %vm1344_vm11, %v1333_v5, %v1169_v16 }
 0x116   : > { %v1360_v52 = vsel %vm1344_vm11, %v1343_v53, %v1179_v24 }
 0x118   : > { %v1171_v34 = vpop.permute.xlu0 %1170 }
 0x119   : > { %v1201_v8 = vpop.permute.xlu1 %1200  ;;  %v1352_v38 = vsel %vm1344_vm11, %v1335_v46, %v1171_v34 }
 0x11a   : > { %v1375_v22 = vsel %vm1361_vm10, %v1358_v26, %v1201_v8 }
 0x11c   : > { %v1193_v10 = vpop.permute.xlu0 %1192 }
 0x11d   : > { %v1203_v9 = vpop.permute.xlu1 %1202  ;;  %v1367_v60 = vsel %vm1361_vm10, %v1350_v37, %v1193_v10 }
 0x11e   : > { %v1377_v7 = vsel %vm1361_vm10, %v1360_v52, %v1203_v9 }
 0x120   : > { %v1195_v17 = vpop.permute.xlu0 %1194 }
 0x121   : > { %v1223_v54 = vpop.permute.xlu1 %1222  ;;  %v1369_v1 = vsel %vm1361_vm10, %v1352_v38, %v1195_v17 }
 0x122   : > { %v1392_v33 = vsel %vm1378_vm9, %v1375_v22, %v1223_v54 }
 0x124   : > { %v1215_v35 = vpop.permute.xlu0 %1214 }
 0x125   : > { %v1225_v36 = vpop.permute.xlu1 %1224  ;;  %v1384_v27 = vsel %vm1378_vm9, %v1367_v60, %v1215_v35 }
 0x126   : > { %v1394_v40 = vsel %vm1378_vm9, %v1377_v7, %v1225_v36 }
 0x128   : > { %v1217_v43 = vpop.permute.xlu0 %1216 }
 0x129   : > { %v1265_v63 = vpop.permute.xlu1 %1264  ;;  %v1386_v56 = vsel %vm1378_vm9, %v1369_v1, %v1217_v43 }
 0x12a   : > { %v1409_v30 = vsel %vm1395_vm3, %v1392_v33, %v1265_v63 }
 0x12b   : > { %1808 = vmatprep.mubr.msk.bf16.mxu1 %vm1431_vm7, %v1409_v30 }
 0x12c   : > { %v1257_v62 = vpop.permute.xlu0 %1256 }
 0x12d   : > { %v1401_v58 = vsel %vm1395_vm3, %v1384_v27, %v1257_v62  ;;  %v1267_v57 = vpop.permute.xlu1 %1266 }
 0x12e   : > { %1800 = vmatprep.mubr.msk.bf16.mxu0 %vm1431_vm7, %v1401_v58  ;;  %v1411_v61 = vsel %vm1395_vm3, %v1394_v40, %v1267_v57 }
 0x12f   : > { %1809 = vmatmul.mubr.msk.bf16.gmra.mxu1 %vm1431_vm7, %v1411_v61 }
 0x130   : > { %v1259_v13 = vpop.permute.xlu0 %1258 }
 0x131   : > { %v1403_v32 = vsel %vm1395_vm3, %v1386_v56, %v1259_v13 }
 0x132   : > { %1801 = vmatmul.mubr.msk.bf16.gmra.mxu0 %vm1431_vm7, %v1403_v32 }
 0x1b3   : > { %v1806_v47 = vpop.f32.mrf.mxu1 }
 0x1b4   : > { %v1527_v50 = vadd.f32 %v1806_v47, %v3089_v2 }
 0x1b5   : > { %v1518_v11 = vpop.f32.mrf.mxu1 }
 0x1b6   : > { %v1798_v48 = vpop.f32.mrf.mxu0  ;;  %v1519_v20 = vadd.f32 %v3089_v2, %v1518_v11  ;;  %v1566_v14 = vmul.f32 %v3095_v59, %v1527_v50 }
 0x1b7   : > { %v1495_v29 = vadd.f32 %v1798_v48, %v3089_v2  ;;  %v1807_v23 = vpop.f32.mrf.mxu1 }
 0x1b8   : > { %v1486_v3 = vpop.f32.mrf.mxu0  ;;  %v1564_v12 = vmul.f32 %v3095_v59, %v1519_v20  ;;  %v1530_v6 = vadd.f32 %v1807_v23, %v3089_v2  ;;  %v1589_v44 = vadd.f32 %v3105_v0, %v1566_v14 }
 0x1b9   : > { %v1487_v19 = vadd.f32 %v3089_v2, %v1486_v3  ;;  %v1521_v25 = vpop.f32.mrf.mxu1  ;;  %v1558_v39 = vmul.f32 %v3095_v59, %v1495_v29 }
 0x1ba   : > { %v1587_v4 = vadd.f32 %v3105_v0, %v1564_v12  ;;  %v1799_v31 = vpop.f32.mrf.mxu0  ;;  %v1567_v51 = vmul.f32 %v3095_v59, %v1530_v6  ;;  %v1522_v49 = vadd.f32 %v3089_v2, %v1521_v25  ;;  %v1605_v45 = vmax.f32 %v1589_v44, 0.0 }
 0x1bb   : > { %v1556_v15 = vmul.f32 %v3095_v59, %v1487_v19  ;;  %v1498_v28 = vadd.f32 %v1799_v31, %v3089_v2  ;;  %v1581_v54 = vadd.f32 %v3105_v0, %v1558_v39 }
 0x1bc   : > { %v1489_v42 = vpop.f32.mrf.mxu0  ;;  %v1565_v16 = vmul.f32 %v3095_v59, %v1522_v49  ;;  %v1603_v10 = vmax.f32 %v1587_v4, 0.0  ;;  %v1590_v9 = vadd.f32 %v3105_v0, %v1567_v51  ;;  %v1628_v53 = vsel %vm1395_vm3, %v1605_v45, -inf }
 0x1bd   : > { %v1579_v24 = vadd.f32 %v3105_v0, %v1556_v15  ;;  %v1559_v34 = vmul.f32 %v3095_v59, %v1498_v28  ;;  %v1490_v8 = vadd.f32 %v3089_v2, %v1489_v42  ;;  %v1597_v5 = vmax.f32 %v1581_v54, 0.0 }
 0x1be   : > { %v1588_v17 = vadd.f32 %v3105_v0, %v1565_v16  ;;  %v1625_v22 = vsel %vm1395_vm3, %v1603_v10, -inf  ;;  %v1606_v43 = vmax.f32 %v1590_v9, 0.0 }
 0x1bf   : > { %v1557_v35 = vmul.f32 %v3095_v59, %v1490_v8  ;;  %v1595_v55 = vmax.f32 %v1579_v24, 0.0  ;;  %v1582_v26 = vadd.f32 %v3105_v0, %v1559_v34  ;;  %v1614_v27 = vsel %vm1395_vm3, %v1597_v5, -inf }
 0x1c0   : > { %v1604_v36 = vmax.f32 %v1588_v17, 0.0  ;;  %v1630_v21 = vsel %vm1395_vm3, %v1606_v43, -inf }
 0x1c1   : > { %v1580_v41 = vadd.f32 %v3105_v0, %v1557_v35  ;;  %v1611_v37 = vsel %vm1395_vm3, %v1595_v55, -inf  ;;  %v1598_v30 = vmax.f32 %v1582_v26, 0.0 }
 0x1c2   : > { %v1626_v18 = vsel %vm1395_vm3, %v1604_v36, -inf }
 0x1c3   : > { %v1596_v33 = vmax.f32 %v1580_v41, 0.0  ;;  %v1627_v63 = vmax.f32 %v1625_v22, %v1626_v18  ;;  %v1616_v40 = vsel %vm1395_vm3, %v1598_v30, -inf }
 0x1c5   : > { %v1612_v52 = vsel %vm1395_vm3, %v1596_v33, -inf  ;;  %v1629_v60 = vmax.f32 %v1627_v63, %v1628_v53 }
 0x1c6   : > { %v1613_v7 = vmax.f32 %v1611_v37, %v1612_v52 }
 0x1c7   : > { %v1631_v62 = vmax.f32 %v1629_v60, %v1630_v21 }
 0x1c8   : > { %v1615_v46 = vmax.f32 %v1613_v7, %v1614_v27 }
 0x1c9   : > { %v1780_v58 = vpack.c.bf16 %v1631_v62, %v1631_v62 }
 0x1ca   : > { %v1617_v57 = vmax.f32 %v1615_v46, %v1616_v40 }
 0x1cb   : > { %1658 = vst.msk [vmem:[%s3136_s22 + $0x8] sm:$0xf] %vm1655_vm5, %v1780_v58 }
 0x1cc   : > { %v1778_v38 = vpack.c.bf16 %v1617_v57, %v1617_v57 }
 0x1ce   : > { %1656 = vst.msk [vmem:[%s3136_s22] sm:$0xf] %vm1655_vm5, %v1778_v38 }
 0x1ef   : > { %v1810_v61 = vpop.f32.mrf.mxu1 }
 0x1f0   : > { %v1543_v1 = vadd.f32 %v1810_v61, %v3089_v2 }
 0x1f1   : > { %v1534_v56 = vpop.f32.mrf.mxu1 }
 0x1f2   : > { %v1802_v13 = vpop.f32.mrf.mxu0  ;;  %v1535_v32 = vadd.f32 %v3089_v2, %v1534_v56  ;;  %v1570_v11 = vmul.f32 %v3095_v59, %v1543_v1 }
 0x1f3   : > { %v1511_v47 = vadd.f32 %v1802_v13, %v3089_v2  ;;  %v1811_v50 = vpop.f32.mrf.mxu1 }
 0x1f4   : > { %v1502_v48 = vpop.f32.mrf.mxu0  ;;  %v1568_v20 = vmul.f32 %v3095_v59, %v1535_v32  ;;  %v1546_v29 = vadd.f32 %v1811_v50, %v3089_v2  ;;  %v1593_v51 = vadd.f32 %v3105_v0, %v1570_v11 }
 0x1f5   : > { %v1503_v23 = vadd.f32 %v3089_v2, %v1502_v48  ;;  %v1537_v14 = vpop.f32.mrf.mxu1  ;;  %v1562_v25 = vmul.f32 %v3095_v59, %v1511_v47 }
 0x1f6   : > { %v1591_v3 = vadd.f32 %v3105_v0, %v1568_v20  ;;  %v1803_v12 = vpop.f32.mrf.mxu0  ;;  %v1571_v6 = vmul.f32 %v3095_v59, %v1546_v29  ;;  %v1538_v19 = vadd.f32 %v3089_v2, %v1537_v14  ;;  %v1609_v10 = vmax.f32 %v1593_v51, 0.0 }
 0x1f7   : > { %v1560_v4 = vmul.f32 %v3095_v59, %v1503_v23  ;;  %v1514_v31 = vadd.f32 %v1803_v12, %v3089_v2  ;;  %v1585_v34 = vadd.f32 %v3105_v0, %v1562_v25 }
 0x1f8   : > { %v1505_v49 = vpop.f32.mrf.mxu0  ;;  %v1569_v39 = vmul.f32 %v3095_v59, %v1538_v19  ;;  %v1607_v42 = vmax.f32 %v1591_v3, 0.0  ;;  %v1594_v16 = vadd.f32 %v3105_v0, %v1571_v6  ;;  %v1635_v22 = vsel %vm1395_vm3, %v1609_v10, -inf }
 0x1f9   : > { %v1583_v15 = vadd.f32 %v3105_v0, %v1560_v4  ;;  %v1563_v28 = vmul.f32 %v3095_v59, %v1514_v31  ;;  %v1506_v44 = vadd.f32 %v3089_v2, %v1505_v49  ;;  %v1601_v55 = vmax.f32 %v1585_v34, 0.0 }
 0x1fa   : > { %v1592_v24 = vadd.f32 %v3105_v0, %v1569_v39  ;;  %v1632_v45 = vsel %vm1395_vm3, %v1607_v42, -inf  ;;  %v1610_v36 = vmax.f32 %v1594_v16, 0.0 }
 0x1fb   : > { %v1561_v8 = vmul.f32 %v3095_v59, %v1506_v44  ;;  %v1599_v17 = vmax.f32 %v1583_v15, 0.0  ;;  %v1586_v54 = vadd.f32 %v3105_v0, %v1563_v28  ;;  %v1621_v63 = vsel %vm1395_vm3, %v1601_v55, -inf }
 0x1fc   : > { %v1608_v9 = vmax.f32 %v1592_v24, 0.0 }
 0x1fd   : > { %v1584_v35 = vadd.f32 %v3105_v0, %v1561_v8  ;;  %v1618_v59 = vsel %vm1395_vm3, %v1599_v17, -inf  ;;  %v1602_v43 = vmax.f32 %v1586_v54, 0.0  ;;  %v1637_v0 = vsel %vm1395_vm3, %v1610_v36, -inf }
 0x1fe   : > { %v1633_v2 = vsel %vm1395_vm3, %v1608_v9, -inf }
 0x1ff   : > { %v1600_v26 = vmax.f32 %v1584_v35, 0.0  ;;  %v1634_v41 = vmax.f32 %v1632_v45, %v1633_v2  ;;  %v1623_v30 = vsel %vm1395_vm3, %v1602_v43, -inf }
 0x201   : > { %v1619_v18 = vsel %vm1395_vm3, %v1600_v26, -inf  ;;  %v1636_v5 = vmax.f32 %v1634_v41, %v1635_v22 }
 0x202   : > { %v1620_v33 = vmax.f32 %v1618_v59, %v1619_v18 }
 0x203   : > { %v1638_v53 = vmax.f32 %v1636_v5, %v1637_v0 }
 0x204   : > { %v1622_v37 = vmax.f32 %v1620_v33, %v1621_v63 }
 0x205   : > { %v1781_v52 = vpack.c.bf16 %v1638_v53, %v1638_v53 }
 0x206   : > { %v1624_v60 = vmax.f32 %v1622_v37, %v1623_v30 }
 0x207   : > { %1659 = vst.msk [vmem:[%s3136_s22 + $0xc] sm:$0xf] %vm1655_vm5, %v1781_v52 }
 0x208   : > { %v1779_v21 = vpack.c.bf16 %v1624_v60, %v1624_v60 }
 0x20a   : > { %1657 = vst.msk [vmem:[%s3136_s22 + $0x4] sm:$0xf] %vm1655_vm5, %v1779_v21 }
 0x20b PF: > { %s15_s18 = sadd.s32 1, %s1851_s18  }
 0x20c   : > { %p12_p4 = scmp.ge.s32.totalorder %s15_s18, 8  }
 0x20e   :  { %14 = sbr.rel (!%p12_p4) target bundleno = 1 (0x1), region = 70 }

// kernel: _lambda_.7
= control target key start
LH: loop header
LB: loop body
LE: loop exit
PB: predicated region body
PF: predicated region fallthrough
CT: control target
= control target key end

     0   :  { %s1758_s25 = smov 0   ;;  %s2277_s0 = inlined_call_operand.vmem [shape: bf16[6,32,16], index: 0, kind: input, shape index: {}]   ;;  %s2278_s1 = inlined_call_operand.vmem [shape: f32[1,16], index: 1, kind: input, shape index: {}, may-alias: {1,4,10}]   ;;  %s2279_s2 = inlined_call_operand.vmem [shape: f32[1,16], index: 2, kind: input, shape index: {}, may-alias: {2,5,11}]   ;;  %s2280_s3 = inlined_call_operand.vmem [shape: bf16[16,16], index: 3, kind: input, shape index: {}]   ;;  %s2281_s4 = inlined_call_operand.vmem [shape: f32[1,16], index: 4, kind: input, shape index: {}, may-alias: {1,4,10}]   ;;  %s2282_s5 = inlined_call_operand.vmem [shape: f32[1,16], index: 5, kind: input, shape index: {}, may-alias: {2,5,11}]   ;;  %s2283_s6 = inlined_call_operand.vmem [shape: bf16[144,8], index: 6, kind: input, shape index: {}]   ;;  %s2284_s7 = inlined_call_operand.vmem [shape: f32[1,24], index: 7, kind: input, shape index: {}]   ;;  %s2285_s8 = inlined_call_operand.vmem [shape: f32[1,24], index: 8, kind: input, shape index: {}]   ;;  %s2286_s9 = inlined_call_operand.vmem [shape: bf16[24,16], index: 9, kind: input, shape index: {}]   ;;  %s2287_s10 = inlined_call_operand.vmem [shape: f32[1,16], index: 10, kind: input, shape index: {}, may-alias: {1,4,10}]   ;;  %s2288_s11 = inlined_call_operand.vmem [shape: f32[1,16], index: 11, kind: input, shape index: {}, may-alias: {2,5,11}]   ;;  %s2289_s12 = inlined_call_operand.vmem [shape: bf16[144,8], index: 12, kind: input, shape index: {}]   ;;  %s2290_s13 = inlined_call_operand.vmem [shape: bf16[6,32,32], index: 13, kind: output, shape index: {}]  }
   0x1 LB: > { %s1544_s26 = sadd.s32 4294967295, %s1677_s25   ;;  %p1548_p0 = scmp.ge.s32.totalorder %s1677_s25, 1  ;;  %s1677_s25 = sphi %s1758_s25, %s23_s25  }
   0x2   : > { %p387_p1 = scmp.lt.s32.totalorder %s1677_s25, 7 }
   0x4   : > { %p388_p2 = pnand %p1548_p0, %p387_p1 }
   0x5   : > { %p431_p3 = scmp.lt.s32.totalorder (!%p388_p2), %s1544_s26, 5  ;;  %s1680_s24 = smov (!%p388_p2), 96  }
   0x6   : > { %391 = sbr.rel (%p388_p2) target bundleno = 1387 (0x56b), region = 72  ;;  %s1681_s30 = smov (!%p388_p2), 32  }
   0x7   : > { %s1682_s14 = smov (!%p388_p2), 48   ;;  %s1684_s18 = smov (!%p388_p2), 16  }
   0x8   : > { %s1685_s19 = smov (!%p388_p2), 64   ;;  %s1686_s20 = smov (!%p388_p2), 112  }
   0xb   : > { %v1646_v0 = vld [vmem:[%s2280_s3] sm:$0xff]   ;;  %s2366_s26 = smov (!%p431_p3, %s1544_s26), 5  ;;  %vm549_vm0 = vcmask 130048   ;;  %v1679_v23 = vmov 0   ;;  %v1647_v24 = vld [vmem:[%s2283_s6 + $0x38] sm:$0xff]   ;;  %v1648_v25 = vld [vmem:[%s2283_s6 + $0x30] sm:$0xff]   ;;  %v444_v28 = vlaneseq }
   0xc   : > { %1614 = vmatprep.subr.bf16.mxu1 %v1646_v0  ;;  %s2303_s29 = sshll.u32 %s2366_s26, 4  ;;  %v1553_v1 = vld [vmem:[%s2278_s1] ss:$0 sm:$0xff]  ;;  %v1649_v26 = vld [vmem:[%s2283_s6 + $0x28] sm:$0xff]   ;;  %vm2292_vm15 = vsmask.f32 4352 }
   0xd   : > { %1615 = vmatpush3.bf16.msra.mxu1 %v1646_v0  ;;  %s435_s17 = scalar_lea.vmem %s2277_s0, %s2303_s29  ;;  %v1554_v3 = vld [vmem:[%s2279_s2] ss:$0 sm:$0xff]  ;;  %v445_v29 = vshrl.u32 %v444_v28, 7  ;;  %v1653_v38 = vld [vmem:[%s2283_s6 + $0x8] sm:$0xff]  }
   0xe   : > { %v1780_v2 = vld [vmem:[%s435_s17] sm:$0xff]   ;;  %v1785_v4 = vld [vmem:[%s435_s17 + $0x8] sm:$0xff]   ;;  %960 = vmatprep.subr.bf16.mxu1 %v1679_v23  ;;  %s1683_s17 = smov 80  }
   0xf   : > { %v509_v5 = vunpack.c.l.bf16 %v1780_v2  ;;  %v510_v6 = vunpack.c.h.bf16 %v1780_v2  ;;  %v511_v7 = vunpack.c.l.bf16 %v1785_v4  ;;  %v512_v8 = vunpack.c.h.bf16 %v1785_v4  ;;  %v1650_v27 = vld [vmem:[%s2283_s6 + $0x20] sm:$0xff]  }
  0x10   : > { %v446_v30 = vadd.s32 8, %v445_v29  ;;  %v447_v31 = vadd.s32 16, %v445_v29  ;;  %v448_v32 = vadd.s32 24, %v445_v29  ;;  %v453_v33 = vand.u32 7, %v445_v29  ;;  %v1558_v39 = vld [vmem:[%s2281_s4] ss:$0 sm:$0xff] }
  0x11   : > { %v520_v9 = vmul.f32 %v1553_v1, %v509_v5  ;;  %v521_v10 = vmul.f32 %v1553_v1, %v510_v6  ;;  %v522_v11 = vmul.f32 %v1553_v1, %v511_v7  ;;  %v523_v12 = vmul.f32 %v1553_v1, %v512_v8  ;;  %v1559_v42 = vld [vmem:[%s2282_s5] ss:$0 sm:$0xff]  ;;  %v1651_v1 = vld [vmem:[%s2283_s6 + $0x18] sm:$0xff]  }
  0x12   : > { %v460_v34 = vand.u32 7, %v446_v30  ;;  %v467_v35 = vand.u32 7, %v447_v31  ;;  %v474_v36 = vand.u32 7, %v448_v32  ;;  %vm501_vm1 = vcmp.ne.s32.totalorder %v453_v33, 7  ;;  %v1668_v37 = vld [vmem:[%s2289_s12 + $0x40] sm:$0xff]  }
  0x13   : > { %v531_v13 = vadd.f32 %v1554_v3, %v520_v9  ;;  %v532_v14 = vadd.f32 %v1554_v3, %v521_v10  ;;  %v533_v15 = vadd.f32 %v1554_v3, %v522_v11  ;;  %v534_v16 = vadd.f32 %v1554_v3, %v523_v12  ;;  %vm692_vm5 = vmpackc.low %vm501_vm1, %vm501_vm1 }
  0x14   : > { %vm502_vm2 = vcmp.ne.s32.totalorder %v460_v34, 7  ;;  %vm1810_vm3 = vcmp.ne.s32.totalorder %v467_v35, 7  ;;  %vm1814_vm4 = vcmp.ne.s32.totalorder %v474_v36, 7  ;;  %v696_v44 = vsel %vm692_vm5, 65537, %v1679_v23 }
  0x15   : > { %v535_v17 = vmax.f32 %v531_v13, 0.0  ;;  %v536_v18 = vmax.f32 %v532_v14, 0.0  ;;  %v537_v19 = vmax.f32 %v533_v15, 0.0  ;;  %v538_v20 = vmax.f32 %v534_v16, 0.0  ;;  %vm693_vm6 = vmpackc.low %vm502_vm2, %vm502_vm2 }
  0x16   : > { %vm694_vm7 = vmpackc.low %vm1810_vm3, %vm1810_vm3  ;;  %v697_v45 = vsel %vm693_vm6, 65537, %v1679_v23  ;;  %vm1832_vm9 = vcmp.ne.s32.totalorder %v453_v33, 0  ;;  %vm1838_vm10 = vcmp.ne.s32.totalorder %v460_v34, 0  ;;  %vm1842_vm11 = vcmp.ne.s32.totalorder %v474_v36, 0 }
  0x17   : > { %v539_v21 = vpack.c.bf16 %v536_v18, %v535_v17  ;;  %v540_v22 = vpack.c.bf16 %v538_v20, %v537_v19  ;;  %vm695_vm8 = vmpackc.low %vm1814_vm4, %vm1814_vm4  ;;  %v698_v48 = vsel %vm694_vm7, 65537, %v1679_v23  ;;  %vm1846_vm12 = vcmp.ne.s32.totalorder %v467_v35, 0 }
  0x18   : > { %v699_v49 = vsel %vm695_vm8, 65537, %v1679_v23  ;;  %vm666_vm13 = vmpackc.low %vm1832_vm9, %vm1832_vm9  ;;  %v1562_v57 = vcombine.low %v696_v44, %v697_v45  ;;  %vm706_vm3 = vcmask 1040384   ;;  %vm654_vm4 = vcmask 1044480  }
  0x19   : > { %1616 = vmatprep.mubr.msk.bf16.mxu1 %vm549_vm0, %v539_v21  ;;  %v1853_v58 = vcombine.low %v698_v48, %v699_v49  ;;  %vm667_vm14 = vmpackc.low %vm1838_vm10, %vm1838_vm10  ;;  %v670_v3 = vsel %vm666_vm13, 65537, %v1679_v23  ;;  %vm2298_vm9 = vcmask 1046528  }
  0x1a   : > { %1617 = vmatmul.mubr.msk.bf16.vlgmr.msra.gmra.mxu1 %vm549_vm0, %v540_v22  ;;  %vm669_vm1 = vmpackc.low %vm1842_vm11, %vm1842_vm11  ;;  %v671_v5 = vsel %vm667_vm14, 65537, %v1679_v23  ;;  %v707_v6 = vrot.slane %v1562_v57, 7  ;;  %v725_v13 = vrot.slane %v1562_v57, 3  ;;  %v1564_v18 = vcombine.low %v670_v3, %v670_v3 }
  0x1b   : > { %961 = vmatpush1.bf16.msra.mxu1 %v1647_v24  ;;  %vm668_vm2 = vmpackc.low %vm1846_vm12, %vm1846_vm12  ;;  %v708_v7 = vrot.slane %v1853_v58, 7  ;;  %v1871_v11 = vsel %vm669_vm1, 65537, %v1679_v23  ;;  %v726_v14 = vrot.slane %v1853_v58, 3  ;;  %v1560_v19 = vcombine.low %v670_v3, %v671_v5  ;;  %v1652_v24 = vld [vmem:[%s2283_s6 + $0x10] sm:$0xff]  }
  0x1c   : > { %962 = vmatprep.subr.bf16.mxu1 %v1679_v23  ;;  %v1874_v12 = vsel %vm668_vm2, 65537, %v1679_v23  ;;  %v1566_v22 = vcombine.low %v1871_v11, %v1871_v11  ;;  %vm1891_vm5 = vmand %vm654_vm4, %vm2292_vm15  ;;  %vm1895_vm6 = vcmp.ne.s16.totalorder %v707_v6, 0  ;;  %vm1910_vm10 = vcmp.ne.s16.totalorder %v1564_v18, 0  ;;  %v1655_v18 = vld [vmem:[%s2283_s6 + $0x40] sm:$0xff]  }
  0x1d   : > { %v1565_v20 = vcombine.low %v671_v5, %v1874_v12  ;;  %v1882_v21 = vsel %vm706_vm3, %v707_v6, %v708_v7  ;;  %v1902_v31 = vsel %vm654_vm4, %v725_v13, %v726_v14  ;;  %vm1906_vm8 = vcmp.ne.s16.totalorder %v1560_v19, 0 }
  0x1e   : > { %vm2293_vm7 = vcmp.ne.s16.totalorder %v1882_v21, 0  ;;  %vm1914_vm11 = vcmp.ne.s16.totalorder %v1566_v22, 0  ;;  %vm1929_vm13 = vcmp.ne.s16.totalorder %v725_v13, 0  ;;  %vm2297_vm14 = vcmask 1043456  }
  0x1f   : > { %963 = vmatpush1.bf16.msra.mxu1 %v1648_v25  ;;  %vm1925_vm12 = vcmp.ne.s16.totalorder %v1565_v20, 0  ;;  %vm2291_vm1 = vcmp.ne.s16.totalorder %v1902_v31, 0  ;;  %vm2296_vm2 = vcmask 1042432   ;;  %vm1999_vm3 = vcmp.ne.s16.totalorder %v708_v7, 0 }
  0x20   : > { %964 = vmatprep.subr.bf16.mxu1 %v1679_v23  ;;  %vm2295_vm4 = vsmask.f32 7424 }
  0x23   : > { %965 = vmatpush1.bf16.msra.mxu1 %v1649_v26 }
  0x24   : > { %966 = vmatprep.subr.bf16.mxu1 %v1679_v23 }
  0x27   : > { %967 = vmatpush1.bf16.msra.mxu1 %v1650_v27 }
  0x28   : > { %968 = vmatprep.subr.bf16.mxu1 %v1679_v23 }
  0x2b   : > { %969 = vmatpush1.bf16.msra.mxu1 %v1651_v1  ;;  %v1654_v1 = vld [vmem:[%s2283_s6] sm:$0xff]  }
  0x2c   : > { %970 = vmatprep.subr.bf16.mxu1 %v1679_v23 }
  0x2f   : > { %971 = vmatpush1.bf16.msra.mxu1 %v1652_v24 }
  0x30   : > { %972 = vmatprep.subr.bf16.mxu1 %v1679_v23 }
  0x33   : > { %973 = vmatpush1.bf16.msra.mxu1 %v1653_v38  ;;  %v2332_v38 = vmov 0 }
  0x34   : > { %974 = vmatprep.subr.bf16.mxu1 %v1679_v23 }
  0x37   : > { %975 = vmatpush1.bf16.msra.mxu1 %v1654_v1 }
  0x38   : > { %990 = vmatprep.subr.bf16.mxu1 %v1679_v23 }
  0x3b   : > { %991 = vmatpush2.bf16.msra.mxu1 %v1655_v18 }
  0xda   : > { %v1618_v40 = vpop.f32.mrf.mxu1 }
  0xdb   : > { %v614_v41 = vmul.f32 %v1618_v40, %v1558_v39 }
  0xdc   : > { %v590_v43 = vpop.f32.mrf.mxu1 }
  0xdd   : > { %v612_v46 = vmul.f32 %v1558_v39, %v590_v43  ;;  %v625_v52 = vadd.f32 %v1559_v42, %v614_v41 }
  0xde   : > { %v1619_v50 = vpop.f32.mrf.mxu1 }
  0xdf   : > { %v615_v53 = vmul.f32 %v1619_v50, %v1558_v39  ;;  %v623_v59 = vadd.f32 %v1559_v42, %v612_v46  ;;  %v629_v62 = vmax.f32 %v625_v52, 0.0 }
  0xe0   : > { %v593_v55 = vpop.f32.mrf.mxu1 }
  0xe1   : > { %v626_v60 = vadd.f32 %v1559_v42, %v615_v53  ;;  %v613_v61 = vmul.f32 %v1558_v39, %v593_v55  ;;  %v627_v8 = vmax.f32 %v623_v59, 0.0 }
  0xe3   : > { %v630_v63 = vmax.f32 %v626_v60, 0.0  ;;  %v624_v0 = vadd.f32 %v1559_v42, %v613_v61 }
  0xe5   : > { %v632_v9 = vpack.c.bf16 %v630_v63, %v629_v62  ;;  %v628_v10 = vmax.f32 %v624_v0, 0.0 }
  0xe7   : > { %v643_v15 = vshrl.u32 %v632_v9, 16  ;;  %v646_v16 = vshll.u32 %v632_v9, 16  ;;  %v631_v17 = vpack.c.bf16 %v628_v10, %v627_v8 }
  0xe9   : > { %v645_v25 = vrot.slane %v643_v15, 3  ;;  %v648_v26 = vrot.slane %v646_v16, 4  ;;  %v635_v27 = vshrl.u32 %v631_v17, 16  ;;  %v638_v28 = vshll.u32 %v631_v17, 16 }
  0xeb   : > { %v649_v32 = vor.u32 %v648_v26, %v645_v25  ;;  %v637_v33 = vrot.slane %v635_v27, 3  ;;  %v640_v34 = vrot.slane %v638_v28, 4 }
  0xed   : > { %v1923_v39 = vsel %vm1891_vm5, %v649_v32, 0  ;;  %v641_v40 = vor.u32 %v640_v34, %v637_v33 }
  0xee   : > { %v1936_v43 = vsel %vm2293_vm7, %v1923_v39, 0  ;;  %v724_v47 = vsel %vm1914_vm11, %v1923_v39, 0  ;;  %v755_v34 = vshll.u32 %v1923_v39, 16 }
  0xef   : > { %v1940_v44 = vsel %vm2292_vm15, %v641_v40, %v649_v32  ;;  %v1944_v45 = vsel %vm1891_vm5, 0, %v641_v40  ;;  %v840_v46 = vrot.slane %v1936_v43, 1  ;;  %v783_v13 = vrot.slane %v724_v47, 4 }
  0xf0   : > { %v734_v48 = vsel %vm1906_vm8, %v1940_v44, 0  ;;  %v736_v49 = vsel %vm1895_vm6, %v1940_v44, 0  ;;  %v713_v50 = vsel %vm1895_vm6, %v1944_v45, 0  ;;  %v1963_v51 = vsel %vm2293_vm7, %v1940_v44, 0 }
  0xf1   : > { %822 = vrot.lane.b32.xlu1 %v734_v48, %s1680_s24  ;;  %v839_v52 = vrot.slane %v736_v49, 1  ;;  %v767_v53 = vrot.slane %v713_v50, 1  ;;  %v768_v54 = vrot.slane %v1963_v51, 1  ;;  %v722_v55 = vsel %vm1910_vm10, %v1944_v45, 0 }
  0xf2   : > { %v723_v56 = vsel %vm1925_vm12, %v1940_v44, 0  ;;  %v780_v57 = vrot.slane %v722_v55, 4  ;;  %v731_v59 = vsel %vm1929_vm13, %v1944_v45, 0  ;;  %v1979_v60 = vsel %vm2291_vm1, %v1940_v44, 0 }
  0xf3   : > { %v841_v61 = vsel %vm2298_vm9, %v839_v52, %v840_v46  ;;  %v769_v62 = vsel %vm2298_vm9, %v767_v53, %v768_v54  ;;  %v781_v63 = vrot.slane %v723_v56, 4  ;;  %v811_v0 = vrot.slane %v731_v59, 5 }
  0xf4   : > { %1576 = vmatprep.mubr.msk.bf16.mxu1 %vm549_vm0, %v841_v61  ;;  %772 = vrot.lane.b32.xlu0 %v769_v62, %s1681_s30  ;;  %v812_v3 = vrot.slane %v1979_v60, 5  ;;  %v740_v5 = vshrl.u32 %v1944_v45, 16  ;;  %v742_v6 = vshll.u32 %v1944_v45, 16  ;;  %v747_v8 = vshll.u32 %v1940_v44, 16 }
  0xf5   : > { %v782_v9 = vsel %vm2297_vm14, %v780_v57, %v781_v63  ;;  %v751_v10 = vshrl.u32 %v1940_v44, 16  ;;  %v784_v7 = vsel %vm2297_vm14, %v781_v63, %v783_v13  ;;  %vm2294_vm1 = vsmask.f32 3328 }
  0xf6   : > { %785 = vrot.lane.b32.xlu1 %v782_v9, %s1682_s14  ;;  %v744_v15 = vrot.slane %v742_v6, 1  ;;  %v790_v16 = vrot.slane %v740_v5, 4  ;;  %v813_v19 = vsel %vm2296_vm2, %v811_v0, %v812_v3  ;;  %v791_v20 = vrot.slane %v742_v6, 5 }
  0xf7   : > { %v793_v22 = vrot.slane %v751_v10, 4  ;;  %v794_v24 = vrot.slane %v747_v8, 5  ;;  %v749_v26 = vrot.slane %v747_v8, 1  ;;  %v715_v32 = vsel %vm1999_vm3, %v1923_v39, 0 }
  0xf8   : > { %816 = vrot.lane.b32.xlu0 %v813_v19, %s1683_s17  ;;  %v745_v25 = vor.u32 %v744_v15, %v740_v5  ;;  %v792_v27 = vor.u32 %v791_v20, %v790_v16  ;;  %vm2019_vm15 = vcmp.ne.s16.totalorder %v726_v14, 0  ;;  %v770_v47 = vrot.slane %v715_v32, 1 }
  0xf9   : > { %v795_v28 = vor.u32 %v794_v24, %v793_v22  ;;  %v2333_v38 = vsel %vm2019_vm15, 4294967295, %v2332_v38  ;;  %v753_v48 = vor.u32 %v751_v10, %v749_v26  ;;  %v797_v49 = vshrl.u32 %v1923_v39, 16 }
  0xfa   : > { %787 = vrot.lane.b32.xlu1 %v784_v7, %s1682_s14  ;;  %v750_v33 = vsel %vm2295_vm4, %v745_v25, %v749_v26  ;;  %v771_v50 = vsel %vm2298_vm9, %v768_v54, %v770_v47  ;;  %v757_v51 = vrot.slane %v755_v34, 1  ;;  %v733_v58 = vsel %vm2019_vm15, %v1923_v39, 0 }
  0xfb   : > { %v796_v40 = vsel %vm2294_vm1, %v792_v27, %v795_v28  ;;  %v799_v52 = vrot.slane %v797_v49, 4  ;;  %v800_v53 = vrot.slane %v755_v34, 5  ;;  %v814_v55 = vrot.slane %v733_v58, 5 }
  0xfc   : > { %759 = vrot.lane.b32.xlu0 %v750_v33, %s1684_s18  ;;  %v758_v14 = vsel %vm2295_vm4, %v753_v48, %v757_v51  ;;  %v1561_v54 = vcombine.low %v1874_v12, %v1871_v11  ;;  %v826_v59 = vor.u32 %v797_v49, %v757_v51  ;;  %v2040_v61 = vrot.slane %v1679_v23, 1 }
  0xfd   : > { %v815_v56 = vsel %vm2296_vm2, %v812_v3, %v814_v55  ;;  %v801_v57 = vor.u32 %v800_v53, %v799_v52  ;;  %v682_v6 = vsel %vm1906_vm8, %v1944_v45, 0  ;;  %vm860_vm2 = vcmask 523264   ;;  %v1659_v52 = vld [vmem:[%s2286_s9] sm:$0xff]  }
  0xfe   : > { %803 = vrot.lane.b32.xlu1 %v796_v40, %s1685_s19  ;;  %vm2043_vm7 = vcmp.ne.s16.totalorder %v1561_v54, 0  ;;  %v831_v11 = vsel %vm2295_vm4, %v826_v59, %v2040_v61  ;;  %vm855_vm4 = vcmask 392192   ;;  %vm2300_vm14 = vcmask 654336  }
  0xff   : > { %v802_v60 = vsel %vm2294_vm1, %v795_v28, %v801_v57  ;;  %v735_v12 = vsel %vm2043_vm7, %v1923_v39, 0  ;;  %vm2302_vm1 = vcmask 261120   ;;  %vm2301_vm9 = vcmask 785408  }
 0x100   : > { %774 = vrot.lane.b32.xlu0 %v771_v50, %s1681_s30  ;;  %v683_v45 = vsel %vm2043_vm7, %v1940_v44, 0  ;;  %vm875_vm15 = vcmask 916480  }
 0x102   : > { %761 = vrot.lane.b32.xlu1 %v758_v14, %s1684_s18 }
 0x104   : > { %832 = vrot.lane.b32.xlu0 %v758_v14, %s1686_s20  ;;  %v1658_v14 = vld [vmem:[%s2286_s9 + $0x8] ss:$0 sps:$4 sm:$0xff]  }
 0x106   : > { %818 = vrot.lane.b32.xlu1 %v815_v56, %s1683_s17 }
 0x108   : > { %805 = vrot.lane.b32.xlu0 %v802_v60, %s1685_s19 }
 0x10a   : > { %834 = vrot.lane.b32.xlu1 %v831_v11, %s1686_s20  ;;  %v1580_v11 = vld [vmem:[%s2284_s7] ss:$0 sm:$0xff] }
 0x10c   : > { %824 = vrot.lane.b32.xlu0 %v735_v12, %s1680_s24 }
 0x163   : > { %v823_v63 = vpop.permute.xlu1 %822 }
 0x166   : > { %v773_v0 = vpop.permute.xlu0 %772 }
 0x168   : > { %v786_v1 = vpop.permute.xlu1 %785 }
 0x16a   : > { %v817_v3 = vpop.permute.xlu0 %816 }
 0x16c   : > { %v788_v5 = vpop.permute.xlu1 %787 }
 0x16e   : > { %v760_v8 = vpop.permute.xlu0 %759 }
 0x16f   : > { %v846_v9 = vsel %vm549_vm0, %v682_v6, %v760_v8 }
 0x170   : > { %v852_v10 = vsel %vm2302_vm1, %v846_v9, %v773_v0  ;;  %v804_v39 = vpop.permute.xlu1 %803  ;;  %v1581_v0 = vld [vmem:[%s2285_s8] ss:$0 sm:$0xff] }
 0x171   : > { %v857_v13 = vsel %vm855_vm4, %v852_v10, %v786_v1 }
 0x172   : > { %v862_v15 = vsel %vm860_vm2, %v857_v13, %v804_v39  ;;  %v775_v16 = vpop.permute.xlu0 %774 }
 0x173   : > { %v867_v18 = vsel %vm2300_vm14, %v862_v15, %v817_v3  ;;  %vm2336_vm14 = vcmask 1046528  }
 0x174   : > { %v762_v19 = vpop.permute.xlu1 %761  ;;  %v872_v22 = vsel %vm2301_vm9, %v867_v18, %v823_v63  ;;  %v843_v26 = vsel %vm2336_vm14, %v840_v46, %v2040_v61  ;;  %vm2337_vm9 = vcmask 654336  }
 0x175   : > { %v849_v20 = vsel %vm549_vm0, %v683_v45, %v762_v19 }
 0x176   : > { %v833_v24 = vpop.permute.xlu0 %832  ;;  %v854_v25 = vsel %vm2302_vm1, %v849_v20, %v775_v16  ;;  %vm2338_vm1 = vcmask 785408  }
 0x177   : > { %v877_v7 = vsel %vm875_vm15, %v872_v22, %v833_v24  ;;  %v859_v28 = vsel %vm855_vm4, %v854_v25, %v788_v5  ;;  %v1661_v25 = vld [vmem:[%s2289_s12 + $0x30] sm:$0xff]  }
 0x178   : > { %993 = vmatmul.mubr.bf16.vlgmr.msra.gmra.mxu1 %v877_v7  ;;  %v819_v27 = vpop.permute.xlu1 %818  ;;  %v1662_v7 = vld [vmem:[%s2289_s12 + $0x28] sm:$0xff]  }
 0x179   : > { %1577 = vmatprep.mubr.msk.bf16.mxu1 %vm549_vm0, %v843_v26  ;;  %v1663_v26 = vld [vmem:[%s2289_s12 + $0x20] sm:$0xff]  }
 0x17a   : > { %v806_v44 = vpop.permute.xlu0 %805 }
 0x17b   : > { %v864_v32 = vsel %vm860_vm2, %v859_v28, %v806_v44 }
 0x17c   : > { %v869_v34 = vsel %vm2337_vm9, %v864_v32, %v819_v27  ;;  %v835_v40 = vpop.permute.xlu1 %834  ;;  %vm2339_vm9 = vcmask 1043456   ;;  %v1586_v27 = vld [vmem:[%s2287_s10] ss:$0 sm:$0xff] }
 0x17d   : > { %1628 = vmatprep.subr.msk.bf16.mxu0 %vm2339_vm9, %v1658_v14  ;;  %vm2340_vm14 = vmmov %vm2339_vm9  ;;  %v1587_v32 = vld [vmem:[%s2288_s11] ss:$0 sm:$0xff]  ;;  %vm2341_vm9 = vcmp.ne.s16.totalorder %v1882_v21, 0 }
 0x17e   : > { %v825_v33 = vpop.permute.xlu0 %824  ;;  %v1088_v55 = vsel %vm2340_vm14, %v1658_v14, 0  ;;  %vm2342_vm14 = vsmask.f32 4352  ;;  %v1667_v21 = vld [vmem:[%s2289_s12] sm:$0xff]  }
 0x17f   : > { %v874_v47 = vsel %vm2338_vm1, %v869_v34, %v825_v33  ;;  %1621 = vmatpush3.bf16.msra.mxu0 %v1088_v55  ;;  %vm1079_vm1 = vcmask 195584  }
 0x180   : > { %v880_v48 = vsel %vm875_vm15, %v874_v47, %v835_v40  ;;  %1622 = vmatprep.subr.bf16.mxu0 %v1659_v52 }
 0x181   : > { %1001 = vmatmul.mubr.bf16.gmra.mxu1 %v880_v48 }
 0x183   : > { %1623 = vmatpush3.bf16.msra.mxu0 %v1659_v52  ;;  %v1664_v52 = vld [vmem:[%s2289_s12 + $0x18] sm:$0xff]  }
 0x184   : > { %1409 = vmatprep.subr.bf16.mxu0 %v1679_v23 }
 0x238   : > { %v994_v43 = vpop.f32.mrf.mxu1 }
 0x23a   : > { %v996_v49 = vpop.f32.mrf.mxu1 }
 0x23c   : > { %v997_v46 = vpop.f32.mrf.mxu1 }
 0x23d   : > { %v1009_v50 = vpack.c.bf16 %v997_v46, %v994_v43 }
 0x23e   : > { %v999_v51 = vpop.f32.mrf.mxu1 }
 0x23f   : > { %1023 = vrot.lane.b32.xlu0 %v1009_v50, %s1684_s18 }
 0x241   : > { %v1002_v58 = vpop.f32.mrf.mxu1 }
 0x243   : > { %v1004_v53 = vpop.f32.mrf.mxu1 }
 0x245   : > { %v1005_v54 = vpop.f32.mrf.mxu1 }
 0x246   : > { %v1010_v56 = vpack.c.bf16 %v1005_v54, %v1002_v58 }
 0x247   : > { %v1007_v57 = vpop.f32.mrf.mxu1 }
 0x248   : > { %1025 = vrot.lane.b32.xlu1 %v1010_v56, %s1684_s18 }
 0x2b1   : > { %v1024_v59 = vpop.permute.xlu0 %1023 }
 0x2b2   : > { %v2092_v60 = vsel %vm549_vm0, %v1780_v2, %v1024_v59 }
 0x2b3   : > { %v1035_v12 = vunpack.c.l.bf16 %v2092_v60  ;;  %v1036_v63 = vunpack.c.h.bf16 %v2092_v60 }
 0x2b5   : > { %v1046_v1 = vmul.f32 %v1580_v11, %v1035_v12  ;;  %v1047_v3 = vmul.f32 %v1580_v11, %v1036_v63 }
 0x2b7   : > { %v1057_v5 = vadd.f32 %v1581_v0, %v1046_v1  ;;  %v1058_v6 = vadd.f32 %v1581_v0, %v1047_v3 }
 0x2b9   : > { %v1061_v8 = vmax.f32 %v1057_v5, 0.0  ;;  %v1062_v9 = vmax.f32 %v1058_v6, 0.0 }
 0x2ba   : > { %v1026_v2 = vpop.permute.xlu1 %1025 }
 0x2bb   : > { %v2104_v10 = vsel %vm549_vm0, %v1785_v4, %v1026_v2  ;;  %v1065_v39 = vpack.c.bf16 %v1062_v9, %v1061_v8  ;;  %v1660_v4 = vld [vmem:[%s2289_s12 + $0x38] sm:$0xff]   ;;  %v1666_v8 = vld [vmem:[%s2289_s12 + $0x8] sm:$0xff]  }
 0x2bc   : > { %v1037_v13 = vunpack.c.l.bf16 %v2104_v10  ;;  %v1038_v15 = vunpack.c.h.bf16 %v2104_v10 }
 0x2bd   : > { %1624 = vmatprep.mubr.msk.bf16.mxu0 %vm1079_vm1, %v1065_v39 }
 0x2be   : > { %v1048_v16 = vmul.f32 %v1580_v11, %v1037_v13  ;;  %v1049_v18 = vmul.f32 %v1580_v11, %v1038_v15  ;;  %v1665_v11 = vld [vmem:[%s2289_s12 + $0x10] sm:$0xff]  }
 0x2c0   : > { %v1059_v19 = vadd.f32 %v1581_v0, %v1048_v16  ;;  %v1060_v45 = vadd.f32 %v1581_v0, %v1049_v18 }
 0x2c2   : > { %v1063_v20 = vmax.f32 %v1059_v19, 0.0  ;;  %v1064_v22 = vmax.f32 %v1060_v45, 0.0 }
 0x2c4   : > { %v1066_v24 = vpack.c.bf16 %v1064_v22, %v1063_v20 }
 0x2c6   : > { %1625 = vmatmul.mubr.msk.bf16.vlgmr.msra.gmra.mxu0 %vm1079_vm1, %v1066_v24 }
 0x2c7   : > { %1410 = vmatpush1.bf16.msra.mxu0 %v1660_v4 }
 0x2c8   : > { %1411 = vmatprep.subr.bf16.mxu0 %v1679_v23 }
 0x2cb   : > { %1412 = vmatpush1.bf16.msra.mxu0 %v1661_v25 }
 0x2cc   : > { %1413 = vmatprep.subr.bf16.mxu0 %v1679_v23 }
 0x2cf   : > { %1414 = vmatpush1.bf16.msra.mxu0 %v1662_v7 }
 0x2d0   : > { %1415 = vmatprep.subr.bf16.mxu0 %v1679_v23 }
 0x2d3   : > { %1416 = vmatpush1.bf16.msra.mxu0 %v1663_v26 }
 0x2d4   : > { %1417 = vmatprep.subr.bf16.mxu0 %v1679_v23 }
 0x2d7   : > { %1418 = vmatpush1.bf16.msra.mxu0 %v1664_v52 }
 0x2d8   : > { %1419 = vmatprep.subr.bf16.mxu0 %v1679_v23 }
 0x2db   : > { %1420 = vmatpush1.bf16.msra.mxu0 %v1665_v11 }
 0x2dc   : > { %1421 = vmatprep.subr.bf16.mxu0 %v1679_v23 }
 0x2df   : > { %1422 = vmatpush1.bf16.msra.mxu0 %v1666_v8 }
 0x2e0   : > { %1423 = vmatprep.subr.bf16.mxu0 %v1679_v23 }
 0x2e3   : > { %1424 = vmatpush1.bf16.msra.mxu0 %v1667_v21 }
 0x2e4   : > { %1439 = vmatprep.subr.bf16.mxu0 %v1679_v23 }
 0x2e7   : > { %1440 = vmatpush2.bf16.msra.mxu0 %v1668_v37 }
 0x386   : > { %v1626_v44 = vpop.f32.mrf.mxu0 }
 0x387   : > { %v1148_v28 = vmul.f32 %v1626_v44, %v1586_v27 }
 0x388   : > { %v1124_v33 = vpop.f32.mrf.mxu0 }
 0x389   : > { %v1146_v34 = vmul.f32 %v1586_v27, %v1124_v33  ;;  %v1159_v47 = vadd.f32 %v1587_v32, %v1148_v28 }
 0x38a   : > { %v1627_v40 = vpop.f32.mrf.mxu0 }
 0x38b   : > { %v1149_v48 = vmul.f32 %v1627_v40, %v1586_v27  ;;  %v1157_v49 = vadd.f32 %v1587_v32, %v1146_v34  ;;  %v1163_v51 = vmax.f32 %v1159_v47, 0.0 }
 0x38c   : > { %v1127_v43 = vpop.f32.mrf.mxu0 }
 0x38d   : > { %v1160_v46 = vadd.f32 %v1587_v32, %v1149_v48  ;;  %v1147_v50 = vmul.f32 %v1586_v27, %v1127_v43  ;;  %v1161_v53 = vmax.f32 %v1157_v49, 0.0 }
 0x38f   : > { %v1164_v58 = vmax.f32 %v1160_v46, 0.0  ;;  %v1158_v14 = vadd.f32 %v1587_v32, %v1147_v50 }
 0x391   : > { %v1166_v55 = vpack.c.bf16 %v1164_v58, %v1163_v51  ;;  %v1162_v54 = vmax.f32 %v1158_v14, 0.0 }
 0x393   : > { %v1176_v56 = vshrl.u32 %v1166_v55, 16  ;;  %v1179_v57 = vshll.u32 %v1166_v55, 16  ;;  %v1165_v59 = vpack.c.bf16 %v1162_v54, %v1161_v53 }
 0x395   : > { %v1178_v12 = vrot.slane %v1176_v56, 3  ;;  %v1181_v63 = vrot.slane %v1179_v57, 4  ;;  %v1168_v0 = vshrl.u32 %v1165_v59, 16  ;;  %v1171_v1 = vshll.u32 %v1165_v59, 16 }
 0x397   : > { %v1182_v3 = vor.u32 %v1181_v63, %v1178_v12  ;;  %v1170_v5 = vrot.slane %v1168_v0, 3  ;;  %v1173_v6 = vrot.slane %v1171_v1, 4 }
 0x399   : > { %v2145_v9 = vsel %vm1891_vm5, %v1182_v3, 0  ;;  %v1174_v2 = vor.u32 %v1173_v6, %v1170_v5 }
 0x39a   : > { %v2150_v39 = vsel %vm2341_vm9, %v2145_v9, 0  ;;  %v1193_v23 = vsel %vm1999_vm3, %v2145_v9, 0  ;;  %v1220_v56 = vshll.u32 %v2145_v9, 16  ;;  %v1259_v12 = vshrl.u32 %v2145_v9, 16 }
 0x39b   : > { %v2153_v13 = vsel %vm2342_vm14, %v1174_v2, %v1182_v3  ;;  %v2157_v15 = vsel %vm1891_vm5, 0, %v1174_v2  ;;  %v1296_v16 = vrot.slane %v2150_v39, 1  ;;  %vm2343_vm5 = vmmov %vm2341_vm9  ;;  %vm2346_vm9 = vcmask 1043456  }
 0x39c   : > { %v1200_v18 = vsel %vm1906_vm8, %v2153_v13, 0  ;;  %v1202_v19 = vsel %vm1895_vm6, %v2153_v13, 0  ;;  %v1194_v45 = vsel %vm1910_vm10, %v2157_v15, 0  ;;  %v1195_v29 = vsel %vm1925_vm12, %v2153_v13, 0 }
 0x39d   : > { %1283 = vrot.lane.b32.xlu1 %v1200_v18, %s1680_s24  ;;  %v1295_v20 = vrot.slane %v1202_v19, 1  ;;  %v1243_v22 = vrot.slane %v1194_v45, 4  ;;  %v1244_v24 = vrot.slane %v1195_v29, 4  ;;  %v1191_v4 = vsel %vm1895_vm6, %v2157_v15, 0 }
 0x39e   : > { %v1192_v25 = vsel %vm2343_vm5, %v2153_v13, 0  ;;  %v1231_v7 = vrot.slane %v1191_v4, 1  ;;  %v1197_v36 = vsel %vm1929_vm13, %v2157_v15, 0  ;;  %vm2344_vm10 = vcmp.ne.s16.totalorder %v1902_v31, 0  ;;  %vm2349_vm13 = vmmov %vm2346_vm9 }
 0x39f   : > { %v1198_v41 = vsel %vm2344_vm10, %v2153_v13, 0  ;;  %vm2345_vm12 = vcmask 1046528   ;;  %v1245_v30 = vsel %vm2346_vm9, %v1243_v22, %v1244_v24  ;;  %v1232_v27 = vrot.slane %v1192_v25, 1 }
 0x3a0   : > { %v1297_v26 = vsel %vm2345_vm12, %v1295_v20, %v1296_v16  ;;  %v1272_v44 = vrot.slane %v1197_v36, 5  ;;  %1248 = vrot.lane.b32.xlu0 %v1245_v30, %s1682_s14  ;;  %v1273_v42 = vrot.slane %v1198_v41, 5  ;;  %v1196_v31 = vsel %vm1914_vm11, %v2145_v9, 0  ;;  %vm2347_vm6 = vmmov %vm2345_vm12 }
 0x3a1   : > { %1597 = vmatprep.mubr.msk.bf16.mxu0 %vm549_vm0, %v1297_v26  ;;  %v1205_v28 = vshrl.u32 %v2157_v15, 16  ;;  %v1207_v32 = vshll.u32 %v2157_v15, 16  ;;  %v1233_v33 = vsel %vm2347_vm6, %v1231_v7, %v1232_v27  ;;  %v1212_v34 = vshll.u32 %v2153_v13, 16  ;;  %vm2352_vm10 = vmmov %vm2347_vm6 }
 0x3a2   : > { %v1216_v40 = vshrl.u32 %v2153_v13, 16  ;;  %1236 = vrot.lane.b32.xlu1 %v1233_v33, %s1681_s30  ;;  %vm2348_vm11 = vcmask 1042432   ;;  %v1246_v46 = vrot.slane %v1196_v31, 4  ;;  %vm2350_vm14 = vsmask.f32 7424 }
 0x3a3   : > { %v1209_v47 = vrot.slane %v1207_v32, 1  ;;  %v1252_v48 = vrot.slane %v1205_v28, 4  ;;  %v1253_v43 = vrot.slane %v1207_v32, 5  ;;  %v1274_v49 = vsel %vm2348_vm11, %v1272_v44, %v1273_v42  ;;  %vm2354_vm12 = vmmov %vm2350_vm14 }
 0x3a4   : > { %v1255_v50 = vrot.slane %v1216_v40, 4  ;;  %v1256_v51 = vrot.slane %v1212_v34, 5  ;;  %1277 = vrot.lane.b32.xlu0 %v1274_v49, %s1683_s17  ;;  %v1247_v14 = vsel %vm2349_vm13, %v1244_v24, %v1246_v46  ;;  %v1214_v52 = vrot.slane %v1212_v34, 1  ;;  %vm2355_vm9 = vmmov %vm2348_vm11 }
 0x3a5   : > { %v1210_v58 = vor.u32 %v1209_v47, %v1205_v28  ;;  %v1254_v53 = vor.u32 %v1253_v43, %v1252_v48  ;;  %vm2351_vm5 = vsmask.f32 3328  ;;  %v1234_v59 = vrot.slane %v1193_v23, 1  ;;  %vm2357_vm11 = vmmov %vm2354_vm12 }
 0x3a6   : > { %v1257_v55 = vor.u32 %v1256_v51, %v1255_v50  ;;  %1250 = vrot.lane.b32.xlu1 %v1247_v14, %s1682_s14  ;;  %v1218_v11 = vor.u32 %v1216_v40, %v1214_v52  ;;  %v1222_v0 = vrot.slane %v1220_v56, 1  ;;  %vm2353_vm3 = vnez %v2333_v38  ;;  %vm2356_vm6 = vmmov %vm2351_vm5 }
 0x3a7   : > { %v1215_v54 = vsel %vm2350_vm14, %v1210_v58, %v1214_v52  ;;  %v1235_v63 = vsel %vm2352_vm10, %v1232_v27, %v1234_v59  ;;  %v1199_v17 = vsel %vm2353_vm3, %v2145_v9, 0  ;;  %v1261_v3 = vrot.slane %v1259_v12, 4 }
 0x3a8   : > { %1224 = vrot.lane.b32.xlu0 %v1215_v54, %s1684_s18  ;;  %v1258_v57 = vsel %vm2351_vm5, %v1254_v53, %v1257_v55  ;;  %v1223_v1 = vsel %vm2354_vm12, %v1218_v11, %v1222_v0  ;;  %v1262_v5 = vrot.slane %v1220_v56, 5  ;;  %v1275_v6 = vrot.slane %v1199_v17, 5 }
 0x3a9   : > { %v1287_v18 = vor.u32 %v1259_v12, %v1222_v0  ;;  %v1201_v45 = vsel %vm2043_vm7, %v2145_v9, 0  ;;  %v1189_v25 = vsel %vm1906_vm8, %v2157_v15, 0  ;;  %vm2358_vm13 = vcmask 261120  }
 0x3aa   : > { %1265 = vrot.lane.b32.xlu1 %v1258_v57, %s1685_s19  ;;  %v1276_v8 = vsel %vm2355_vm9, %v1273_v42, %v1275_v6  ;;  %v1263_v2 = vor.u32 %v1262_v5, %v1261_v3  ;;  %vm2359_vm14 = vcmask 654336   ;;  %v1190_v42 = vsel %vm2043_vm7, %v2153_v13, 0  ;;  %vm2361_vm5 = vmmov %vm2358_vm13 }
 0x3ab   : > { %v1288_v38 = vsel %vm2357_vm11, %v1287_v18, %v2040_v61  ;;  %vm2360_vm8 = vcmask 785408   ;;  %v1298_v33 = vsel %vm2352_vm10, %v1296_v16, %v2040_v61  ;;  %vm2362_vm7 = vmmov %vm2359_vm14 }
 0x3ac   : > { %1238 = vrot.lane.b32.xlu0 %v1235_v63, %s1681_s30  ;;  %v1264_v19 = vsel %vm2356_vm6, %v1257_v55, %v1263_v2  ;;  %vm2363_vm3 = vmmov %vm2360_vm8  ;;  %s2364_s30 = sshll.u32 %s2366_s26, 4 }
 0x3ae   : > { %1226 = vrot.lane.b32.xlu1 %v1223_v1, %s1684_s18  ;;  %s440_s18 = scalar_lea.vmem %s2290_s13, %s2364_s30 }
 0x3b0   : > { %1289 = vrot.lane.b32.xlu0 %v1223_v1, %s1686_s20 }
 0x3b2   : > { %1279 = vrot.lane.b32.xlu1 %v1276_v8, %s1683_s17 }
 0x3b4   : > { %1267 = vrot.lane.b32.xlu0 %v1264_v19, %s1685_s19 }
 0x3b6   : > { %1291 = vrot.lane.b32.xlu1 %v1288_v38, %s1686_s20 }
 0x3b8   : > { %1285 = vrot.lane.b32.xlu0 %v1201_v45, %s1680_s24  ;;  %s1687_s24 = smov 24  }
 0x40f   : > { %v1284_v29 = vpop.permute.xlu1 %1283 }
 0x412   : > { %v1249_v20 = vpop.permute.xlu0 %1248 }
 0x414   : > { %v1237_v22 = vpop.permute.xlu1 %1236 }
 0x416   : > { %v1278_v24 = vpop.permute.xlu0 %1277 }
 0x418   : > { %v1251_v4 = vpop.permute.xlu1 %1250 }
 0x41a   : > { %v1225_v7 = vpop.permute.xlu0 %1224 }
 0x41b   : > { %v1301_v36 = vsel %vm549_vm0, %v1189_v25, %v1225_v7 }
 0x41c   : > { %v1306_v41 = vsel %vm2358_vm13, %v1301_v36, %v1237_v22  ;;  %v1266_v26 = vpop.permute.xlu1 %1265 }
 0x41d   : > { %v1310_v30 = vsel %vm855_vm4, %v1306_v41, %v1249_v20 }
 0x41e   : > { %v1314_v9 = vsel %vm860_vm2, %v1310_v30, %v1266_v26  ;;  %v1239_v27 = vpop.permute.xlu0 %1238 }
 0x41f   : > { %v1318_v44 = vsel %vm2359_vm14, %v1314_v9, %v1278_v24 }
 0x420   : > { %v1227_v21 = vpop.permute.xlu1 %1226  ;;  %v1322_v31 = vsel %vm2360_vm8, %v1318_v44, %v1284_v29 }
 0x421   : > { %v1304_v35 = vsel %vm549_vm0, %v1190_v42, %v1227_v21 }
 0x422   : > { %v1290_v15 = vpop.permute.xlu0 %1289  ;;  %v1308_v28 = vsel %vm2361_vm5, %v1304_v35, %v1239_v27 }
 0x423   : > { %v1326_v32 = vsel %vm875_vm15, %v1322_v31, %v1290_v15  ;;  %v1312_v13 = vsel %vm855_vm4, %v1308_v28, %v1251_v4 }
 0x424   : > { %1442 = vmatmul.mubr.bf16.vlgmr.msra.gmra.mxu0 %v1326_v32  ;;  %v1280_v34 = vpop.permute.xlu1 %1279 }
 0x425   : > { %1598 = vmatprep.mubr.msk.bf16.mxu0 %vm549_vm0, %v1298_v33  ;;  %vm1484_vm0 = vcmask 257024  }
 0x426   : > { %v1268_v62 = vpop.permute.xlu0 %1267 }
 0x427   : > { %v1316_v40 = vsel %vm860_vm2, %v1312_v13, %v1268_v62 }
 0x428   : > { %v1320_v48 = vsel %vm2362_vm7, %v1316_v40, %v1280_v34  ;;  %v1292_v43 = vpop.permute.xlu1 %1291 }
 0x42a   : > { %v1286_v47 = vpop.permute.xlu0 %1285 }
 0x42b   : > { %v1324_v37 = vsel %vm2363_vm3, %v1320_v48, %v1286_v47 }
 0x42c   : > { %v1329_v49 = vsel %vm875_vm15, %v1324_v37, %v1292_v43 }
 0x42d   : > { %1450 = vmatmul.mubr.bf16.gmra.mxu0 %v1329_v49 }
 0x4e4   : > { %v1443_v39 = vpop.f32.mrf.mxu0 }
 0x4e6   : > { %v1445_v61 = vpop.f32.mrf.mxu0 }
 0x4e8   : > { %v1446_v16 = vpop.f32.mrf.mxu0 }
 0x4e9   : > { %v1458_v46 = vpack.c.bf16 %v1446_v16, %v1443_v39 }
 0x4ea   : > { %v1448_v50 = vpop.f32.mrf.mxu0 }
 0x4eb   : > { %1462 = vrot.lane.b32.xlu0 %v1458_v46, %s1687_s24 }
 0x4ed   : > { %v1451_v51 = vpop.f32.mrf.mxu0 }
 0x4ef   : > { %v1453_v58 = vpop.f32.mrf.mxu0 }
 0x4f1   : > { %v1454_v14 = vpop.f32.mrf.mxu0 }
 0x4f2   : > { %v1459_v52 = vpack.c.bf16 %v1454_v14, %v1451_v51 }
 0x4f3   : > { %v1456_v53 = vpop.f32.mrf.mxu0 }
 0x4f4   : > { %1464 = vrot.lane.b32.xlu1 %v1459_v52, %s1687_s24 }
 0x55d   : > { %v1463_v55 = vpop.permute.xlu0 %1462 }
 0x55e   : > { %v1467_v23 = vsel %vm1079_vm1, %v2092_v60, %v1463_v55 }
 0x55f   : > { %v1599_v54 = vcombine.low %v1467_v23, %v1467_v23  ;;  %v1600_v56 = vcombine.high %v1467_v23, %v1467_v23 }
 0x561   : > { %1485 = vst.msk [vmem:[%s440_s18] sm:$0xf] %vm1484_vm0, %v1599_v54  ;;  %1486 = vst.msk [vmem:[%s440_s18 + $0x4] sm:$0xf] %vm1484_vm0, %v1600_v56 }
 0x566   : > { %v1465_v57 = vpop.permute.xlu1 %1464 }
 0x567   : > { %v1469_v59 = vsel %vm1079_vm1, %v2104_v10, %v1465_v57 }
 0x568   : > { %v1601_v11 = vcombine.low %v1469_v59, %v1469_v59  ;;  %v1602_v12 = vcombine.high %v1469_v59, %v1469_v59 }
 0x56a   : > { %1487 = vst.msk [vmem:[%s440_s18 + $0x8] sm:$0xf] %vm1484_vm0, %v1601_v11  ;;  %1488 = vst.msk [vmem:[%s440_s18 + $0xc] sm:$0xf] %vm1484_vm0, %v1602_v12 }
 0x56b PF: > { %s23_s25 = sadd.s32 1, %s1677_s25  }
 0x56c   : > { %p20_p4 = scmp.ge.s32.totalorder %s23_s25, 8  }
 0x56e   :  { %22 = sbr.rel (!%p20_p4) target bundleno = 1 (0x1), region = 102 }

// kernel: _lambda_.9
= control target key start
LH: loop header
LB: loop body
LE: loop exit
PB: predicated region body
PF: predicated region fallthrough
CT: control target
= control target key end

     0   :  { %s1318_s25 = smov 0   ;;  %s1575_s0 = inlined_call_operand.vmem [shape: bf16[6,8,16], index: 0, kind: input, shape index: {}]   ;;  %s1576_s1 = inlined_call_operand.vmem [shape: f32[1,16], index: 1, kind: input, shape index: {}, may-alias: {1,4,10}]   ;;  %s1577_s2 = inlined_call_operand.vmem [shape: f32[1,16], index: 2, kind: input, shape index: {}, may-alias: {2,5,11}]   ;;  %s1578_s3 = inlined_call_operand.vmem [shape: bf16[16,16], index: 3, kind: input, shape index: {}]   ;;  %s1579_s4 = inlined_call_operand.vmem [shape: f32[1,16], index: 4, kind: input, shape index: {}, may-alias: {1,4,10}]   ;;  %s1580_s5 = inlined_call_operand.vmem [shape: f32[1,16], index: 5, kind: input, shape index: {}, may-alias: {2,5,11}]   ;;  %s1581_s6 = inlined_call_operand.vmem [shape: bf16[144,8], index: 6, kind: input, shape index: {}]   ;;  %s1582_s7 = inlined_call_operand.vmem [shape: f32[1,24], index: 7, kind: input, shape index: {}]   ;;  %s1583_s8 = inlined_call_operand.vmem [shape: f32[1,24], index: 8, kind: input, shape index: {}]   ;;  %s1584_s9 = inlined_call_operand.vmem [shape: bf16[24,16], index: 9, kind: input, shape index: {}]   ;;  %s1585_s10 = inlined_call_operand.vmem [shape: f32[1,16], index: 10, kind: input, shape index: {}, may-alias: {1,4,10}]   ;;  %s1586_s11 = inlined_call_operand.vmem [shape: f32[1,16], index: 11, kind: input, shape index: {}, may-alias: {2,5,11}]   ;;  %s1587_s12 = inlined_call_operand.vmem [shape: bf16[144,8], index: 12, kind: input, shape index: {}]   ;;  %s1588_s13 = inlined_call_operand.vmem [shape: bf16[6,8,32], index: 13, kind: output, shape index: {}]  }
   0x1 LB: > { %s1126_s26 = sadd.s32 4294967295, %s1235_s25   ;;  %p1130_p0 = scmp.ge.s32.totalorder %s1235_s25, 1  ;;  %s1235_s25 = sphi %s1318_s25, %s23_s25  }
   0x2   : > { %p386_p1 = scmp.lt.s32.totalorder %s1235_s25, 7 }
   0x4   : > { %p387_p2 = pnand %p1130_p0, %p386_p1 }
   0x5   : > { %p428_p3 = scmp.lt.s32.totalorder (!%p387_p2), %s1126_s26, 5  ;;  %s1240_s14 = smov (!%p387_p2), 48  }
   0x6   : > { %390 = sbr.rel (%p387_p2) target bundleno = 1338 (0x53a), region = 72  ;;  %s1241_s15 = smov (!%p387_p2), 32  }
   0x7   : > { %s1242_s16 = smov (!%p387_p2), 64   ;;  %s1244_s18 = smov (!%p387_p2), 96  }
   0x8   : > { %s1245_s19 = smov (!%p387_p2), 80   ;;  %s1246_s20 = smov (!%p387_p2), 112  }
   0xb   : > { %v1208_v0 = vld [vmem:[%s1578_s3] sm:$0xff]   ;;  %v1237_v1 = vmov 0.0   ;;  %vm1238_vm0 = vmmov 0   ;;  %s1610_s26 = smov (!%p428_p3, %s1126_s26), 5  ;;  %vm483_vm1 = vcmask 130048   ;;  %v1239_v10 = vmov 0  }
   0xc   : > { %1175 = vmatprep.subr.bf16.mxu1 %v1237_v1  ;;  %1181 = vmatprep.subr.bf16.mxu0 %v1237_v1  ;;  %s1591_s29 = sshll.u32 %s1610_s26, 2  ;;  %v1133_v2 = vld [vmem:[%s1576_s1] ss:$0 sm:$0xff]  ;;  %v1209_v11 = vld [vmem:[%s1581_s6 + $0x38] sm:$0xff]   ;;  %v1210_v12 = vld [vmem:[%s1581_s6 + $0x30] sm:$0xff]   ;;  %v439_v17 = vlaneseq  ;;  %vm554_vm6 = vcmask 1042432  }
   0xd   : > { %1176 = vmatpush3.bf16.msra.mxu1 %v1208_v0  ;;  %1177 = vmatprep.mubr.msk.bf16.mxu1 %vm1238_vm0, %v1237_v1  ;;  %s431_s17 = scalar_lea.vmem %s1575_s0, %s1591_s29  ;;  %v1134_v4 = vld [vmem:[%s1577_s2] ss:$0 sm:$0xff]  ;;  %v1211_v13 = vld [vmem:[%s1581_s6 + $0x28] sm:$0xff]   ;;  %v1213_v15 = vld [vmem:[%s1581_s6 + $0x18] sm:$0xff]   ;;  %vm555_vm7 = vsmask.f32 2304 }
   0xe   : > { %1185 = vmatprep.mubr.msk.bf16.mxu0 %vm1238_vm0, %v1237_v1  ;;  %v1344_v3 = vld [vmem:[%s431_s17] sm:$0xf]  ;;  %732 = vmatprep.subr.bf16.mxu1 %v1239_v10  ;;  %v1214_v16 = vld [vmem:[%s1581_s6 + $0x10] sm:$0xff]   ;;  %v440_v18 = vshrl.u32 %v439_v17, 7  ;;  %v1215_v34 = vld [vmem:[%s1581_s6 + $0x8] sm:$0xff]   ;;  %vm558_vm8 = vcmask 1046528  }
   0xf   : > { %v456_v5 = vunpack.c.l.bf16 %v1344_v3  ;;  %v1212_v14 = vld [vmem:[%s1581_s6 + $0x20] sm:$0xff]   ;;  %vm559_vm9 = vsmask.f32 6400  ;;  %vm1398_vm10 = vmand %vm554_vm6, %vm555_vm7  ;;  %v1430_v53 = vrot.slane %v1239_v10, 5  ;;  %s1243_s17 = smov 16   ;;  %vm644_vm7 = vcmask 523264  }
  0x10   : > { %v445_v19 = vand.u32 3, %v440_v18  ;;  %v1137_v20 = vld [vmem:[%s1579_s4] ss:$0 sm:$0xff]  ;;  %vm1405_vm11 = vmand %vm558_vm8, %vm559_vm9  ;;  %vm647_vm8 = vcmask 654336   ;;  %vm650_vm9 = vcmask 785408  }
  0x11   : > { %v464_v6 = vmul.f32 %v1133_v2, %v456_v5  ;;  %v1138_v23 = vld [vmem:[%s1580_s5] ss:$0 sm:$0xff] }
  0x12   : > { %vm453_vm2 = vcmp.ne.s32.totalorder %v445_v19, 0  ;;  %vm454_vm3 = vcmp.ne.s32.totalorder %v445_v19, 3  ;;  %v1216_v44 = vld [vmem:[%s1581_s6] sm:$0xff]  }
  0x13   : > { %v472_v7 = vadd.f32 %v1134_v4, %v464_v6  ;;  %vm1379_vm4 = vmpackc.low %vm453_vm2, %vm453_vm2  ;;  %v1217_v51 = vld [vmem:[%s1581_s6 + $0x40] sm:$0xff]   ;;  %vm1589_vm2 = vsmask.f32 3328 }
  0x14   : > { %vm568_vm5 = vmpackc.low %vm454_vm3, %vm454_vm3  ;;  %v575_v27 = vsel %vm1379_vm4, 65537, %v1239_v10  ;;  %vm1590_vm3 = vcmask 261120   ;;  %v1228_v43 = vld [vmem:[%s1587_s12 + $0x40] sm:$0xff]  }
  0x15   : > { %v473_v8 = vmax.f32 %v472_v7, 0.0  ;;  %v569_v28 = vsel %vm568_vm5, 65537, %v1239_v10  ;;  %v1390_v32 = vcombine.low %v575_v27, %v575_v27  ;;  %vm641_vm5 = vcmask 392192  }
  0x16   : > { %v1139_v33 = vcombine.low %v569_v28, %v569_v28 }
  0x17   : > { %v474_v9 = vpack.c.bf16 %v473_v8, %v473_v8  ;;  %v578_v38 = vrot.slane %v1390_v32, 6  ;;  %vm584_vm15 = vcmp.ne.s16.totalorder %v1390_v32, 0 }
  0x18   : > { %v572_v39 = vrot.slane %v1139_v33, 7  ;;  %v586_v40 = vrot.slane %v1139_v33, 3  ;;  %v581_v54 = vrot.slane %v1139_v33, 5 }
  0x19   : > { %1178 = vmatmul.mubr.msk.bf16.vlgmr.msra.gmra.mxu1 %vm483_vm1, %v474_v9  ;;  %vm1409_vm12 = vcmp.ne.s16.totalorder %v578_v38, 0 }
  0x1a   : > { %733 = vmatpush1.bf16.msra.mxu1 %v1209_v11  ;;  %vm1413_vm13 = vcmp.ne.s16.totalorder %v572_v39, 0  ;;  %vm1417_vm14 = vcmp.ne.s16.totalorder %v586_v40, 0  ;;  %vm1443_vm0 = vcmp.ne.s16.totalorder %v581_v54, 0 }
  0x1b   : > { %734 = vmatprep.subr.bf16.mxu1 %v1239_v10 }
  0x1e   : > { %735 = vmatpush1.bf16.msra.mxu1 %v1210_v12 }
  0x1f   : > { %736 = vmatprep.subr.bf16.mxu1 %v1239_v10 }
  0x22   : > { %737 = vmatpush1.bf16.msra.mxu1 %v1211_v13 }
  0x23   : > { %738 = vmatprep.subr.bf16.mxu1 %v1239_v10 }
  0x26   : > { %739 = vmatpush1.bf16.msra.mxu1 %v1212_v14 }
  0x27   : > { %740 = vmatprep.subr.bf16.mxu1 %v1239_v10 }
  0x2a   : > { %741 = vmatpush1.bf16.msra.mxu1 %v1213_v15 }
  0x2b   : > { %742 = vmatprep.subr.bf16.mxu1 %v1239_v10 }
  0x2e   : > { %743 = vmatpush1.bf16.msra.mxu1 %v1214_v16 }
  0x2f   : > { %744 = vmatprep.subr.bf16.mxu1 %v1239_v10 }
  0x32   : > { %745 = vmatpush1.bf16.msra.mxu1 %v1215_v34  ;;  %v1218_v34 = vld [vmem:[%s1584_s9 + $0x8] ss:$0 sps:$4 sm:$0xff]  }
  0x33   : > { %746 = vmatprep.subr.bf16.mxu1 %v1239_v10 }
  0x36   : > { %747 = vmatpush1.bf16.msra.mxu1 %v1216_v44  ;;  %v1151_v44 = vld [vmem:[%s1582_s7] ss:$0 sm:$0xff] }
  0x37   : > { %762 = vmatprep.subr.bf16.mxu1 %v1239_v10 }
  0x3a   : > { %763 = vmatpush2.bf16.msra.mxu1 %v1217_v51 }
  0xd9   : > { %v521_v22 = vpop.f32.mrf.mxu1 }
  0xda   : > { %v534_v24 = vmul.f32 %v1137_v20, %v521_v22 }
  0xdb   : > { %v1179_v25 = vpop.f32.mrf.mxu1 }
  0xdc   : > { %v542_v26 = vadd.f32 %v1138_v23, %v534_v24 }
  0xdd   : > { %v524_v29 = vpop.f32.mrf.mxu1 }
  0xde   : > { %v543_v30 = vmax.f32 %v542_v26, 0.0 }
  0xdf   : > { %v1180_v31 = vpop.f32.mrf.mxu1 }
  0xe0   : > { %v544_v35 = vpack.c.bf16 %v543_v30, %v543_v30 }
  0xe2   : > { %v546_v36 = vshrl.u32 %v544_v35, 16  ;;  %v549_v37 = vshll.u32 %v544_v35, 16 }
  0xe4   : > { %v548_v41 = vrot.slane %v546_v36, 5  ;;  %v551_v42 = vrot.slane %v549_v37, 6  ;;  %v1219_v36 = vld [vmem:[%s1584_s9] sm:$0xff]  }
  0xe6   : > { %v552_v45 = vor.u32 %v551_v42, %v548_v41 }
  0xe8   : > { %v557_v50 = vsel %vm1398_vm10, 0, %v552_v45 }
  0xe9   : > { %v561_v52 = vsel %vm1405_vm11, %v557_v50, 0  ;;  %v1152_v50 = vld [vmem:[%s1583_s8] ss:$0 sm:$0xff] }
  0xea   : > { %v580_v55 = vsel %vm1409_vm12, %v561_v52, 0  ;;  %v574_v56 = vsel %vm1413_vm13, %v561_v52, 0  ;;  %v588_v57 = vsel %vm1417_vm14, %v561_v52, 0  ;;  %v590_v58 = vshrl.u32 %v561_v52, 16 }
  0xeb   : > { %v603_v59 = vrot.slane %v580_v55, 2  ;;  %v599_v60 = vrot.slane %v574_v56, 1  ;;  %v632_v61 = vrot.slane %v588_v57, 5  ;;  %v592_v62 = vshll.u32 %v561_v52, 16  ;;  %v1220_v56 = vld [vmem:[%s1587_s12 + $0x38] sm:$0xff]   ;;  %v1222_v57 = vld [vmem:[%s1587_s12 + $0x28] sm:$0xff]  }
  0xec   : > { %v606_v63 = vrot.slane %v590_v58, 2  ;;  %v585_v8 = vsel %vm584_vm15, %v561_v52, 0  ;;  %v583_v9 = vsel %vm1443_vm0, %v561_v52, 0  ;;  %v620_v11 = vrot.slane %v590_v58, 4 }
  0xed   : > { %604 = vrot.lane.b32.xlu1 %v603_v59, %s1240_s14  ;;  %600 = vrot.lane.b32.xlu0 %v599_v60, %s1241_s15  ;;  %v634_v0 = vsel %vm554_vm6, %v632_v61, %v1430_v53  ;;  %v607_v2 = vrot.slane %v592_v62, 3  ;;  %v594_v4 = vrot.slane %v592_v62, 1  ;;  %v621_v12 = vrot.slane %v592_v62, 5  ;;  %v1224_v59 = vld [vmem:[%s1587_s12 + $0x18] sm:$0xff]   ;;  %v1225_v60 = vld [vmem:[%s1587_s12 + $0x10] sm:$0xff]  }
  0xee   : > { %1150 = vmatprep.mubr.msk.bf16.mxu1 %vm483_vm1, %v634_v0  ;;  %v616_v13 = vrot.slane %v585_v8, 4  ;;  %v612_v14 = vrot.slane %v583_v9, 3  ;;  %v565_v22 = vsel %vm1379_vm4, %v561_v52, 0  ;;  %v1156_v61 = vld [vmem:[%s1585_s10] ss:$0 sm:$0xff]  ;;  %v1226_v9 = vld [vmem:[%s1587_s12 + $0x8] sm:$0xff]  }
  0xef   : > { %v608_v6 = vor.u32 %v607_v2, %v606_v63  ;;  %v595_v7 = vor.u32 %v594_v4, %v590_v58  ;;  %v622_v15 = vor.u32 %v621_v12, %v620_v11  ;;  %v1223_v58 = vld [vmem:[%s1587_s12 + $0x20] sm:$0xff]  }
  0xf0   : > { %v1157_v63 = vld [vmem:[%s1586_s11] ss:$0 sm:$0xff] }
  0xf1   : > { %609 = vrot.lane.b32.xlu1 %v608_v6, %s1242_s16  ;;  %596 = vrot.lane.b32.xlu0 %v595_v7, %s1243_s17  ;;  %v627_v16 = vsel %vm1589_vm2, %v622_v15, %v1430_v53  ;;  %vm653_vm2 = vcmask 916480  }
  0xf5   : > { %617 = vrot.lane.b32.xlu1 %v616_v13, %s1244_s18  ;;  %613 = vrot.lane.b32.xlu0 %v612_v14, %s1245_s19 }
  0xf9   : > { %628 = vrot.lane.b32.xlu0 %v627_v16, %s1246_s20 }
 0x15f   : > { %v605_v17 = vpop.permute.xlu1 %604  ;;  %v601_v18 = vpop.permute.xlu0 %600 }
 0x163   : > { %v610_v19 = vpop.permute.xlu1 %609  ;;  %v597_v20 = vpop.permute.xlu0 %596 }
 0x164   : > { %v637_v23 = vsel %vm483_vm1, %v565_v22, %v597_v20 }
 0x165   : > { %v640_v24 = vsel %vm1590_vm3, %v637_v23, %v601_v18  ;;  %vm815_vm3 = vcmask 1043456  }
 0x166   : > { %v643_v25 = vsel %vm641_vm5, %v640_v24, %v605_v17  ;;  %v817_v35 = vsel %vm815_vm3, %v1218_v34, 0  ;;  %vm811_vm3 = vcmask 195584   ;;  %v1227_v17 = vld [vmem:[%s1587_s12] sm:$0xff]  }
 0x167   : > { %v614_v26 = vpop.permute.xlu0 %613  ;;  %v646_v27 = vsel %vm644_vm7, %v643_v25, %v610_v19  ;;  %v618_v28 = vpop.permute.xlu1 %617  ;;  %1182 = vmatpush3.bf16.msra.mxu0 %v817_v35 }
 0x168   : > { %v649_v29 = vsel %vm647_vm8, %v646_v27, %v614_v26  ;;  %1183 = vmatprep.subr.bf16.mxu0 %v1237_v1 }
 0x169   : > { %v652_v31 = vsel %vm650_vm9, %v649_v29, %v618_v28 }
 0x16b   : > { %v629_v30 = vpop.permute.xlu0 %628  ;;  %1184 = vmatpush3.bf16.msra.mxu0 %v1219_v36 }
 0x16c   : > { %v655_v33 = vsel %vm653_vm2, %v652_v31, %v629_v30  ;;  %1024 = vmatprep.subr.bf16.mxu0 %v1239_v10 }
 0x16d   : > { %765 = vmatmul.mubr.bf16.vlgmr.msra.gmra.mxu1 %v655_v33 }
 0x22d   : > { %v766_v37 = vpop.f32.mrf.mxu1 }
 0x22e   : > { %v772_v38 = vpack.c.bf16 %v766_v37, %v766_v37 }
 0x22f   : > { %v768_v39 = vpop.f32.mrf.mxu1 }
 0x230   : > { %774 = vrot.lane.b32.xlu1 %v772_v38, %s1243_s17 }
 0x231   : > { %v769_v40 = vpop.f32.mrf.mxu1 }
 0x233   : > { %v770_v41 = vpop.f32.mrf.mxu1 }
 0x2a2   : > { %v775_v42 = vpop.permute.xlu1 %774 }
 0x2a3   : > { %v1482_v45 = vsel %vm483_vm1, %v1344_v3, %v775_v42  ;;  %v1221_v3 = vld [vmem:[%s1587_s12 + $0x30] sm:$0xff]  }
 0x2a4   : > { %v780_v1 = vunpack.c.l.bf16 %v1482_v45 }
 0x2a6   : > { %v788_v51 = vmul.f32 %v1151_v44, %v780_v1 }
 0x2a8   : > { %v796_v52 = vadd.f32 %v1152_v50, %v788_v51 }
 0x2aa   : > { %v797_v54 = vmax.f32 %v796_v52, 0.0 }
 0x2ac   : > { %v798_v55 = vpack.c.bf16 %v797_v54, %v797_v54 }
 0x2ae   : > { %1186 = vmatmul.mubr.msk.bf16.vlgmr.msra.gmra.mxu0 %vm811_vm3, %v798_v55 }
 0x2af   : > { %1025 = vmatpush1.bf16.msra.mxu0 %v1220_v56 }
 0x2b0   : > { %1026 = vmatprep.subr.bf16.mxu0 %v1239_v10 }
 0x2b3   : > { %1027 = vmatpush1.bf16.msra.mxu0 %v1221_v3 }
 0x2b4   : > { %1028 = vmatprep.subr.bf16.mxu0 %v1239_v10 }
 0x2b7   : > { %1029 = vmatpush1.bf16.msra.mxu0 %v1222_v57 }
 0x2b8   : > { %1030 = vmatprep.subr.bf16.mxu0 %v1239_v10 }
 0x2bb   : > { %1031 = vmatpush1.bf16.msra.mxu0 %v1223_v58 }
 0x2bc   : > { %1032 = vmatprep.subr.bf16.mxu0 %v1239_v10 }
 0x2bf   : > { %1033 = vmatpush1.bf16.msra.mxu0 %v1224_v59 }
 0x2c0   : > { %1034 = vmatprep.subr.bf16.mxu0 %v1239_v10 }
 0x2c3   : > { %1035 = vmatpush1.bf16.msra.mxu0 %v1225_v60 }
 0x2c4   : > { %1036 = vmatprep.subr.bf16.mxu0 %v1239_v10 }
 0x2c7   : > { %1037 = vmatpush1.bf16.msra.mxu0 %v1226_v9 }
 0x2c8   : > { %1038 = vmatprep.subr.bf16.mxu0 %v1239_v10 }
 0x2cb   : > { %1039 = vmatpush1.bf16.msra.mxu0 %v1227_v17 }
 0x2cc   : > { %1054 = vmatprep.subr.bf16.mxu0 %v1239_v10 }
 0x2cf   : > { %1055 = vmatpush2.bf16.msra.mxu0 %v1228_v43 }
 0x36e   : > { %v853_v62 = vpop.f32.mrf.mxu0 }
 0x36f   : > { %v866_v0 = vmul.f32 %v1156_v61, %v853_v62 }
 0x370   : > { %v1187_v2 = vpop.f32.mrf.mxu0 }
 0x371   : > { %v874_v4 = vadd.f32 %v1157_v63, %v866_v0 }
 0x372   : > { %v856_v6 = vpop.f32.mrf.mxu0 }
 0x373   : > { %v875_v7 = vmax.f32 %v874_v4, 0.0 }
 0x374   : > { %v1188_v8 = vpop.f32.mrf.mxu0 }
 0x375   : > { %v876_v11 = vpack.c.bf16 %v875_v7, %v875_v7 }
 0x377   : > { %v878_v12 = vshrl.u32 %v876_v11, 16  ;;  %v881_v13 = vshll.u32 %v876_v11, 16 }
 0x379   : > { %v880_v14 = vrot.slane %v878_v12, 5  ;;  %v883_v15 = vrot.slane %v881_v13, 6 }
 0x37b   : > { %v884_v16 = vor.u32 %v883_v15, %v880_v14 }
 0x37d   : > { %v886_v18 = vsel %vm1398_vm10, 0, %v884_v16  ;;  %vm1607_vm10 = vcmask 261120  }
 0x37e   : > { %v887_v19 = vsel %vm1405_vm11, %v886_v18, 0 }
 0x37f   : > { %v890_v20 = vsel %vm1409_vm12, %v887_v19, 0  ;;  %v889_v22 = vsel %vm1413_vm13, %v887_v19, 0  ;;  %v893_v23 = vsel %vm1417_vm14, %v887_v19, 0  ;;  %v895_v24 = vshrl.u32 %v887_v19, 16 }
 0x380   : > { %v908_v25 = vrot.slane %v890_v20, 2  ;;  %v904_v46 = vrot.slane %v889_v22, 1  ;;  %v931_v26 = vrot.slane %v893_v23, 5  ;;  %v897_v27 = vshll.u32 %v887_v19, 16 }
 0x381   : > { %v911_v28 = vrot.slane %v895_v24, 2  ;;  %v891_v30 = vsel %vm1443_vm0, %v887_v19, 0  ;;  %v892_v31 = vsel %vm584_vm15, %v887_v19, 0  ;;  %v924_v33 = vrot.slane %v895_v24, 4 }
 0x382   : > { %909 = vrot.lane.b32.xlu0 %v908_v25, %s1240_s14  ;;  %905 = vrot.lane.b32.xlu1 %v904_v46, %s1241_s15  ;;  %v932_v47 = vsel %vm554_vm6, %v931_v26, %v1430_v53  ;;  %v899_v48 = vrot.slane %v897_v27, 1  ;;  %v912_v49 = vrot.slane %v897_v27, 3  ;;  %v925_v34 = vrot.slane %v897_v27, 5  ;;  %s1247_s14 = smov 24   ;;  %s1608_s15 = sshll.u32 %s1610_s26, 2 }
 0x383   : > { %1167 = vmatprep.mubr.msk.bf16.mxu0 %vm483_vm1, %v932_v47  ;;  %v917_v35 = vrot.slane %v891_v30, 3  ;;  %v921_v36 = vrot.slane %v892_v31, 4  ;;  %vm1606_vm6 = vsmask.f32 3328  ;;  %v888_v40 = vsel %vm1379_vm4, %v887_v19, 0 }
 0x384   : > { %v900_v10 = vor.u32 %v899_v48, %v895_v24  ;;  %v913_v29 = vor.u32 %v912_v49, %v911_v28  ;;  %v926_v37 = vor.u32 %v925_v34, %v924_v33 }
 0x386   : > { %901 = vrot.lane.b32.xlu0 %v900_v10, %s1243_s17  ;;  %914 = vrot.lane.b32.xlu1 %v913_v29, %s1242_s16  ;;  %v927_v5 = vsel %vm1606_vm6, %v926_v37, %v1430_v53 }
 0x38a   : > { %918 = vrot.lane.b32.xlu0 %v917_v35, %s1245_s19  ;;  %922 = vrot.lane.b32.xlu1 %v921_v36, %s1244_s18  ;;  %s435_s18 = scalar_lea.vmem %s1588_s13, %s1608_s15 }
 0x38e   : > { %928 = vrot.lane.b32.xlu0 %v927_v5, %s1246_s20 }
 0x3f4   : > { %v910_v32 = vpop.permute.xlu0 %909  ;;  %v906_v38 = vpop.permute.xlu1 %905 }
 0x3f8   : > { %v902_v39 = vpop.permute.xlu0 %901  ;;  %v915_v41 = vpop.permute.xlu1 %914 }
 0x3f9   : > { %v935_v42 = vsel %vm483_vm1, %v888_v40, %v902_v39  ;;  %vm1071_vm1 = vcmask 257024  }
 0x3fa   : > { %v937_v44 = vsel %vm1607_vm10, %v935_v42, %v906_v38 }
 0x3fb   : > { %v939_v1 = vsel %vm641_vm5, %v937_v44, %v910_v32 }
 0x3fc   : > { %v941_v50 = vsel %vm644_vm7, %v939_v1, %v915_v41  ;;  %v919_v51 = vpop.permute.xlu0 %918  ;;  %v923_v52 = vpop.permute.xlu1 %922 }
 0x3fd   : > { %v943_v53 = vsel %vm647_vm8, %v941_v50, %v919_v51 }
 0x3fe   : > { %v945_v54 = vsel %vm650_vm9, %v943_v53, %v923_v52 }
 0x400   : > { %v929_v55 = vpop.permute.xlu0 %928 }
 0x401   : > { %v947_v21 = vsel %vm653_vm2, %v945_v54, %v929_v55 }
 0x402   : > { %1057 = vmatmul.mubr.bf16.vlgmr.msra.gmra.mxu0 %v947_v21 }
 0x4c2   : > { %v1058_v56 = vpop.f32.mrf.mxu0 }
 0x4c3   : > { %v1064_v3 = vpack.c.bf16 %v1058_v56, %v1058_v56 }
 0x4c4   : > { %v1060_v57 = vpop.f32.mrf.mxu0 }
 0x4c5   : > { %1066 = vrot.lane.b32.xlu1 %v1064_v3, %s1247_s14 }
 0x4c6   : > { %v1061_v58 = vpop.f32.mrf.mxu0 }
 0x4c8   : > { %v1062_v59 = vpop.f32.mrf.mxu0 }
 0x537   : > { %v1067_v60 = vpop.permute.xlu1 %1066 }
 0x538   : > { %v1069_v61 = vsel %vm811_vm3, %v1482_v45, %v1067_v60 }
 0x539   : > { %1072 = vst.msk [vmem:[%s435_s18] sm:$0xf] %vm1071_vm1, %v1069_v61 }
 0x53a PF: > { %s23_s25 = sadd.s32 1, %s1235_s25  }
 0x53b   : > { %p20_p4 = scmp.ge.s32.totalorder %s23_s25, 8  }
 0x53d   :  { %22 = sbr.rel (!%p20_p4) target bundleno = 1 (0x1), region = 102 }

// kernel: _lambda_.10
= control target key start
LH: loop header
LB: loop body
LE: loop exit
PB: predicated region body
PF: predicated region fallthrough
CT: control target
= control target key end

     0   :  { %v255_v0 = vmov 0.0   ;;  %vm256_vm0 = vmmov 0   ;;  %vm64_vm1 = vcmask 261120   ;;  %vm131_vm2 = vcmask 1041409   ;;  %s327_s3 = inlined_call_operand.vmem [shape: f32[32,10], index: 3, kind: input, shape index: {}]   ;;  %s328_s0 = inlined_call_operand.vmem [shape: bf16[6,8,32], index: 0, kind: input, shape index: {}]   ;;  %s329_s1 = inlined_call_operand.vmem [shape: f32[1,32], index: 1, kind: input, shape index: {}]   ;;  %s330_s2 = inlined_call_operand.vmem [shape: f32[1,32], index: 2, kind: input, shape index: {}]   ;;  %s331_s4 = inlined_call_operand.vmem [shape: f32[1,10], index: 4, kind: input, shape index: {}]   ;;  %s332_s5 = inlined_call_operand.vmem [shape: f32[6,10], index: 5, kind: output, shape index: {}]  }
   0x1   :  { %242 = vmatprep.subr.mxu0 %v255_v0  ;;  %v117_v1 = vld [vmem:[%s327_s3 + $0x18] sm:$0xff]  ;;  %v116_v2 = vld [vmem:[%s327_s3 + $0x10] sm:$0xff]  ;;  %250 = vmatprep.mubr.msk.f32.mxu0 %vm256_vm0, %v255_v0  ;;  %v224_v3 = vld [vmem:[%s328_s0] sm:$0xff]   ;;  %vm133_vm3 = vcmask 1042434   ;;  %vm135_vm4 = vcmask 1043459   ;;  %vm137_vm5 = vcmask 1044484  }
   0x2   :  { %243 = vmatpush3.msra.mxu0 %v117_v1  ;;  %v235_v4 = vld [vmem:[%s328_s0 + $0x8] sm:$0xff]   ;;  %v225_v6 = vunpack.c.l.bf16 %v224_v3  ;;  %v226_v7 = vunpack.c.h.bf16 %v224_v3  ;;  %v236_v10 = vld [vmem:[%s328_s0 + $0x10] sm:$0xff]   ;;  %v219_v11 = vld [vmem:[%s329_s1] ss:$0 sm:$0xff]  ;;  %vm139_vm6 = vcmask 1045509   ;;  %vm213_vm7 = vcmask 78848  }
   0x3   :  { %244 = vmatprep.subr.mxu0 %v255_v0  ;;  %v115_v5 = vld [vmem:[%s327_s3 + $0x8] sm:$0xff]  ;;  %v229_v8 = vunpack.c.l.bf16 %v235_v4  ;;  %v230_v9 = vunpack.c.h.bf16 %v235_v4  ;;  %v233_v12 = vunpack.c.l.bf16 %v236_v10  ;;  %v234_v13 = vunpack.c.h.bf16 %v236_v10  ;;  %v220_v14 = vld [vmem:[%s330_s2] ss:$0 sm:$0xff] }
   0x4   :  { %245 = vmatpush3.msra.mxu0 %v116_v2  ;;  %v114_v15 = vld [vmem:[%s327_s3] sm:$0xff]  ;;  %v39_v16 = vmul.f32 %v225_v6, %v219_v11  ;;  %v40_v17 = vmul.f32 %v226_v7, %v219_v11 }
   0x5   :  { %246 = vmatprep.subr.mxu0 %v255_v0  ;;  %v41_v18 = vmul.f32 %v229_v8, %v219_v11  ;;  %v42_v19 = vmul.f32 %v230_v9, %v219_v11  ;;  %v43_v20 = vmul.f32 %v233_v12, %v219_v11  ;;  %v44_v21 = vmul.f32 %v234_v13, %v219_v11 }
   0x6   :  { %247 = vmatpush3.msra.mxu0 %v115_v5  ;;  %v52_v22 = vadd.f32 %v220_v14, %v39_v16  ;;  %v53_v23 = vadd.f32 %v220_v14, %v40_v17 }
   0x7   :  { %248 = vmatprep.subr.mxu0 %v255_v0  ;;  %v54_v24 = vadd.f32 %v220_v14, %v41_v18  ;;  %v55_v25 = vadd.f32 %v220_v14, %v42_v19  ;;  %v56_v26 = vadd.f32 %v220_v14, %v43_v20  ;;  %v57_v27 = vadd.f32 %v220_v14, %v44_v21 }
   0x8   :  { %249 = vmatpush3.msra.mxu0 %v114_v15  ;;  %v58_v28 = vmax.f32 %v52_v22, 0.0  ;;  %v59_v29 = vmax.f32 %v53_v23, 0.0  ;;  %v221_v23 = vld [vmem:[%s331_s4] ss:$0 sm:$0xff] }
   0x9   :  { %v60_v30 = vmax.f32 %v54_v24, 0.0  ;;  %v61_v31 = vmax.f32 %v55_v25, 0.0  ;;  %v62_v32 = vmax.f32 %v56_v26, 0.0  ;;  %v63_v33 = vmax.f32 %v57_v27, 0.0 }
   0xa   :  { %v65_v34 = vsel %vm64_vm1, %v58_v28, 0.0  ;;  %v72_v35 = vsel %vm64_vm1, %v59_v29, 0.0 }
   0xb   :  { %v79_v36 = vsel %vm64_vm1, %v60_v30, 0.0  ;;  %v86_v37 = vsel %vm64_vm1, %v61_v31, 0.0  ;;  %v66_v38 = vrot.slane %v65_v34, 4  ;;  %v73_v39 = vrot.slane %v72_v35, 4 }
   0xc   :  { %v80_v40 = vrot.slane %v79_v36, 4  ;;  %v87_v41 = vrot.slane %v86_v37, 4  ;;  %v93_v42 = vsel %vm64_vm1, %v62_v32, 0.0  ;;  %v100_v43 = vsel %vm64_vm1, %v63_v33, 0.0 }
   0xd   :  { %v67_v44 = vadd.f32 %v66_v38, %v65_v34  ;;  %v74_v45 = vadd.f32 %v73_v39, %v72_v35  ;;  %v94_v48 = vrot.slane %v93_v42, 4  ;;  %v101_v49 = vrot.slane %v100_v43, 4 }
   0xe   :  { %v81_v46 = vadd.f32 %v80_v40, %v79_v36  ;;  %v88_v47 = vadd.f32 %v87_v41, %v86_v37 }
   0xf   :  { %v68_v50 = vrot.slane %v67_v44, 2  ;;  %v75_v51 = vrot.slane %v74_v45, 2  ;;  %v95_v54 = vadd.f32 %v94_v48, %v93_v42  ;;  %v102_v55 = vadd.f32 %v101_v49, %v100_v43 }
  0x10   :  { %v82_v52 = vrot.slane %v81_v46, 2  ;;  %v89_v53 = vrot.slane %v88_v47, 2 }
  0x11   :  { %v69_v56 = vadd.f32 %v68_v50, %v67_v44  ;;  %v76_v57 = vadd.f32 %v75_v51, %v74_v45  ;;  %v96_v60 = vrot.slane %v95_v54, 2  ;;  %v103_v61 = vrot.slane %v102_v55, 2 }
  0x12   :  { %v83_v58 = vadd.f32 %v82_v52, %v81_v46  ;;  %v90_v59 = vadd.f32 %v89_v53, %v88_v47 }
  0x13   :  { %v70_v62 = vrot.slane %v69_v56, 1  ;;  %v77_v63 = vrot.slane %v76_v57, 1  ;;  %v97_v2 = vadd.f32 %v96_v60, %v95_v54  ;;  %v104_v3 = vadd.f32 %v103_v61, %v102_v55 }
  0x14   :  { %v84_v0 = vrot.slane %v83_v58, 1  ;;  %v91_v1 = vrot.slane %v90_v59, 1 }
  0x15   :  { %v71_v4 = vadd.f32 %v70_v62, %v69_v56  ;;  %v78_v5 = vadd.f32 %v77_v63, %v76_v57  ;;  %v98_v8 = vrot.slane %v97_v2, 1  ;;  %v105_v9 = vrot.slane %v104_v3, 1 }
  0x16   :  { %v85_v6 = vadd.f32 %v84_v0, %v83_v58  ;;  %v92_v7 = vadd.f32 %v91_v1, %v90_v59 }
  0x17   :  { %v108_v10 = vmul.f32 0.125, %v71_v4  ;;  %v109_v11 = vmul.f32 0.125, %v78_v5  ;;  %v99_v14 = vadd.f32 %v98_v8, %v97_v2  ;;  %v106_v15 = vadd.f32 %v105_v9, %v104_v3 }
  0x18   :  { %v110_v12 = vmul.f32 0.125, %v85_v6  ;;  %v111_v13 = vmul.f32 0.125, %v92_v7 }
  0x19   :  { %v132_v16 = vsel %vm131_vm2, %v109_v11, %v108_v10  ;;  %v112_v17 = vmul.f32 0.125, %v99_v14  ;;  %v113_v18 = vmul.f32 0.125, %v106_v15 }
  0x1a   :  { %v134_v19 = vsel %vm133_vm3, %v110_v12, %v132_v16 }
  0x1b   :  { %v136_v20 = vsel %vm135_vm4, %v111_v13, %v134_v19 }
  0x1c   :  { %v138_v21 = vsel %vm137_vm5, %v112_v17, %v136_v20 }
  0x1d   :  { %v140_v22 = vsel %vm139_vm6, %v113_v18, %v138_v21 }
  0x1e   :  { %251 = vmatmul.mubr.msk.f32.vlgmr.msra.gmra.mxu0 %vm64_vm1, %v140_v22 }
  0xde   :  { %v209_v24 = vpop.f32.mrf.mxu0 }
  0xdf   :  { %v210_v25 = vadd.f32 %v221_v23, %v209_v24 }
  0xe0   :  { %v252_v26 = vpop.f32.mrf.mxu0 }
  0xe1   :  { %214 = vst.msk [vmem:[%s332_s5] sm:$0x3f] %vm213_vm7, %v210_v25 }

// kernel: _lambda_.11
= control target key start
LH: loop header
LB: loop body
LE: loop exit
PB: predicated region body
PF: predicated region fallthrough
CT: control target
= control target key end

     0   :  { %vm17_vm0 = vcmask 75776   ;;  %s631_s0 = inlined_call_operand.vmem [shape: f32[2,3,10], index: 0, kind: input, shape index: {}]   ;;  %s632_s1 = inlined_call_operand.vmem [shape: f32[10,10], index: 1, kind: input, shape index: {}]   ;;  %s633_s2 = inlined_call_operand.vmem [shape: f32[1,10], index: 2, kind: input, shape index: {}]   ;;  %s634_s3 = inlined_call_operand.hbm [shape: f32[2,1,10], index: 3, kind: output, shape index: {}]  }
   0x1   :  { %v15_v0 = vld [vmem:[%s631_s0] sm:$0x7]  ;;  %v16_v1 = vld [vmem:[%s631_s0 + $0x4] sm:$0x7] }
   0x2   :  { %v18_v2 = vsel %vm17_vm0, %v15_v0, -inf }
   0x3   :  { %8 = vsyncpa [#allocation3], 0  ;;  %19 = vmax.xlane.f32.xlu0 %v18_v2  ;;  %v21_v3 = vsel %vm17_vm0, %v16_v1, -inf  ;;  %v95_v14 = vld [vmem:[%s632_s1 + $0x8] sm:$0x3]  ;;  %vm139_vm1 = vcmask 1041408   ;;  %v51_v29 = vlaneseq }
   0x4   :  { %v537_v15 = vmov 0.0   ;;  %v94_v16 = vld [vmem:[%s632_s1] sm:$0xff]  ;;  %vm538_vm2 = vmmov 0   ;;  %v539_v27 = vmov 1966171168   ;;  %vm136_vm3 = vcmask 80896  }
   0x5   :  { %474 = vmatprep.subr.mxu0 %v537_v15  ;;  %478 = vmatprep.mubr.msk.f32.mxu0 %vm538_vm2, %v537_v15  ;;  %v49_v28 = vunpack.c.l.s4 %v539_v27  ;;  %v52_v31 = vshrl.u32 %v51_v29, 7  ;;  %v470_v55 = vld [vmem:[%s633_s2] ss:$0 sm:$0xff]  ;;  %vm366_vm4 = vcmask 1042432   ;;  %vm449_vm5 = vcmask 73728   ;;  %s540_s2 = smov [#allocation2]  }
   0x6   :  { %475 = vmatpush3.msk.msra.mxu0 %vm139_vm1, %v95_v14  ;;  %s457_s20 = sshll.u32 %s540_s2, 4  ;;  %s458_s20 = int_to_ptr.vmem [resolvable:$true] %s457_s20 }
   0x7   :  { %22 = vmax.xlane.f32.xlu0 %v21_v3  ;;  %476 = vmatprep.subr.mxu0 %v537_v15  ;;  %v50_v30 = vunpack.c.0.s8 %v49_v28  ;;  %s515_s21 = scalar_lea.vmem %s458_s20, 32  ;;  %p520_p1 = scmp.lt.s32.totalorder %s458_s20, %s458_s20 }
   0x8   :  { %477 = vmatpush3.msra.mxu0 %v94_v16  ;;  %p516_p0 = scmp.ne.s32.totalorder %s458_s20, %s515_s21  ;;  %p521_p2 = scmp.lt.s32.totalorder %s515_s21, %s515_s21 }
   0x9   :  { %v585_v32 = vsub.s32 %v50_v30, %v52_v31 }
   0xa   :  { %p522_p3 = por %p521_p2, %p520_p1 }
   0xb   :  { %v280_v56 = vrot.slane %v470_v55, %v585_v32 }
   0xc   :  { %p523_p4 = pnand %p522_p3, %p516_p0 }
   0xd   :  { %v281_v59 = vcombine.high %v280_v56, %v280_v56  ;;  %v288_v60 = vrot.slane %v280_v56, %v585_v32 }
   0xf   :  { %v295_v3 = vrot.slane %v281_v59, %v585_v32 }
  0x8c   :  { %v20_v4 = vpop.xlane.xlu0 %19 }
  0x8d   :  { %v24_v5 = vsub.f32 %v15_v0, %v20_v4  ;;  %v296_v4 = vcombine.high %v288_v60, %v288_v60 }
  0x8f   :  { %v26_v6 = vmul.f32 1.442695, %v24_v5 }
  0x90   :  { %v23_v7 = vpop.xlane.xlu0 %22 }
  0x91   :  { %487 = vpow2.f32 %v26_v6  ;;  %v25_v8 = vsub.f32 %v16_v1, %v23_v7 }
  0x93   :  { %v28_v9 = vmul.f32 1.442695, %v25_v8 }
  0x95   :  { %489 = vpow2.f32 %v28_v9 }
  0x9e   :  { %v488_v10 = vpop.eup %487 }
  0x9f   :  { %v30_v11 = vsel %vm17_vm0, %v488_v10, 0.0 }
  0xa0   :  { %31 = vadd.xlane.f32.xlu1 %v30_v11 }
  0xa2   :  { %v490_v12 = vpop.eup %489 }
  0xa3   :  { %v33_v13 = vsel %vm17_vm0, %v490_v12, 0.0 }
  0xa4   :  { %34 = vadd.xlane.f32.xlu1 %v33_v13 }
 0x129   :  { %v32_v17 = vpop.xlane.xlu1 %31 }
 0x12a   :  { %491 = vlog2.f32 %v32_v17 }
 0x12d   :  { %v35_v18 = vpop.xlane.xlu1 %34 }
 0x12e   :  { %493 = vlog2.f32 %v35_v18 }
 0x137   :  { %v492_v19 = vpop.eup %491 }
 0x138   :  { %v37_v20 = vmul.f32 0.6931472, %v492_v19 }
 0x13a   :  { %v579_v21 = vsub.f32 %v24_v5, %v37_v20 }
 0x13b   :  { %v494_v22 = vpop.eup %493 }
 0x13c   :  { %v42_v23 = vmul.f32 1.442695, %v579_v21  ;;  %v39_v24 = vmul.f32 0.6931472, %v494_v22 }
 0x13e   :  { %495 = vpow2.f32 %v42_v23  ;;  %v582_v25 = vsub.f32 %v25_v8, %v39_v24 }
 0x140   :  { %v44_v26 = vmul.f32 1.442695, %v582_v25 }
 0x142   :  { %497 = vpow2.f32 %v44_v26 }
 0x14b   :  { %v496_v33 = vpop.eup %495 }
 0x14c   :  { %v54_v34 = vrot.slane %v496_v33, %v585_v32 }
 0x14e   :  { %v55_v35 = vcombine.high %v54_v34, %v54_v34  ;;  %v62_v36 = vrot.slane %v54_v34, %v585_v32 }
 0x14f   :  { %v498_v37 = vpop.eup %497 }
 0x150   :  { %v69_v38 = vrot.slane %v55_v35, %v585_v32  ;;  %v77_v39 = vrot.slane %v498_v37, %v585_v32  ;;  %v70_v40 = vcombine.high %v62_v36, %v62_v36 }
 0x152   :  { %v78_v41 = vcombine.high %v77_v39, %v77_v39  ;;  %v85_v42 = vrot.slane %v77_v39, %v585_v32  ;;  %v96_v43 = vcombine.low %v62_v36, %v69_v38 }
 0x154   :  { %v92_v44 = vrot.slane %v78_v41, %v585_v32  ;;  %v93_v45 = vcombine.high %v85_v42, %v85_v42  ;;  %v97_v46 = vcombine.low %v70_v40, %v85_v42  ;;  %v105_v48 = vrot.slane %v96_v43, %v585_v32 }
 0x156   :  { %v98_v47 = vcombine.low %v92_v44, %v93_v45  ;;  %v112_v49 = vrot.slane %v97_v46, %v585_v32 }
 0x158   :  { %v119_v50 = vrot.slane %v98_v47, %v585_v32  ;;  %v120_v51 = vcombine.low %v105_v48, %v112_v49 }
 0x15a   :  { %v127_v52 = vrot.slane %v120_v51, %v585_v32  ;;  %v134_v53 = vrot.slane %v119_v50, %v585_v32 }
 0x15c   :  { %v135_v54 = vcombine.low %v127_v52, %v134_v53 }
 0x15e   :  { %479 = vmatmul.mubr.msk.f32.vlgmr.msra.gmra.mxu0 %vm136_vm3, %v135_v54 }
 0x21e   :  { %v209_v57 = vpop.f32.mrf.mxu0 }
 0x21f   :  { %v213_v58 = vmax.f32 %v209_v57, 0.0 }
 0x220   :  { %v480_v61 = vpop.f32.mrf.mxu0 }
 0x221   :  { %v215_v62 = vcombine.high %v213_v58, %v213_v58  ;;  %v222_v63 = vrot.slane %v213_v58, %v585_v32 }
 0x223   :  { %v229_v0 = vrot.slane %v215_v62, %v585_v32  ;;  %v230_v1 = vcombine.high %v222_v63, %v222_v63  ;;  %v238_v2 = vrot.slane %v222_v63, %v585_v32 }
 0x225   :  { %v231_v5 = vcombine.high %v229_v0, %v229_v0  ;;  %v245_v6 = vrot.slane %v229_v0, %v585_v32  ;;  %v252_v7 = vrot.slane %v230_v1, %v585_v32  ;;  %v260_v8 = vcombine.high %v238_v2, %v238_v2 }
 0x226   :  { %v300_v11 = vmul.f32 %v288_v60, %v238_v2 }
 0x227   :  { %v259_v9 = vrot.slane %v231_v5, %v585_v32  ;;  %v261_v10 = vcombine.high %v252_v7, %v252_v7  ;;  %v301_v12 = vmul.f32 %v295_v3, %v252_v7  ;;  %v302_v13 = vmul.f32 %v296_v4, %v260_v8 }
 0x228   :  { %v304_v14 = vmul.f32 %v295_v3, %v245_v6 }
 0x229   :  { %v312_v15 = vcombine.low %v300_v11, %v301_v12  ;;  %v303_v16 = vmul.f32 %v288_v60, %v261_v10  ;;  %v305_v17 = vmul.f32 %v296_v4, %v259_v9  ;;  %v326_v19 = vrot.slane %v302_v13, %v585_v32 }
 0x22b   :  { %v319_v18 = vrot.slane %v312_v15, %v585_v32  ;;  %v335_v20 = vcombine.low %v303_v16, %v304_v14  ;;  %v349_v24 = vrot.slane %v305_v17, %v585_v32 }
 0x22d   :  { %v327_v22 = vcombine.low %v319_v18, %v326_v19  ;;  %v342_v23 = vrot.slane %v335_v20, %v585_v32 }
 0x22f   :  { %v334_v26 = vrot.slane %v327_v22, %v585_v32  ;;  %v350_v27 = vcombine.low %v342_v23, %v349_v24 }
 0x231   :  { %v360_v28 = vsel %vm17_vm0, %v334_v26, 0.0  ;;  %v357_v29 = vrot.slane %v350_v27, %v585_v32 }
 0x232   :  { %361 = vadd.xlane.f32.xlu0 %v360_v28 }
 0x233   :  { %v363_v30 = vsel %vm17_vm0, %v357_v29, 0.0 }
 0x234   :  { %364 = vadd.xlane.f32.xlu1 %v363_v30 }
 0x2bb   :  { %v362_v31 = vpop.xlane.xlu0 %361 }
 0x2bc   :  { %v367_v33 = vsel %vm366_vm4, %v362_v31, -inf }
 0x2bd   :  { %v368_v34 = vrot.slane %v367_v33, 4  ;;  %v365_v35 = vpop.xlane.xlu1 %364 }
 0x2be   :  { %v374_v36 = vsel %vm366_vm4, %v365_v35, -inf }
 0x2bf   :  { %v369_v37 = vmax.f32 %v367_v33, %v368_v34  ;;  %v375_v38 = vrot.slane %v374_v36, 4 }
 0x2c1   :  { %v370_v39 = vrot.slane %v369_v37, 2  ;;  %v376_v40 = vmax.f32 %v374_v36, %v375_v38 }
 0x2c3   :  { %v371_v41 = vmax.f32 %v369_v37, %v370_v39  ;;  %v377_v42 = vrot.slane %v376_v40, 2 }
 0x2c5   :  { %v372_v43 = vrot.slane %v371_v41, 1  ;;  %v378_v32 = vmax.f32 %v376_v40, %v377_v42 }
 0x2c7   :  { %v373_v44 = vmax.f32 %v371_v41, %v372_v43  ;;  %v379_v45 = vrot.slane %v378_v32, 1 }
 0x2c9   :  { %v381_v46 = vsub.f32 %v362_v31, %v373_v44  ;;  %v380_v47 = vmax.f32 %v378_v32, %v379_v45 }
 0x2cb   :  { %v383_v48 = vmul.f32 1.442695, %v381_v46  ;;  %v382_v49 = vsub.f32 %v365_v35, %v380_v47 }
 0x2cd   :  { %499 = vpow2.f32 %v383_v48  ;;  %v385_v50 = vmul.f32 1.442695, %v382_v49 }
 0x2cf   :  { %501 = vpow2.f32 %v385_v50 }
 0x2da   :  { %v500_v51 = vpop.eup %499 }
 0x2db   :  { %v387_v52 = vsel %vm366_vm4, %v500_v51, 0.0 }
 0x2dc   :  { %v502_v53 = vpop.eup %501  ;;  %v388_v54 = vrot.slane %v387_v52, 4 }
 0x2dd   :  { %v394_v55 = vsel %vm366_vm4, %v502_v53, 0.0 }
 0x2de   :  { %v389_v56 = vadd.f32 %v388_v54, %v387_v52  ;;  %v395_v57 = vrot.slane %v394_v55, 4 }
 0x2e0   :  { %v390_v58 = vrot.slane %v389_v56, 2  ;;  %v396_v59 = vadd.f32 %v395_v57, %v394_v55 }
 0x2e2   :  { %v391_v60 = vadd.f32 %v390_v58, %v389_v56  ;;  %v397_v61 = vrot.slane %v396_v59, 2 }
 0x2e4   :  { %v392_v62 = vrot.slane %v391_v60, 1  ;;  %v398_v63 = vadd.f32 %v397_v61, %v396_v59 }
 0x2e6   :  { %v393_v0 = vadd.f32 %v392_v62, %v391_v60  ;;  %v399_v1 = vrot.slane %v398_v63, 1 }
 0x2e8   :  { %503 = vlog2.f32 %v393_v0  ;;  %v400_v2 = vadd.f32 %v399_v1, %v398_v63 }
 0x2ea   :  { %505 = vlog2.f32 %v400_v2 }
 0x2f5   :  { %v504_v3 = vpop.eup %503 }
 0x2f6   :  { %v402_v4 = vmul.f32 0.6931472, %v504_v3 }
 0x2f7   :  { %v506_v5 = vpop.eup %505 }
 0x2f8   :  { %v405_v6 = vsub.f32 %v381_v46, %v402_v4  ;;  %v404_v7 = vmul.f32 0.6931472, %v506_v5 }
 0x2fa   :  { %v407_v8 = vadd.f32 %v405_v6, %v579_v21  ;;  %v406_v9 = vsub.f32 %v382_v49, %v404_v7 }
 0x2fc   :  { %v409_v10 = vsel %vm17_vm0, %v407_v8, -inf  ;;  %v408_v11 = vadd.f32 %v406_v9, %v582_v25 }
 0x2fd   :  { %v410_v12 = vrot.slane %v409_v10, 4 }
 0x2fe   :  { %v416_v13 = vsel %vm17_vm0, %v408_v11, -inf }
 0x2ff   :  { %v411_v14 = vmax.f32 %v409_v10, %v410_v12  ;;  %v417_v15 = vrot.slane %v416_v13, 4 }
 0x301   :  { %v412_v16 = vrot.slane %v411_v14, 2  ;;  %v418_v17 = vmax.f32 %v416_v13, %v417_v15 }
 0x303   :  { %v413_v18 = vmax.f32 %v411_v14, %v412_v16  ;;  %v419_v19 = vrot.slane %v418_v17, 2 }
 0x305   :  { %v414_v20 = vrot.slane %v413_v18, 1  ;;  %v420_v22 = vmax.f32 %v418_v17, %v419_v19 }
 0x307   :  { %v415_v23 = vmax.f32 %v413_v18, %v414_v20  ;;  %v421_v24 = vrot.slane %v420_v22, 1 }
 0x309   :  { %v423_v26 = vsub.f32 %v407_v8, %v415_v23  ;;  %v422_v21 = vmax.f32 %v420_v22, %v421_v24 }
 0x30b   :  { %v425_v27 = vmul.f32 1.442695, %v423_v26  ;;  %v424_v28 = vsub.f32 %v408_v11, %v422_v21 }
 0x30d   :  { %507 = vpow2.f32 %v425_v27  ;;  %v427_v29 = vmul.f32 1.442695, %v424_v28 }
 0x30f   :  { %509 = vpow2.f32 %v427_v29 }
 0x31a   :  { %v508_v25 = vpop.eup %507 }
 0x31b   :  { %v429_v30 = vsel %vm17_vm0, %v508_v25, 0.0 }
 0x31c   :  { %v510_v31 = vpop.eup %509  ;;  %v430_v33 = vrot.slane %v429_v30, 4 }
 0x31d   :  { %v436_v34 = vsel %vm17_vm0, %v510_v31, 0.0 }
 0x31e   :  { %v431_v35 = vadd.f32 %v430_v33, %v429_v30  ;;  %v437_v36 = vrot.slane %v436_v34, 4 }
 0x320   :  { %v432_v37 = vrot.slane %v431_v35, 2  ;;  %v438_v38 = vadd.f32 %v437_v36, %v436_v34 }
 0x322   :  { %v433_v39 = vadd.f32 %v432_v37, %v431_v35  ;;  %v439_v40 = vrot.slane %v438_v38, 2 }
 0x324   :  { %v434_v41 = vrot.slane %v433_v39, 1  ;;  %v440_v42 = vadd.f32 %v439_v40, %v438_v38 }
 0x326   :  { %v435_v43 = vadd.f32 %v434_v41, %v433_v39  ;;  %v441_v32 = vrot.slane %v440_v42, 1 }
 0x328   :  { %v442_v44 = vadd.f32 %v441_v32, %v440_v42  ;;  %511 = vlog2.f32 %v435_v43 }
 0x32a   :  { %513 = vlog2.f32 %v442_v44 }
 0x335   :  { %v512_v45 = vpop.eup %511 }
 0x336   :  { %v444_v46 = vmul.f32 0.6931472, %v512_v45 }
 0x337   :  { %v514_v47 = vpop.eup %513 }
 0x338   :  { %v446_v48 = vmul.f32 0.6931472, %v514_v47  ;;  %v447_v49 = vadd.f32 %v444_v46, %v415_v23 }
 0x33a   :  { %v448_v50 = vadd.f32 %v446_v48, %v422_v21  ;;  %450 = vst.msk [vmem:[#allocation2] sm:$0x1] %vm449_vm5, %v447_v49 }
 0x33c   :  { %451 = vst.msk [vmem:[#allocation2 + $0x1] sm:$0x1] %vm449_vm5, %v448_v50 }
 0x33d   :  { %526 = shalt.err (!%p523_p4)
}
 0x33e   :  { %s541_s22 = smov 16   ;;  %s542_s23 = smov 1  }
 0x33f   :  { %463 = dma.vmem_to_hbm [thread:$0]  %s458_s20, 32, %s634_s3, [#allocation3], %s541_s22, %s541_s22, %s542_s23  }
 0x340   :  { %535 = dma.done.wait [#allocation3], 32  }
 0x341   :  { %536 = vsyncadd [#allocation3], 4294967264 }
 0x342   :  { %467 = vsyncpa [#allocation3], 1 }

</bundles_post_ra>
